<compile_context>
chip_gen: v7x
topology: tpu7x:2x2x1
jax: 0.10.0
libtpu: 0.0.40
codegen_flags: <defaults>
</compile_context>

<pallas_src>
import functools

import jax
import jax.numpy as jnp
from jax.experimental import pallas as pl
from jax.experimental.pallas import tpu as pltpu


# ----------------------------------------------------------------------------
# small math helpers (used inside kernels)
# ----------------------------------------------------------------------------
def _erf(x):
    # Abramowitz & Stegun 7.1.26 (~1.5e-7 abs error); exp/mul only.
    a1, a2, a3, a4, a5 = 0.254829592, -0.284496736, 1.421413741, -1.453152027, 1.061405429
    p = 0.3275911
    s = jnp.where(x >= 0.0, 1.0, -1.0)
    ax = jnp.abs(x)
    t = 1.0 / (1.0 + p * ax)
    poly = ((((a5 * t + a4) * t + a3) * t + a2) * t + a1) * t
    return s * (1.0 - poly * jnp.exp(-ax * ax))


def _gelu(x):
    # exact (erf-based) GELU, matching torch.nn.GELU / F.gelu default
    return 0.5 * x * (1.0 + _erf(x * 0.7071067811865476))


def _layernorm(x, g, b, eps=1e-5):
    mu = jnp.mean(x, axis=-1, keepdims=True)
    var = jnp.mean((x - mu) ** 2, axis=-1, keepdims=True)
    return (x - mu) * jax.lax.rsqrt(var + eps) * g + b


def _softmax_last(s):
    s = s - jnp.max(s, axis=-1, keepdims=True)
    e = jnp.exp(s)
    return e / jnp.sum(e, axis=-1, keepdims=True)


# ----------------------------------------------------------------------------
# VMEM-budget based tile selection
# ----------------------------------------------------------------------------
_ROI_VMEM_BUDGET = 16 * 1024 * 1024
_ENC_VMEM_BUDGET = 16 * 1024 * 1024
_ROI_VMEM_LIMIT = 32 * 1024 * 1024      # > v5e 16 MiB scoped default
_ENC_VMEM_LIMIT = 48 * 1024 * 1024      # < v7x 64 MiB physical VMEM per core


def _pick_roi_block(n_rois, batch, k, d, budget_bytes):
    """ROI block must be a multiple of 8 (sublane constraint) or n_rois itself."""
    per_roi = (2 * k * d * 2            # weight block (double-buffered, bf16)
               + 2 * batch * k * 4      # x block (double-buffered, f32)
               + 2 * batch * d * 4      # out block (double-buffered, f32)
               + 2 * 4 * d * 4)         # aux block (double-buffered, f32)
    cands = [r for r in range(1, n_rois + 1)
             if n_rois % r == 0 and (r % 8 == 0 or r == n_rois)]
    fit = [r for r in cands if r * per_roi <= budget_bytes]
    if not fit:
        return min(cands)
    multi = [r for r in fit if n_rois // r >= 2 and r >= 8]   # keep grid parallelism
    return max(multi) if multi else max(fit)


def _pick_batch_tile(batch, t, d, budget_bytes):
    """Batch tile for the fused encoder: any divisor of batch (3-D blocks)."""
    per_sample = (3 * t * d * 4          # x block (x2 buffers) + resident scratch, f32
                  + 2 * t * 3 * d * 4    # qkv / FFN hidden activations, f32
                  + t * t * 4            # per-head attention scores, f32
                  + 2 * t * d * 4)       # residual temporaries, f32
    cands = [b for b in range(1, batch + 1) if batch % b == 0]
    fit = [b for b in cands if b * per_sample <= budget_bytes]
    if not fit:
        return 1
    multi = [b for b in fit if batch // b >= 2 and b >= 8]    # >=2 tiles for megacore
    return max(multi) if multi else max(fit)


# ----------------------------------------------------------------------------
# Kernel 1: per-ROI projection (Linear + LayerNorm + GELU) + positional embed.
# grid = (n_rois // r_blk,); natural layouts: reads (B, r_blk, K), writes
# (B, r_blk, D) directly into the (B, T, D) token slab.  Each ROI has its own
# weight matrix, so the block does r_blk small (B, K) @ (K, D) matmuls
# (weight-DMA bound; the f32 epilogue is vector work).
# ----------------------------------------------------------------------------
def roi_proj_kernel(x_ref, w_ref, aux_ref, out_ref):
    x = x_ref[...]                                   # (B, r_blk, K) f32
    batch = x.shape[0]
    r_blk = w_ref.shape[0]
    d = w_ref.shape[2]
    for r in range(r_blk):
        xr = x[:, r, :].astype(jnp.bfloat16)                               # (B, K)
        yr = jnp.dot(xr, w_ref[r], preferred_element_type=jnp.float32)     # (B, D)
        a = aux_ref[r]                                                     # (4, D) f32
        yr = yr + a[0:1, :]                          # linear bias
        yr = _layernorm(yr, a[1:2, :], a[2:3, :])    # per-ROI LayerNorm
        yr = _gelu(yr) + a[3:4, :]                   # GELU + positional embedding
        out_ref[:, r:r + 1, :] = yr.reshape(batch, 1, d)


def roi_projection(roi_x, roi_W, roi_aux, *, r_blk, vmem_limit):
    B, n_rois, K = roi_x.shape
    D = roi_W.shape[-1]
    return pl.pallas_call(
        roi_proj_kernel,
        out_shape=jax.ShapeDtypeStruct((B, n_rois, D), jnp.float32),
        grid=(n_rois // r_blk,),
        in_specs=[
            pl.BlockSpec((B, r_blk, K), lambda r: (0, r, 0)),
            pl.BlockSpec((r_blk, K, D), lambda r: (r, 0, 0)),
            pl.BlockSpec((r_blk, 4, D), lambda r: (r, 0, 0)),
        ],
        out_specs=pl.BlockSpec((B, r_blk, D), lambda r: (0, r, 0)),
        compiler_params=pltpu.CompilerParams(
            dimension_semantics=("parallel",),
            vmem_limit_bytes=vmem_limit),
    )(roi_x, roi_W, roi_aux)


# ----------------------------------------------------------------------------
# Kernel 2: fused TransformerEncoder (all layers) + mean-query attention
# pooling + classifier MLP.  grid = (batch_tiles, num_layers).  The residual
# stream stays resident in a VMEM scratch across the layer axis; pooling and
# the classifier run under @pl.when(l == L-1) and only tiny logits reach HBM.
# ----------------------------------------------------------------------------
def encoder_pool_cls_kernel(
        x_ref,
        wqkv_ref, bqkv_ref, wo_ref, bo_ref, ln1g_ref, ln1b_ref,
        w1_ref, b1_ref, w2_ref, b2_ref, ln2g_ref, ln2b_ref,
        pwq_ref, pbq_ref, pwkv_ref, pbkv_ref, pwo_ref, pbo_ref,
        clng_ref, clnb_ref, cw1_ref, cb1_ref, cw2_ref, cb2_ref, cw3_ref, cb3_ref,
        logits_ref, resid_ref, *, num_heads):
    l = pl.program_id(1)
    n_layers = pl.num_programs(1)

    @pl.when(l == 0)
    def _load_tokens():                               # fresh tokens for this batch tile
        resid_ref[...] = x_ref[...]

    x = resid_ref[...]                                # (B_T, T, D) f32 residual stream
    b_t, seq, d = x.shape
    dh = d // num_heads
    scale = 1.0 / (dh ** 0.5)
    m = b_t * seq

    x2d = x.reshape(m, d)
    xb = x2d.astype(jnp.bfloat16)

    # ---- self-attention: one fused (D, 3D) QKV matmul, one (D, D) out-proj ----
    qkv = jnp.dot(xb, wqkv_ref[0], preferred_element_type=jnp.float32) + bqkv_ref[0]

    ctx_parts = []
    for h in range(num_heads):
        qh = qkv[:, h * dh:(h + 1) * dh].astype(jnp.bfloat16).reshape(b_t, seq, dh)
        kh = qkv[:, d + h * dh:d + (h + 1) * dh].astype(jnp.bfloat16).reshape(b_t, seq, dh)
        vh = qkv[:, 2 * d + h * dh:2 * d + (h + 1) * dh].astype(jnp.bfloat16).reshape(b_t, seq, dh)
        s = jnp.einsum('bqd,bkd->bqk', qh, kh,
                       preferred_element_type=jnp.float32) * scale       # (B_T, T, T)
        p = _softmax_last(s)
        oh = jnp.einsum('bqk,bkd->bqd', p.astype(jnp.bfloat16), vh,
                        preferred_element_type=jnp.float32)              # (B_T, T, dh)
        ctx_parts.append(oh.reshape(m, dh))
    ctx = jnp.concatenate(ctx_parts, axis=-1)                            # (M, D) f32
    attn = jnp.dot(ctx.astype(jnp.bfloat16), wo_ref[0],
                   preferred_element_type=jnp.float32) + bo_ref[0]

    # ---- post-norm transformer layer (PyTorch default norm_first=False) ----
    x1 = _layernorm(x2d + attn, ln1g_ref[0], ln1b_ref[0])
    ff = _gelu(jnp.dot(x1.astype(jnp.bfloat16), w1_ref[0],
                       preferred_element_type=jnp.float32) + b1_ref[0])
    ff = jnp.dot(ff.astype(jnp.bfloat16), w2_ref[0],
                 preferred_element_type=jnp.float32) + b2_ref[0]
    y2d = _layernorm(x1 + ff, ln2g_ref[0], ln2b_ref[0])
    resid_ref[...] = y2d.reshape(b_t, seq, d)

    # ---- pooling + classifier, only after the last encoder layer ----
    @pl.when(l == n_layers - 1)
    def _pool_and_classify():
        q_in = jnp.mean(y2d.reshape(b_t, seq, d), axis=1)                # (B_T, D) mean token
        qp = jnp.dot(q_in.astype(jnp.bfloat16), pwq_ref[...],
                     preferred_element_type=jnp.float32) + pbq_ref[...]  # (B_T, D)
        kv = jnp.dot(y2d.astype(jnp.bfloat16), pwkv_ref[...],
                     preferred_element_type=jnp.float32) + pbkv_ref[...] # (M, 2D)
        parts = []
        for h in range(num_heads):
            qh = qp[:, h * dh:(h + 1) * dh].astype(jnp.bfloat16).reshape(b_t, 1, dh)
            kh = kv[:, h * dh:(h + 1) * dh].astype(jnp.bfloat16).reshape(b_t, seq, dh)
            vh = kv[:, d + h * dh:d + (h + 1) * dh].astype(jnp.bfloat16).reshape(b_t, seq, dh)
            s = jnp.einsum('bqd,bkd->bqk', qh, kh,
                           preferred_element_type=jnp.float32) * scale   # (B_T, 1, T)
            p = _softmax_last(s)
            oh = jnp.einsum('bqk,bkd->bqd', p.astype(jnp.bfloat16), vh,
                            preferred_element_type=jnp.float32)          # (B_T, 1, dh)
            parts.append(oh.reshape(b_t, dh))
        pooled = jnp.concatenate(parts, axis=-1)                         # (B_T, D)
        pooled = jnp.dot(pooled.astype(jnp.bfloat16), pwo_ref[...],
                         preferred_element_type=jnp.float32) + pbo_ref[...]

        # classifier: LayerNorm -> Linear/GELU -> Linear/GELU -> Linear
        z = _layernorm(pooled, clng_ref[...], clnb_ref[...])
        z = _gelu(jnp.dot(z.astype(jnp.bfloat16), cw1_ref[...],
                          preferred_element_type=jnp.float32) + cb1_ref[...])
        z = _gelu(jnp.dot(z.astype(jnp.bfloat16), cw2_ref[...],
                          preferred_element_type=jnp.float32) + cb2_ref[...])
        logits = jnp.dot(z.astype(jnp.bfloat16), cw3_ref[...],
                         preferred_element_type=jnp.float32) + cb3_ref[...]
        logits_ref[...] = logits[:, None, :]


_ENC_NAMES = ('wqkv', 'bqkv', 'wo', 'bo', 'ln1g', 'ln1b',
              'w1', 'b1', 'w2', 'b2', 'ln2g', 'ln2b')
_POOL_NAMES = ('wq', 'bq', 'wkv', 'bkv', 'wo', 'bo')
_CLS_NAMES = ('lng', 'lnb', 'w1', 'b1', 'w2', 'b2', 'w3', 'b3')


def encoder_pool_classifier(tokens, enc, pool, cls, *, num_heads, num_classes,
                            b_tile, vmem_limit):
    B, T, D = tokens.shape
    L = enc['wqkv'].shape[0]
    enc_args = [enc[n] for n in _ENC_NAMES]
    tail_args = [pool[n] for n in _POOL_NAMES] + [cls[n] for n in _CLS_NAMES]

    def layer_spec(a):                   # per-layer stacked weights, selected by l
        nz = a.ndim - 1
        return pl.BlockSpec((1,) + a.shape[1:],
                            lambda bt, l, _nz=nz: (l,) + (0,) * _nz)

    def const_spec(a):                   # pooling/classifier weights, fetched once
        nz = a.ndim
        return pl.BlockSpec(a.shape, lambda bt, l, _nz=nz: (0,) * _nz)

    in_specs = [pl.BlockSpec((b_tile, T, D), lambda bt, l: (bt, 0, 0))]
    in_specs += [layer_spec(a) for a in enc_args]
    in_specs += [const_spec(a) for a in tail_args]

    out = pl.pallas_call(
        functools.partial(encoder_pool_cls_kernel, num_heads=num_heads),
        out_shape=jax.ShapeDtypeStruct((B, 1, num_classes), jnp.float32),
        grid=(B // b_tile, L),
        in_specs=in_specs,
        out_specs=pl.BlockSpec((b_tile, 1, num_classes), lambda bt, l: (bt, 0, 0)),
        scratch_shapes=[pltpu.VMEM((b_tile, T, D), jnp.float32)],
        compiler_params=pltpu.CompilerParams(
            dimension_semantics=("parallel", "arbitrary"),
            vmem_limit_bytes=vmem_limit),
    )(tokens, *enc_args, *tail_args)
    return out.reshape(B, num_classes)


# ----------------------------------------------------------------------------
# Full forward (glue in plain JAX is only a metadata reshape of x)
# ----------------------------------------------------------------------------
def forward(packed, x, *, n_rois, roi_dim, num_heads, num_classes):
    B = x.shape[0]
    assert x.shape[1] == n_rois * roi_dim
    D = packed['roi_W'].shape[-1]

    roi_x = x.reshape(B, n_rois, roi_dim)          # metadata-only reshape (no copy)

    r_blk = _pick_roi_block(n_rois, B, roi_dim, D, _ROI_VMEM_BUDGET)
    tokens = roi_projection(roi_x, packed['roi_W'], packed['roi_aux'],
                            r_blk=r_blk, vmem_limit=_ROI_VMEM_LIMIT)     # (B, T, D) f32

    b_tile = _pick_batch_tile(B, n_rois, D, _ENC_VMEM_BUDGET)
    # dropout / layer_dropout are identity at inference
    return encoder_pool_classifier(tokens, packed['enc'], packed['pool'], packed['cls'],
                                   num_heads=num_heads, num_classes=num_classes,
                                   b_tile=b_tile, vmem_limit=_ENC_VMEM_LIMIT)


# ----------------------------------------------------------------------------
# Parameter init (module-style natural layout) + packing into kernel layout
# ----------------------------------------------------------------------------
def init_params(key, *, n_rois, roi_dim, d_model, num_layers, num_classes):
    keys = iter(jax.random.split(key, 256))

    def xavier(shape):
        fan_in, fan_out = shape[-2], shape[-1]
        bound = (6.0 / (fan_in + fan_out)) ** 0.5
        return jax.random.uniform(next(keys), shape, jnp.float32, -bound, bound)

    zeros = lambda s: jnp.zeros(s, jnp.float32)
    ones = lambda s: jnp.ones(s, jnp.float32)

    P = {
        'roi_W': xavier((n_rois, roi_dim, d_model)),
        'roi_b': zeros((n_rois, 1, d_model)),
        'roi_ln_g': ones((n_rois, 1, d_model)),
        'roi_ln_b': zeros((n_rois, 1, d_model)),
        'pos': 0.02 * jax.random.normal(next(keys), (n_rois, 1, d_model), jnp.float32),
    }

    dff = d_model * 3
    P['layers'] = [{
        'wq': xavier((d_model, d_model)), 'wk': xavier((d_model, d_model)),
        'wv': xavier((d_model, d_model)), 'wo': xavier((d_model, d_model)),
        'bq': zeros((1, d_model)), 'bk': zeros((1, d_model)),
        'bv': zeros((1, d_model)), 'bo': zeros((1, d_model)),
        'ln1g': ones((1, d_model)), 'ln1b': zeros((1, d_model)),
        'w1': xavier((d_model, dff)), 'b1': zeros((1, dff)),
        'w2': xavier((dff, d_model)), 'b2': zeros((1, d_model)),
        'ln2g': ones((1, d_model)), 'ln2b': zeros((1, d_model)),
    } for _ in range(num_layers)]

    P['pool'] = {
        'wq': xavier((d_model, d_model)), 'wk': xavier((d_model, d_model)),
        'wv': xavier((d_model, d_model)), 'wo': xavier((d_model, d_model)),
        'bq': zeros((1, d_model)), 'bk': zeros((1, d_model)),
        'bv': zeros((1, d_model)), 'bo': zeros((1, d_model)),
    }
    P['cls'] = {
        'lng': ones((1, d_model)), 'lnb': zeros((1, d_model)),
        'w1': xavier((d_model, d_model // 2)), 'b1': zeros((1, d_model // 2)),
        'w2': xavier((d_model // 2, d_model // 4)), 'b2': zeros((1, d_model // 4)),
        'w3': xavier((d_model // 4, num_classes)), 'b3': zeros((1, num_classes)),
    }
    return P


def pack_params(P):
    # NOTE: weight convention is (in, out); loading torch checkpoints would
    # require a transpose of each nn.Linear weight before packing.
    bf = lambda a: a.astype(jnp.bfloat16)

    packed = {
        'roi_W': bf(P['roi_W']),                                          # (n_rois, K, D)
        'roi_aux': jnp.concatenate([P['roi_b'], P['roi_ln_g'],
                                    P['roi_ln_b'], P['pos']], axis=1),    # (n_rois, 4, D)
    }

    def stack(name):
        return jnp.stack([lp[name] for lp in P['layers']], axis=0)

    wqkv = jnp.stack([jnp.concatenate([lp['wq'], lp['wk'], lp['wv']], axis=1)
                      for lp in P['layers']], axis=0)                     # (L, D, 3D)
    bqkv = jnp.stack([jnp.concatenate([lp['bq'], lp['bk'], lp['bv']], axis=1)
                      for lp in P['layers']], axis=0)                     # (L, 1, 3D)
    packed['enc'] = {
        'wqkv': bf(wqkv), 'bqkv': bqkv,
        'wo': bf(stack('wo')), 'bo': stack('bo'),
        'ln1g': stack('ln1g'), 'ln1b': stack('ln1b'),
        'w1': bf(stack('w1')), 'b1': stack('b1'),
        'w2': bf(stack('w2')), 'b2': stack('b2'),
        'ln2g': stack('ln2g'), 'ln2b': stack('ln2b'),
    }

    pp = P['pool']
    packed['pool'] = {
        'wq': bf(pp['wq']), 'bq': pp['bq'],
        'wkv': bf(jnp.concatenate([pp['wk'], pp['wv']], axis=1)),         # (D, 2D)
        'bkv': jnp.concatenate([pp['bk'], pp['bv']], axis=1),             # (1, 2D)
        'wo': bf(pp['wo']), 'bo': pp['bo'],
    }
    c = P['cls']
    packed['cls'] = {
        'lng': c['lng'], 'lnb': c['lnb'],
        'w1': bf(c['w1']), 'b1': c['b1'],
        'w2': bf(c['w2']), 'b2': c['b2'],
        'w3': bf(c['w3']), 'b3': c['b3'],
    }
    return packed


# ----------------------------------------------------------------------------
# Pure-JAX reference (f32) for a correctness sanity check
# ----------------------------------------------------------------------------
def reference_forward(P, x, *, n_rois, roi_dim, num_heads):
    B = x.shape[0]
    D = P['roi_W'].shape[-1]
    H = num_heads
    dh = D // H

    def ln(v, g, b, eps=1e-5):
        mu = v.mean(-1, keepdims=True)
        var = ((v - mu) ** 2).mean(-1, keepdims=True)
        return (v - mu) / jnp.sqrt(var + eps) * g + b

    xr = x.reshape(B, n_rois, roi_dim)
    tok = jnp.einsum('brk,rkd->brd', xr, P['roi_W']) + P['roi_b'][:, 0, :][None]
    tok = ln(tok, P['roi_ln_g'][:, 0, :][None], P['roi_ln_b'][:, 0, :][None])
    tok = jax.nn.gelu(tok, approximate=False) + P['pos'][:, 0, :][None]

    def mha(q, kv, wq, wk, wv, wo, bq, bk, bv, bo):
        Q = q @ wq + bq
        K = kv @ wk + bk
        V = kv @ wv + bv
        Bq, Tq, _ = Q.shape
        T = K.shape[1]
        Q = Q.reshape(Bq, Tq, H, dh).transpose(0, 2, 1, 3)
        K = K.reshape(Bq, T, H, dh).transpose(0, 2, 1, 3)
        V = V.reshape(Bq, T, H, dh).transpose(0, 2, 1, 3)
        s = jnp.einsum('bhqd,bhkd->bhqk', Q, K) / jnp.sqrt(dh * 1.0)
        p = jax.nn.softmax(s, axis=-1)
        o = jnp.einsum('bhqk,bhkd->bhqd', p, V)
        o = o.transpose(0, 2, 1, 3).reshape(Bq, Tq, D)
        return o @ wo + bo

    h = tok
    for lp in P['layers']:
        a = mha(h, h, lp['wq'], lp['wk'], lp['wv'], lp['wo'],
                lp['bq'], lp['bk'], lp['bv'], lp['bo'])
        h = ln(h + a, lp['ln1g'], lp['ln1b'])
        f = jax.nn.gelu(h @ lp['w1'] + lp['b1'], approximate=False) @ lp['w2'] + lp['b2']
        h = ln(h + f, lp['ln2g'], lp['ln2b'])

    q = h.mean(axis=1, keepdims=True)
    pp = P['pool']
    pooled = mha(q, h, pp['wq'], pp['wk'], pp['wv'], pp['wo'],
                 pp['bq'], pp['bk'], pp['bv'], pp['bo'])[:, 0, :]
    c = P['cls']
    z = ln(pooled, c['lng'], c['lnb'])
    z = jax.nn.gelu(z @ c['w1'] + c['b1'], approximate=False)
    z = jax.nn.gelu(z @ c['w2'] + c['b2'], approximate=False)
    return z @ c['w3'] + c['b3']


if __name__ == "__main__":
    # small shapes consistent with the module structure
    # (real model: n_rois=200, roi_dim=199, d_model=192, num_heads=6, num_layers=3)
    B = 2
    n_rois = 8
    roi_dim = 64
    d_model = 32
    num_heads = 4
    num_layers = 2
    num_classes = 2
    feat_dim = n_rois * roi_dim

    key = jax.random.PRNGKey(0)
    kp, kx = jax.random.split(key)
    natural = init_params(kp, n_rois=n_rois, roi_dim=roi_dim, d_model=d_model,
                          num_layers=num_layers, num_classes=num_classes)
    packed = pack_params(natural)
    x = jax.random.normal(kx, (B, feat_dim), jnp.float32)

    fwd = jax.jit(functools.partial(forward, n_rois=n_rois, roi_dim=roi_dim,
                                    num_heads=num_heads, num_classes=num_classes))
    logits = jax.block_until_ready(fwd(packed, x))

    assert logits.shape == (B, num_classes), logits.shape
    assert bool(jnp.all(jnp.isfinite(logits)))

    ref = reference_forward(natural, x, n_rois=n_rois, roi_dim=roi_dim,
                            num_heads=num_heads)
    err = float(jnp.max(jnp.abs(logits - ref)))
    assert err < 0.1, f"max abs diff vs reference = {err}"
    print("KERNEL_OK")
</pallas_src>

<mosaic_0001>
module attributes {stable_mosaic.version = 11 : i64} {
  func.func @roi_proj_kernel(%arg0: i32, %arg1: memref<2x8x64xf32, #tpu.memory_space<vmem>>, %arg2: memref<8x64x32xbf16, #tpu.memory_space<vmem>>, %arg3: memref<8x4x32xf32, #tpu.memory_space<vmem>>, %arg4: memref<2x8x32xf32, #tpu.memory_space<vmem>>) attributes {dimension_semantics = [#tpu.dimension_semantics<parallel>], iteration_bounds = array<i64: 1>, scalar_prefetch = 0 : i64, scratch_operands = 0 : i64, tpu.core_type = #tpu.core_type<tc>, window_params = [{transform_indices = @transform_0, window_bounds = array<i64: 2, 8, 64>}, {transform_indices = @transform_1, window_bounds = array<i64: 8, 64, 32>}, {transform_indices = @transform_2, window_bounds = array<i64: 8, 4, 32>}, {transform_indices = @transform_3, window_bounds = array<i64: 2, 8, 32>}]} {
    %c0 = arith.constant 0 : index
    %c0_0 = arith.constant 0 : index
    %c0_1 = arith.constant 0 : index
    %0 = vector.load %arg1[%c0, %c0_0, %c0_1] : memref<2x8x64xf32, #tpu.memory_space<vmem>>, vector<2x8x64xf32>
    %1 = vector.extract_strided_slice %0 {offsets = [0, 0, 0], sizes = [2, 1, 64], strides = [1, 1, 1]} : vector<2x8x64xf32> to vector<2x1x64xf32>
    %2 = vector.shape_cast %1 : vector<2x1x64xf32> to vector<2x64xf32>
    %3 = arith.truncf %2 : vector<2x64xf32> to vector<2x64xbf16>
    %c0_2 = arith.constant 0 : index
    %c0_3 = arith.constant 0 : index
    %c0_4 = arith.constant 0 : index
    %4 = vector.load %arg2[%c0_2, %c0_3, %c0_4] : memref<8x64x32xbf16, #tpu.memory_space<vmem>>, vector<1x64x32xbf16>
    %5 = vector.shape_cast %4 : vector<1x64x32xbf16> to vector<64x32xbf16>
    %cst = arith.constant dense<0.000000e+00> : vector<2x32xf32>
    %6 = tpu.matmul %3, %5, %cst {dimension_numbers = #tpu.dot_dimension_numbers<[1], [0], [0], [1], [0, 0, 1, 1], [], []>} : vector<2x64xbf16>, vector<64x32xbf16>, vector<2x32xf32> -> vector<2x32xf32>
    %c0_5 = arith.constant 0 : index
    %c0_6 = arith.constant 0 : index
    %c0_7 = arith.constant 0 : index
    %7 = vector.load %arg3[%c0_5, %c0_6, %c0_7] : memref<8x4x32xf32, #tpu.memory_space<vmem>>, vector<1x4x32xf32>
    %8 = vector.shape_cast %7 : vector<1x4x32xf32> to vector<4x32xf32>
    %9 = vector.extract_strided_slice %8 {offsets = [0, 0], sizes = [1, 32], strides = [1, 1]} : vector<4x32xf32> to vector<1x32xf32>
    %10 = vector.broadcast %9 : vector<1x32xf32> to vector<2x32xf32>
    %11 = arith.addf %6, %10 : vector<2x32xf32>
    %12 = vector.extract_strided_slice %8 {offsets = [1, 0], sizes = [1, 32], strides = [1, 1]} : vector<4x32xf32> to vector<1x32xf32>
    %13 = vector.extract_strided_slice %8 {offsets = [2, 0], sizes = [1, 32], strides = [1, 1]} : vector<4x32xf32> to vector<1x32xf32>
    %cst_8 = arith.constant dense<0.000000e+00> : vector<2xf32>
    %14 = vector.multi_reduction <add>, %11, %cst_8 [1] : vector<2x32xf32> to vector<2xf32>
    %15 = vector.shape_cast %14 : vector<2xf32> to vector<2x1xf32>
    %cst_9 = arith.constant 3.200000e+01 : f32
    %16 = vector.broadcast %cst_9 : f32 to vector<2x1xf32>
    %17 = arith.divf %15, %16 : vector<2x1xf32>
    %18 = vector.broadcast %17 : vector<2x1xf32> to vector<2x32xf32>
    %19 = arith.subf %11, %18 : vector<2x32xf32>
    %20 = arith.mulf %19, %19 : vector<2x32xf32>
    %cst_10 = arith.constant dense<0.000000e+00> : vector<2xf32>
    %21 = vector.multi_reduction <add>, %20, %cst_10 [1] : vector<2x32xf32> to vector<2xf32>
    %22 = vector.shape_cast %21 : vector<2xf32> to vector<2x1xf32>
    %cst_11 = arith.constant 3.200000e+01 : f32
    %23 = vector.broadcast %cst_11 : f32 to vector<2x1xf32>
    %24 = arith.divf %22, %23 : vector<2x1xf32>
    %25 = vector.broadcast %17 : vector<2x1xf32> to vector<2x32xf32>
    %26 = arith.subf %11, %25 : vector<2x32xf32>
    %cst_12 = arith.constant 9.99999974E-6 : f32
    %27 = vector.broadcast %cst_12 : f32 to vector<2x1xf32>
    %28 = arith.addf %24, %27 : vector<2x1xf32>
    %29 = math.rsqrt %28 : vector<2x1xf32>
    %30 = vector.broadcast %29 : vector<2x1xf32> to vector<2x32xf32>
    %31 = arith.mulf %26, %30 : vector<2x32xf32>
    %32 = vector.broadcast %12 : vector<1x32xf32> to vector<2x32xf32>
    %33 = arith.mulf %31, %32 : vector<2x32xf32>
    %34 = vector.broadcast %13 : vector<1x32xf32> to vector<2x32xf32>
    %35 = arith.addf %33, %34 : vector<2x32xf32>
    %cst_13 = arith.constant 5.000000e-01 : f32
    %36 = vector.broadcast %cst_13 : f32 to vector<2x32xf32>
    %37 = arith.mulf %36, %35 : vector<2x32xf32>
    %cst_14 = arith.constant 0.707106769 : f32
    %38 = vector.broadcast %cst_14 : f32 to vector<2x32xf32>
    %39 = arith.mulf %35, %38 : vector<2x32xf32>
    %cst_15 = arith.constant 0.000000e+00 : f32
    %40 = vector.broadcast %cst_15 : f32 to vector<2x32xf32>
    %41 = arith.cmpf oge, %39, %40 : vector<2x32xf32>
    %cst_16 = arith.constant 1.000000e+00 : f32
    %cst_17 = arith.constant -1.000000e+00 : f32
    %42 = vector.broadcast %cst_16 : f32 to vector<2x32xf32>
    %43 = vector.broadcast %cst_17 : f32 to vector<2x32xf32>
    %44 = arith.select %41, %42, %43 : vector<2x32xi1>, vector<2x32xf32>
    %45 = math.absf %39 : vector<2x32xf32>
    %cst_18 = arith.constant 0.327591091 : f32
    %46 = vector.broadcast %cst_18 : f32 to vector<2x32xf32>
    %47 = arith.mulf %46, %45 : vector<2x32xf32>
    %cst_19 = arith.constant 1.000000e+00 : f32
    %48 = vector.broadcast %cst_19 : f32 to vector<2x32xf32>
    %49 = arith.addf %48, %47 : vector<2x32xf32>
    %cst_20 = arith.constant 1.000000e+00 : f32
    %50 = vector.broadcast %cst_20 : f32 to vector<2x32xf32>
    %51 = arith.divf %50, %49 : vector<2x32xf32>
    %cst_21 = arith.constant 1.06140542 : f32
    %52 = vector.broadcast %cst_21 : f32 to vector<2x32xf32>
    %53 = arith.mulf %52, %51 : vector<2x32xf32>
    %cst_22 = arith.constant -1.45315206 : f32
    %54 = vector.broadcast %cst_22 : f32 to vector<2x32xf32>
    %55 = arith.addf %53, %54 : vector<2x32xf32>
    %56 = arith.mulf %55, %51 : vector<2x32xf32>
    %cst_23 = arith.constant 1.42141378 : f32
    %57 = vector.broadcast %cst_23 : f32 to vector<2x32xf32>
    %58 = arith.addf %56, %57 : vector<2x32xf32>
    %59 = arith.mulf %58, %51 : vector<2x32xf32>
    %cst_24 = arith.constant -0.284496725 : f32
    %60 = vector.broadcast %cst_24 : f32 to vector<2x32xf32>
    %61 = arith.addf %59, %60 : vector<2x32xf32>
    %62 = arith.mulf %61, %51 : vector<2x32xf32>
    %cst_25 = arith.constant 0.254829586 : f32
    %63 = vector.broadcast %cst_25 : f32 to vector<2x32xf32>
    %64 = arith.addf %62, %63 : vector<2x32xf32>
    %65 = arith.mulf %64, %51 : vector<2x32xf32>
    %cst_26 = arith.constant 0.000000e+00 : f32
    %66 = vector.broadcast %cst_26 : f32 to vector<2x32xf32>
    %67 = arith.subf %66, %45 : vector<2x32xf32>
    %68 = arith.mulf %67, %45 : vector<2x32xf32>
    %69 = math.exp %68 : vector<2x32xf32>
    %70 = arith.mulf %65, %69 : vector<2x32xf32>
    %cst_27 = arith.constant 1.000000e+00 : f32
    %71 = vector.broadcast %cst_27 : f32 to vector<2x32xf32>
    %72 = arith.subf %71, %70 : vector<2x32xf32>
    %73 = arith.mulf %44, %72 : vector<2x32xf32>
    %cst_28 = arith.constant 1.000000e+00 : f32
    %74 = vector.broadcast %cst_28 : f32 to vector<2x32xf32>
    %75 = arith.addf %74, %73 : vector<2x32xf32>
    %76 = arith.mulf %37, %75 : vector<2x32xf32>
    %77 = vector.extract_strided_slice %8 {offsets = [3, 0], sizes = [1, 32], strides = [1, 1]} : vector<4x32xf32> to vector<1x32xf32>
    %78 = vector.broadcast %77 : vector<1x32xf32> to vector<2x32xf32>
    %79 = arith.addf %76, %78 : vector<2x32xf32>
    %80 = vector.shape_cast %79 : vector<2x32xf32> to vector<2x1x32xf32>
    %c0_29 = arith.constant 0 : index
    %c0_30 = arith.constant 0 : index
    %c0_31 = arith.constant 0 : index
    %81 = vector.load %arg4[%c0_29, %c0_30, %c0_31] : memref<2x8x32xf32, #tpu.memory_space<vmem>>, vector<2x1x32xf32>
    tpu.vector_store %arg4[%c0_29, %c0_30, %c0_31], %80 {strides = array<i32>} : memref<2x8x32xf32, #tpu.memory_space<vmem>>, vector<2x1x32xf32>,
    %82 = vector.extract_strided_slice %0 {offsets = [0, 1, 0], sizes = [2, 1, 64], strides = [1, 1, 1]} : vector<2x8x64xf32> to vector<2x1x64xf32>
    %83 = vector.shape_cast %82 : vector<2x1x64xf32> to vector<2x64xf32>
    %84 = arith.truncf %83 : vector<2x64xf32> to vector<2x64xbf16>
    %c1 = arith.constant 1 : index
    %c0_32 = arith.constant 0 : index
    %c0_33 = arith.constant 0 : index
    %85 = vector.load %arg2[%c1, %c0_32, %c0_33] : memref<8x64x32xbf16, #tpu.memory_space<vmem>>, vector<1x64x32xbf16>
    %86 = vector.shape_cast %85 : vector<1x64x32xbf16> to vector<64x32xbf16>
    %cst_34 = arith.constant dense<0.000000e+00> : vector<2x32xf32>
    %87 = tpu.matmul %84, %86, %cst_34 {dimension_numbers = #tpu.dot_dimension_numbers<[1], [0], [0], [1], [0, 0, 1, 1], [], []>} : vector<2x64xbf16>, vector<64x32xbf16>, vector<2x32xf32> -> vector<2x32xf32>
    %c1_35 = arith.constant 1 : index
    %c0_36 = arith.constant 0 : index
    %c0_37 = arith.constant 0 : index
    %88 = vector.load %arg3[%c1_35, %c0_36, %c0_37] : memref<8x4x32xf32, #tpu.memory_space<vmem>>, vector<1x4x32xf32>
    %89 = vector.shape_cast %88 : vector<1x4x32xf32> to vector<4x32xf32>
    %90 = vector.extract_strided_slice %89 {offsets = [0, 0], sizes = [1, 32], strides = [1, 1]} : vector<4x32xf32> to vector<1x32xf32>
    %91 = vector.broadcast %90 : vector<1x32xf32> to vector<2x32xf32>
    %92 = arith.addf %87, %91 : vector<2x32xf32>
    %93 = vector.extract_strided_slice %89 {offsets = [1, 0], sizes = [1, 32], strides = [1, 1]} : vector<4x32xf32> to vector<1x32xf32>
    %94 = vector.extract_strided_slice %89 {offsets = [2, 0], sizes = [1, 32], strides = [1, 1]} : vector<4x32xf32> to vector<1x32xf32>
    %cst_38 = arith.constant dense<0.000000e+00> : vector<2xf32>
    %95 = vector.multi_reduction <add>, %92, %cst_38 [1] : vector<2x32xf32> to vector<2xf32>
    %96 = vector.shape_cast %95 : vector<2xf32> to vector<2x1xf32>
    %cst_39 = arith.constant 3.200000e+01 : f32
    %97 = vector.broadcast %cst_39 : f32 to vector<2x1xf32>
    %98 = arith.divf %96, %97 : vector<2x1xf32>
    %99 = vector.broadcast %98 : vector<2x1xf32> to vector<2x32xf32>
    %100 = arith.subf %92, %99 : vector<2x32xf32>
    %101 = arith.mulf %100, %100 : vector<2x32xf32>
    %cst_40 = arith.constant dense<0.000000e+00> : vector<2xf32>
    %102 = vector.multi_reduction <add>, %101, %cst_40 [1] : vector<2x32xf32> to vector<2xf32>
    %103 = vector.shape_cast %102 : vector<2xf32> to vector<2x1xf32>
    %cst_41 = arith.constant 3.200000e+01 : f32
    %104 = vector.broadcast %cst_41 : f32 to vector<2x1xf32>
    %105 = arith.divf %103, %104 : vector<2x1xf32>
    %106 = vector.broadcast %98 : vector<2x1xf32> to vector<2x32xf32>
    %107 = arith.subf %92, %106 : vector<2x32xf32>
    %cst_42 = arith.constant 9.99999974E-6 : f32
    %108 = vector.broadcast %cst_42 : f32 to vector<2x1xf32>
    %109 = arith.addf %105, %108 : vector<2x1xf32>
    %110 = math.rsqrt %109 : vector<2x1xf32>
    %111 = vector.broadcast %110 : vector<2x1xf32> to vector<2x32xf32>
    %112 = arith.mulf %107, %111 : vector<2x32xf32>
    %113 = vector.broadcast %93 : vector<1x32xf32> to vector<2x32xf32>
    %114 = arith.mulf %112, %113 : vector<2x32xf32>
    %115 = vector.broadcast %94 : vector<1x32xf32> to vector<2x32xf32>
    %116 = arith.addf %114, %115 : vector<2x32xf32>
    %cst_43 = arith.constant 5.000000e-01 : f32
    %117 = vector.broadcast %cst_43 : f32 to vector<2x32xf32>
    %118 = arith.mulf %117, %116 : vector<2x32xf32>
    %cst_44 = arith.constant 0.707106769 : f32
    %119 = vector.broadcast %cst_44 : f32 to vector<2x32xf32>
    %120 = arith.mulf %116, %119 : vector<2x32xf32>
    %cst_45 = arith.constant 0.000000e+00 : f32
    %121 = vector.broadcast %cst_45 : f32 to vector<2x32xf32>
    %122 = arith.cmpf oge, %120, %121 : vector<2x32xf32>
    %cst_46 = arith.constant 1.000000e+00 : f32
    %cst_47 = arith.constant -1.000000e+00 : f32
    %123 = vector.broadcast %cst_46 : f32 to vector<2x32xf32>
    %124 = vector.broadcast %cst_47 : f32 to vector<2x32xf32>
    %125 = arith.select %122, %123, %124 : vector<2x32xi1>, vector<2x32xf32>
    %126 = math.absf %120 : vector<2x32xf32>
    %cst_48 = arith.constant 0.327591091 : f32
    %127 = vector.broadcast %cst_48 : f32 to vector<2x32xf32>
    %128 = arith.mulf %127, %126 : vector<2x32xf32>
    %cst_49 = arith.constant 1.000000e+00 : f32
    %129 = vector.broadcast %cst_49 : f32 to vector<2x32xf32>
    %130 = arith.addf %129, %128 : vector<2x32xf32>
    %cst_50 = arith.constant 1.000000e+00 : f32
    %131 = vector.broadcast %cst_50 : f32 to vector<2x32xf32>
    %132 = arith.divf %131, %130 : vector<2x32xf32>
    %cst_51 = arith.constant 1.06140542 : f32
    %133 = vector.broadcast %cst_51 : f32 to vector<2x32xf32>
    %134 = arith.mulf %133, %132 : vector<2x32xf32>
    %cst_52 = arith.constant -1.45315206 : f32
    %135 = vector.broadcast %cst_52 : f32 to vector<2x32xf32>
    %136 = arith.addf %134, %135 : vector<2x32xf32>
    %137 = arith.mulf %136, %132 : vector<2x32xf32>
    %cst_53 = arith.constant 1.42141378 : f32
    %138 = vector.broadcast %cst_53 : f32 to vector<2x32xf32>
    %139 = arith.addf %137, %138 : vector<2x32xf32>
    %140 = arith.mulf %139, %132 : vector<2x32xf32>
    %cst_54 = arith.constant -0.284496725 : f32
    %141 = vector.broadcast %cst_54 : f32 to vector<2x32xf32>
    %142 = arith.addf %140, %141 : vector<2x32xf32>
    %143 = arith.mulf %142, %132 : vector<2x32xf32>
    %cst_55 = arith.constant 0.254829586 : f32
    %144 = vector.broadcast %cst_55 : f32 to vector<2x32xf32>
    %145 = arith.addf %143, %144 : vector<2x32xf32>
    %146 = arith.mulf %145, %132 : vector<2x32xf32>
    %cst_56 = arith.constant 0.000000e+00 : f32
    %147 = vector.broadcast %cst_56 : f32 to vector<2x32xf32>
    %148 = arith.subf %147, %126 : vector<2x32xf32>
    %149 = arith.mulf %148, %126 : vector<2x32xf32>
    %150 = math.exp %149 : vector<2x32xf32>
    %151 = arith.mulf %146, %150 : vector<2x32xf32>
    %cst_57 = arith.constant 1.000000e+00 : f32
    %152 = vector.broadcast %cst_57 : f32 to vector<2x32xf32>
    %153 = arith.subf %152, %151 : vector<2x32xf32>
    %154 = arith.mulf %125, %153 : vector<2x32xf32>
    %cst_58 = arith.constant 1.000000e+00 : f32
    %155 = vector.broadcast %cst_58 : f32 to vector<2x32xf32>
    %156 = arith.addf %155, %154 : vector<2x32xf32>
    %157 = arith.mulf %118, %156 : vector<2x32xf32>
    %158 = vector.extract_strided_slice %89 {offsets = [3, 0], sizes = [1, 32], strides = [1, 1]} : vector<4x32xf32> to vector<1x32xf32>
    %159 = vector.broadcast %158 : vector<1x32xf32> to vector<2x32xf32>
    %160 = arith.addf %157, %159 : vector<2x32xf32>
    %161 = vector.shape_cast %160 : vector<2x32xf32> to vector<2x1x32xf32>
    %c0_59 = arith.constant 0 : index
    %c1_60 = arith.constant 1 : index
    %c0_61 = arith.constant 0 : index
    %162 = vector.load %arg4[%c0_59, %c1_60, %c0_61] : memref<2x8x32xf32, #tpu.memory_space<vmem>>, vector<2x1x32xf32>
    tpu.vector_store %arg4[%c0_59, %c1_60, %c0_61], %161 {strides = array<i32>} : memref<2x8x32xf32, #tpu.memory_space<vmem>>, vector<2x1x32xf32>,
    %163 = vector.extract_strided_slice %0 {offsets = [0, 2, 0], sizes = [2, 1, 64], strides = [1, 1, 1]} : vector<2x8x64xf32> to vector<2x1x64xf32>
    %164 = vector.shape_cast %163 : vector<2x1x64xf32> to vector<2x64xf32>
    %165 = arith.truncf %164 : vector<2x64xf32> to vector<2x64xbf16>
    %c2 = arith.constant 2 : index
    %c0_62 = arith.constant 0 : index
    %c0_63 = arith.constant 0 : index
    %166 = vector.load %arg2[%c2, %c0_62, %c0_63] : memref<8x64x32xbf16, #tpu.memory_space<vmem>>, vector<1x64x32xbf16>
    %167 = vector.shape_cast %166 : vector<1x64x32xbf16> to vector<64x32xbf16>
    %cst_64 = arith.constant dense<0.000000e+00> : vector<2x32xf32>
    %168 = tpu.matmul %165, %167, %cst_64 {dimension_numbers = #tpu.dot_dimension_numbers<[1], [0], [0], [1], [0, 0, 1, 1], [], []>} : vector<2x64xbf16>, vector<64x32xbf16>, vector<2x32xf32> -> vector<2x32xf32>
    %c2_65 = arith.constant 2 : index
    %c0_66 = arith.constant 0 : index
    %c0_67 = arith.constant 0 : index
    %169 = vector.load %arg3[%c2_65, %c0_66, %c0_67] : memref<8x4x32xf32, #tpu.memory_space<vmem>>, vector<1x4x32xf32>
    %170 = vector.shape_cast %169 : vector<1x4x32xf32> to vector<4x32xf32>
    %171 = vector.extract_strided_slice %170 {offsets = [0, 0], sizes = [1, 32], strides = [1, 1]} : vector<4x32xf32> to vector<1x32xf32>
    %172 = vector.broadcast %171 : vector<1x32xf32> to vector<2x32xf32>
    %173 = arith.addf %168, %172 : vector<2x32xf32>
    %174 = vector.extract_strided_slice %170 {offsets = [1, 0], sizes = [1, 32], strides = [1, 1]} : vector<4x32xf32> to vector<1x32xf32>
    %175 = vector.extract_strided_slice %170 {offsets = [2, 0], sizes = [1, 32], strides = [1, 1]} : vector<4x32xf32> to vector<1x32xf32>
    %cst_68 = arith.constant dense<0.000000e+00> : vector<2xf32>
    %176 = vector.multi_reduction <add>, %173, %cst_68 [1] : vector<2x32xf32> to vector<2xf32>
    %177 = vector.shape_cast %176 : vector<2xf32> to vector<2x1xf32>
    %cst_69 = arith.constant 3.200000e+01 : f32
    %178 = vector.broadcast %cst_69 : f32 to vector<2x1xf32>
    %179 = arith.divf %177, %178 : vector<2x1xf32>
    %180 = vector.broadcast %179 : vector<2x1xf32> to vector<2x32xf32>
    %181 = arith.subf %173, %180 : vector<2x32xf32>
    %182 = arith.mulf %181, %181 : vector<2x32xf32>
    %cst_70 = arith.constant dense<0.000000e+00> : vector<2xf32>
    %183 = vector.multi_reduction <add>, %182, %cst_70 [1] : vector<2x32xf32> to vector<2xf32>
    %184 = vector.shape_cast %183 : vector<2xf32> to vector<2x1xf32>
    %cst_71 = arith.constant 3.200000e+01 : f32
    %185 = vector.broadcast %cst_71 : f32 to vector<2x1xf32>
    %186 = arith.divf %184, %185 : vector<2x1xf32>
    %187 = vector.broadcast %179 : vector<2x1xf32> to vector<2x32xf32>
    %188 = arith.subf %173, %187 : vector<2x32xf32>
    %cst_72 = arith.constant 9.99999974E-6 : f32
    %189 = vector.broadcast %cst_72 : f32 to vector<2x1xf32>
    %190 = arith.addf %186, %189 : vector<2x1xf32>
    %191 = math.rsqrt %190 : vector<2x1xf32>
    %192 = vector.broadcast %191 : vector<2x1xf32> to vector<2x32xf32>
    %193 = arith.mulf %188, %192 : vector<2x32xf32>
    %194 = vector.broadcast %174 : vector<1x32xf32> to vector<2x32xf32>
    %195 = arith.mulf %193, %194 : vector<2x32xf32>
    %196 = vector.broadcast %175 : vector<1x32xf32> to vector<2x32xf32>
    %197 = arith.addf %195, %196 : vector<2x32xf32>
    %cst_73 = arith.constant 5.000000e-01 : f32
    %198 = vector.broadcast %cst_73 : f32 to vector<2x32xf32>
    %199 = arith.mulf %198, %197 : vector<2x32xf32>
    %cst_74 = arith.constant 0.707106769 : f32
    %200 = vector.broadcast %cst_74 : f32 to vector<2x32xf32>
    %201 = arith.mulf %197, %200 : vector<2x32xf32>
    %cst_75 = arith.constant 0.000000e+00 : f32
    %202 = vector.broadcast %cst_75 : f32 to vector<2x32xf32>
    %203 = arith.cmpf oge, %201, %202 : vector<2x32xf32>
    %cst_76 = arith.constant 1.000000e+00 : f32
    %cst_77 = arith.constant -1.000000e+00 : f32
    %204 = vector.broadcast %cst_76 : f32 to vector<2x32xf32>
    %205 = vector.broadcast %cst_77 : f32 to vector<2x32xf32>
    %206 = arith.select %203, %204, %205 : vector<2x32xi1>, vector<2x32xf32>
    %207 = math.absf %201 : vector<2x32xf32>
    %cst_78 = arith.constant 0.327591091 : f32
    %208 = vector.broadcast %cst_78 : f32 to vector<2x32xf32>
    %209 = arith.mulf %208, %207 : vector<2x32xf32>
    %cst_79 = arith.constant 1.000000e+00 : f32
    %210 = vector.broadcast %cst_79 : f32 to vector<2x32xf32>
    %211 = arith.addf %210, %209 : vector<2x32xf32>
    %cst_80 = arith.constant 1.000000e+00 : f32
    %212 = vector.broadcast %cst_80 : f32 to vector<2x32xf32>
    %213 = arith.divf %212, %211 : vector<2x32xf32>
    %cst_81 = arith.constant 1.06140542 : f32
    %214 = vector.broadcast %cst_81 : f32 to vector<2x32xf32>
    %215 = arith.mulf %214, %213 : vector<2x32xf32>
    %cst_82 = arith.constant -1.45315206 : f32
    %216 = vector.broadcast %cst_82 : f32 to vector<2x32xf32>
    %217 = arith.addf %215, %216 : vector<2x32xf32>
    %218 = arith.mulf %217, %213 : vector<2x32xf32>
    %cst_83 = arith.constant 1.42141378 : f32
    %219 = vector.broadcast %cst_83 : f32 to vector<2x32xf32>
    %220 = arith.addf %218, %219 : vector<2x32xf32>
    %221 = arith.mulf %220, %213 : vector<2x32xf32>
    %cst_84 = arith.constant -0.284496725 : f32
    %222 = vector.broadcast %cst_84 : f32 to vector<2x32xf32>
    %223 = arith.addf %221, %222 : vector<2x32xf32>
    %224 = arith.mulf %223, %213 : vector<2x32xf32>
    %cst_85 = arith.constant 0.254829586 : f32
    %225 = vector.broadcast %cst_85 : f32 to vector<2x32xf32>
    %226 = arith.addf %224, %225 : vector<2x32xf32>
    %227 = arith.mulf %226, %213 : vector<2x32xf32>
    %cst_86 = arith.constant 0.000000e+00 : f32
    %228 = vector.broadcast %cst_86 : f32 to vector<2x32xf32>
    %229 = arith.subf %228, %207 : vector<2x32xf32>
    %230 = arith.mulf %229, %207 : vector<2x32xf32>
    %231 = math.exp %230 : vector<2x32xf32>
    %232 = arith.mulf %227, %231 : vector<2x32xf32>
    %cst_87 = arith.constant 1.000000e+00 : f32
    %233 = vector.broadcast %cst_87 : f32 to vector<2x32xf32>
    %234 = arith.subf %233, %232 : vector<2x32xf32>
    %235 = arith.mulf %206, %234 : vector<2x32xf32>
    %cst_88 = arith.constant 1.000000e+00 : f32
    %236 = vector.broadcast %cst_88 : f32 to vector<2x32xf32>
    %237 = arith.addf %236, %235 : vector<2x32xf32>
    %238 = arith.mulf %199, %237 : vector<2x32xf32>
    %239 = vector.extract_strided_slice %170 {offsets = [3, 0], sizes = [1, 32], strides = [1, 1]} : vector<4x32xf32> to vector<1x32xf32>
    %240 = vector.broadcast %239 : vector<1x32xf32> to vector<2x32xf32>
    %241 = arith.addf %238, %240 : vector<2x32xf32>
    %242 = vector.shape_cast %241 : vector<2x32xf32> to vector<2x1x32xf32>
    %c0_89 = arith.constant 0 : index
    %c2_90 = arith.constant 2 : index
    %c0_91 = arith.constant 0 : index
    %243 = vector.load %arg4[%c0_89, %c2_90, %c0_91] : memref<2x8x32xf32, #tpu.memory_space<vmem>>, vector<2x1x32xf32>
    tpu.vector_store %arg4[%c0_89, %c2_90, %c0_91], %242 {strides = array<i32>} : memref<2x8x32xf32, #tpu.memory_space<vmem>>, vector<2x1x32xf32>,
    %244 = vector.extract_strided_slice %0 {offsets = [0, 3, 0], sizes = [2, 1, 64], strides = [1, 1, 1]} : vector<2x8x64xf32> to vector<2x1x64xf32>
    %245 = vector.shape_cast %244 : vector<2x1x64xf32> to vector<2x64xf32>
    %246 = arith.truncf %245 : vector<2x64xf32> to vector<2x64xbf16>
    %c3 = arith.constant 3 : index
    %c0_92 = arith.constant 0 : index
    %c0_93 = arith.constant 0 : index
    %247 = vector.load %arg2[%c3, %c0_92, %c0_93] : memref<8x64x32xbf16, #tpu.memory_space<vmem>>, vector<1x64x32xbf16>
    %248 = vector.shape_cast %247 : vector<1x64x32xbf16> to vector<64x32xbf16>
    %cst_94 = arith.constant dense<0.000000e+00> : vector<2x32xf32>
    %249 = tpu.matmul %246, %248, %cst_94 {dimension_numbers = #tpu.dot_dimension_numbers<[1], [0], [0], [1], [0, 0, 1, 1], [], []>} : vector<2x64xbf16>, vector<64x32xbf16>, vector<2x32xf32> -> vector<2x32xf32>
    %c3_95 = arith.constant 3 : index
    %c0_96 = arith.constant 0 : index
    %c0_97 = arith.constant 0 : index
    %250 = vector.load %arg3[%c3_95, %c0_96, %c0_97] : memref<8x4x32xf32, #tpu.memory_space<vmem>>, vector<1x4x32xf32>
    %251 = vector.shape_cast %250 : vector<1x4x32xf32> to vector<4x32xf32>
    %252 = vector.extract_strided_slice %251 {offsets = [0, 0], sizes = [1, 32], strides = [1, 1]} : vector<4x32xf32> to vector<1x32xf32>
    %253 = vector.broadcast %252 : vector<1x32xf32> to vector<2x32xf32>
    %254 = arith.addf %249, %253 : vector<2x32xf32>
    %255 = vector.extract_strided_slice %251 {offsets = [1, 0], sizes = [1, 32], strides = [1, 1]} : vector<4x32xf32> to vector<1x32xf32>
    %256 = vector.extract_strided_slice %251 {offsets = [2, 0], sizes = [1, 32], strides = [1, 1]} : vector<4x32xf32> to vector<1x32xf32>
    %cst_98 = arith.constant dense<0.000000e+00> : vector<2xf32>
    %257 = vector.multi_reduction <add>, %254, %cst_98 [1] : vector<2x32xf32> to vector<2xf32>
    %258 = vector.shape_cast %257 : vector<2xf32> to vector<2x1xf32>
    %cst_99 = arith.constant 3.200000e+01 : f32
    %259 = vector.broadcast %cst_99 : f32 to vector<2x1xf32>
    %260 = arith.divf %258, %259 : vector<2x1xf32>
    %261 = vector.broadcast %260 : vector<2x1xf32> to vector<2x32xf32>
    %262 = arith.subf %254, %261 : vector<2x32xf32>
    %263 = arith.mulf %262, %262 : vector<2x32xf32>
    %cst_100 = arith.constant dense<0.000000e+00> : vector<2xf32>
    %264 = vector.multi_reduction <add>, %263, %cst_100 [1] : vector<2x32xf32> to vector<2xf32>
    %265 = vector.shape_cast %264 : vector<2xf32> to vector<2x1xf32>
    %cst_101 = arith.constant 3.200000e+01 : f32
    %266 = vector.broadcast %cst_101 : f32 to vector<2x1xf32>
    %267 = arith.divf %265, %266 : vector<2x1xf32>
    %268 = vector.broadcast %260 : vector<2x1xf32> to vector<2x32xf32>
    %269 = arith.subf %254, %268 : vector<2x32xf32>
    %cst_102 = arith.constant 9.99999974E-6 : f32
    %270 = vector.broadcast %cst_102 : f32 to vector<2x1xf32>
    %271 = arith.addf %267, %270 : vector<2x1xf32>
    %272 = math.rsqrt %271 : vector<2x1xf32>
    %273 = vector.broadcast %272 : vector<2x1xf32> to vector<2x32xf32>
    %274 = arith.mulf %269, %273 : vector<2x32xf32>
    %275 = vector.broadcast %255 : vector<1x32xf32> to vector<2x32xf32>
    %276 = arith.mulf %274, %275 : vector<2x32xf32>
    %277 = vector.broadcast %256 : vector<1x32xf32> to vector<2x32xf32>
    %278 = arith.addf %276, %277 : vector<2x32xf32>
    %cst_103 = arith.constant 5.000000e-01 : f32
    %279 = vector.broadcast %cst_103 : f32 to vector<2x32xf32>
    %280 = arith.mulf %279, %278 : vector<2x32xf32>
    %cst_104 = arith.constant 0.707106769 : f32
    %281 = vector.broadcast %cst_104 : f32 to vector<2x32xf32>
    %282 = arith.mulf %278, %281 : vector<2x32xf32>
    %cst_105 = arith.constant 0.000000e+00 : f32
    %283 = vector.broadcast %cst_105 : f32 to vector<2x32xf32>
    %284 = arith.cmpf oge, %282, %283 : vector<2x32xf32>
    %cst_106 = arith.constant 1.000000e+00 : f32
    %cst_107 = arith.constant -1.000000e+00 : f32
    %285 = vector.broadcast %cst_106 : f32 to vector<2x32xf32>
    %286 = vector.broadcast %cst_107 : f32 to vector<2x32xf32>
    %287 = arith.select %284, %285, %286 : vector<2x32xi1>, vector<2x32xf32>
    %288 = math.absf %282 : vector<2x32xf32>
    %cst_108 = arith.constant 0.327591091 : f32
    %289 = vector.broadcast %cst_108 : f32 to vector<2x32xf32>
    %290 = arith.mulf %289, %288 : vector<2x32xf32>
    %cst_109 = arith.constant 1.000000e+00 : f32
    %291 = vector.broadcast %cst_109 : f32 to vector<2x32xf32>
    %292 = arith.addf %291, %290 : vector<2x32xf32>
    %cst_110 = arith.constant 1.000000e+00 : f32
    %293 = vector.broadcast %cst_110 : f32 to vector<2x32xf32>
    %294 = arith.divf %293, %292 : vector<2x32xf32>
    %cst_111 = arith.constant 1.06140542 : f32
    %295 = vector.broadcast %cst_111 : f32 to vector<2x32xf32>
    %296 = arith.mulf %295, %294 : vector<2x32xf32>
    %cst_112 = arith.constant -1.45315206 : f32
    %297 = vector.broadcast %cst_112 : f32 to vector<2x32xf32>
    %298 = arith.addf %296, %297 : vector<2x32xf32>
    %299 = arith.mulf %298, %294 : vector<2x32xf32>
    %cst_113 = arith.constant 1.42141378 : f32
    %300 = vector.broadcast %cst_113 : f32 to vector<2x32xf32>
    %301 = arith.addf %299, %300 : vector<2x32xf32>
    %302 = arith.mulf %301, %294 : vector<2x32xf32>
    %cst_114 = arith.constant -0.284496725 : f32
    %303 = vector.broadcast %cst_114 : f32 to vector<2x32xf32>
    %304 = arith.addf %302, %303 : vector<2x32xf32>
    %305 = arith.mulf %304, %294 : vector<2x32xf32>
    %cst_115 = arith.constant 0.254829586 : f32
    %306 = vector.broadcast %cst_115 : f32 to vector<2x32xf32>
    %307 = arith.addf %305, %306 : vector<2x32xf32>
    %308 = arith.mulf %307, %294 : vector<2x32xf32>
    %cst_116 = arith.constant 0.000000e+00 : f32
    %309 = vector.broadcast %cst_116 : f32 to vector<2x32xf32>
    %310 = arith.subf %309, %288 : vector<2x32xf32>
    %311 = arith.mulf %310, %288 : vector<2x32xf32>
    %312 = math.exp %311 : vector<2x32xf32>
    %313 = arith.mulf %308, %312 : vector<2x32xf32>
    %cst_117 = arith.constant 1.000000e+00 : f32
    %314 = vector.broadcast %cst_117 : f32 to vector<2x32xf32>
    %315 = arith.subf %314, %313 : vector<2x32xf32>
    %316 = arith.mulf %287, %315 : vector<2x32xf32>
    %cst_118 = arith.constant 1.000000e+00 : f32
    %317 = vector.broadcast %cst_118 : f32 to vector<2x32xf32>
    %318 = arith.addf %317, %316 : vector<2x32xf32>
    %319 = arith.mulf %280, %318 : vector<2x32xf32>
    %320 = vector.extract_strided_slice %251 {offsets = [3, 0], sizes = [1, 32], strides = [1, 1]} : vector<4x32xf32> to vector<1x32xf32>
    %321 = vector.broadcast %320 : vector<1x32xf32> to vector<2x32xf32>
    %322 = arith.addf %319, %321 : vector<2x32xf32>
    %323 = vector.shape_cast %322 : vector<2x32xf32> to vector<2x1x32xf32>
    %c0_119 = arith.constant 0 : index
    %c3_120 = arith.constant 3 : index
    %c0_121 = arith.constant 0 : index
    %324 = vector.load %arg4[%c0_119, %c3_120, %c0_121] : memref<2x8x32xf32, #tpu.memory_space<vmem>>, vector<2x1x32xf32>
    tpu.vector_store %arg4[%c0_119, %c3_120, %c0_121], %323 {strides = array<i32>} : memref<2x8x32xf32, #tpu.memory_space<vmem>>, vector<2x1x32xf32>,
    %325 = vector.extract_strided_slice %0 {offsets = [0, 4, 0], sizes = [2, 1, 64], strides = [1, 1, 1]} : vector<2x8x64xf32> to vector<2x1x64xf32>
    %326 = vector.shape_cast %325 : vector<2x1x64xf32> to vector<2x64xf32>
    %327 = arith.truncf %326 : vector<2x64xf32> to vector<2x64xbf16>
    %c4 = arith.constant 4 : index
    %c0_122 = arith.constant 0 : index
    %c0_123 = arith.constant 0 : index
    %328 = vector.load %arg2[%c4, %c0_122, %c0_123] : memref<8x64x32xbf16, #tpu.memory_space<vmem>>, vector<1x64x32xbf16>
    %329 = vector.shape_cast %328 : vector<1x64x32xbf16> to vector<64x32xbf16>
    %cst_124 = arith.constant dense<0.000000e+00> : vector<2x32xf32>
    %330 = tpu.matmul %327, %329, %cst_124 {dimension_numbers = #tpu.dot_dimension_numbers<[1], [0], [0], [1], [0, 0, 1, 1], [], []>} : vector<2x64xbf16>, vector<64x32xbf16>, vector<2x32xf32> -> vector<2x32xf32>
    %c4_125 = arith.constant 4 : index
    %c0_126 = arith.constant 0 : index
    %c0_127 = arith.constant 0 : index
    %331 = vector.load %arg3[%c4_125, %c0_126, %c0_127] : memref<8x4x32xf32, #tpu.memory_space<vmem>>, vector<1x4x32xf32>
    %332 = vector.shape_cast %331 : vector<1x4x32xf32> to vector<4x32xf32>
    %333 = vector.extract_strided_slice %332 {offsets = [0, 0], sizes = [1, 32], strides = [1, 1]} : vector<4x32xf32> to vector<1x32xf32>
    %334 = vector.broadcast %333 : vector<1x32xf32> to vector<2x32xf32>
    %335 = arith.addf %330, %334 : vector<2x32xf32>
    %336 = vector.extract_strided_slice %332 {offsets = [1, 0], sizes = [1, 32], strides = [1, 1]} : vector<4x32xf32> to vector<1x32xf32>
    %337 = vector.extract_strided_slice %332 {offsets = [2, 0], sizes = [1, 32], strides = [1, 1]} : vector<4x32xf32> to vector<1x32xf32>
    %cst_128 = arith.constant dense<0.000000e+00> : vector<2xf32>
    %338 = vector.multi_reduction <add>, %335, %cst_128 [1] : vector<2x32xf32> to vector<2xf32>
    %339 = vector.shape_cast %338 : vector<2xf32> to vector<2x1xf32>
    %cst_129 = arith.constant 3.200000e+01 : f32
    %340 = vector.broadcast %cst_129 : f32 to vector<2x1xf32>
    %341 = arith.divf %339, %340 : vector<2x1xf32>
    %342 = vector.broadcast %341 : vector<2x1xf32> to vector<2x32xf32>
    %343 = arith.subf %335, %342 : vector<2x32xf32>
    %344 = arith.mulf %343, %343 : vector<2x32xf32>
    %cst_130 = arith.constant dense<0.000000e+00> : vector<2xf32>
    %345 = vector.multi_reduction <add>, %344, %cst_130 [1] : vector<2x32xf32> to vector<2xf32>
    %346 = vector.shape_cast %345 : vector<2xf32> to vector<2x1xf32>
    %cst_131 = arith.constant 3.200000e+01 : f32
    %347 = vector.broadcast %cst_131 : f32 to vector<2x1xf32>
    %348 = arith.divf %346, %347 : vector<2x1xf32>
    %349 = vector.broadcast %341 : vector<2x1xf32> to vector<2x32xf32>
    %350 = arith.subf %335, %349 : vector<2x32xf32>
    %cst_132 = arith.constant 9.99999974E-6 : f32
    %351 = vector.broadcast %cst_132 : f32 to vector<2x1xf32>
    %352 = arith.addf %348, %351 : vector<2x1xf32>
    %353 = math.rsqrt %352 : vector<2x1xf32>
    %354 = vector.broadcast %353 : vector<2x1xf32> to vector<2x32xf32>
    %355 = arith.mulf %350, %354 : vector<2x32xf32>
    %356 = vector.broadcast %336 : vector<1x32xf32> to vector<2x32xf32>
    %357 = arith.mulf %355, %356 : vector<2x32xf32>
    %358 = vector.broadcast %337 : vector<1x32xf32> to vector<2x32xf32>
    %359 = arith.addf %357, %358 : vector<2x32xf32>
    %cst_133 = arith.constant 5.000000e-01 : f32
    %360 = vector.broadcast %cst_133 : f32 to vector<2x32xf32>
    %361 = arith.mulf %360, %359 : vector<2x32xf32>
    %cst_134 = arith.constant 0.707106769 : f32
    %362 = vector.broadcast %cst_134 : f32 to vector<2x32xf32>
    %363 = arith.mulf %359, %362 : vector<2x32xf32>
    %cst_135 = arith.constant 0.000000e+00 : f32
    %364 = vector.broadcast %cst_135 : f32 to vector<2x32xf32>
    %365 = arith.cmpf oge, %363, %364 : vector<2x32xf32>
    %cst_136 = arith.constant 1.000000e+00 : f32
    %cst_137 = arith.constant -1.000000e+00 : f32
    %366 = vector.broadcast %cst_136 : f32 to vector<2x32xf32>
    %367 = vector.broadcast %cst_137 : f32 to vector<2x32xf32>
    %368 = arith.select %365, %366, %367 : vector<2x32xi1>, vector<2x32xf32>
    %369 = math.absf %363 : vector<2x32xf32>
    %cst_138 = arith.constant 0.327591091 : f32
    %370 = vector.broadcast %cst_138 : f32 to vector<2x32xf32>
    %371 = arith.mulf %370, %369 : vector<2x32xf32>
    %cst_139 = arith.constant 1.000000e+00 : f32
    %372 = vector.broadcast %cst_139 : f32 to vector<2x32xf32>
    %373 = arith.addf %372, %371 : vector<2x32xf32>
    %cst_140 = arith.constant 1.000000e+00 : f32
    %374 = vector.broadcast %cst_140 : f32 to vector<2x32xf32>
    %375 = arith.divf %374, %373 : vector<2x32xf32>
    %cst_141 = arith.constant 1.06140542 : f32
    %376 = vector.broadcast %cst_141 : f32 to vector<2x32xf32>
    %377 = arith.mulf %376, %375 : vector<2x32xf32>
    %cst_142 = arith.constant -1.45315206 : f32
    %378 = vector.broadcast %cst_142 : f32 to vector<2x32xf32>
    %379 = arith.addf %377, %378 : vector<2x32xf32>
    %380 = arith.mulf %379, %375 : vector<2x32xf32>
    %cst_143 = arith.constant 1.42141378 : f32
    %381 = vector.broadcast %cst_143 : f32 to vector<2x32xf32>
    %382 = arith.addf %380, %381 : vector<2x32xf32>
    %383 = arith.mulf %382, %375 : vector<2x32xf32>
    %cst_144 = arith.constant -0.284496725 : f32
    %384 = vector.broadcast %cst_144 : f32 to vector<2x32xf32>
    %385 = arith.addf %383, %384 : vector<2x32xf32>
    %386 = arith.mulf %385, %375 : vector<2x32xf32>
    %cst_145 = arith.constant 0.254829586 : f32
    %387 = vector.broadcast %cst_145 : f32 to vector<2x32xf32>
    %388 = arith.addf %386, %387 : vector<2x32xf32>
    %389 = arith.mulf %388, %375 : vector<2x32xf32>
    %cst_146 = arith.constant 0.000000e+00 : f32
    %390 = vector.broadcast %cst_146 : f32 to vector<2x32xf32>
    %391 = arith.subf %390, %369 : vector<2x32xf32>
    %392 = arith.mulf %391, %369 : vector<2x32xf32>
    %393 = math.exp %392 : vector<2x32xf32>
    %394 = arith.mulf %389, %393 : vector<2x32xf32>
    %cst_147 = arith.constant 1.000000e+00 : f32
    %395 = vector.broadcast %cst_147 : f32 to vector<2x32xf32>
    %396 = arith.subf %395, %394 : vector<2x32xf32>
    %397 = arith.mulf %368, %396 : vector<2x32xf32>
    %cst_148 = arith.constant 1.000000e+00 : f32
    %398 = vector.broadcast %cst_148 : f32 to vector<2x32xf32>
    %399 = arith.addf %398, %397 : vector<2x32xf32>
    %400 = arith.mulf %361, %399 : vector<2x32xf32>
    %401 = vector.extract_strided_slice %332 {offsets = [3, 0], sizes = [1, 32], strides = [1, 1]} : vector<4x32xf32> to vector<1x32xf32>
    %402 = vector.broadcast %401 : vector<1x32xf32> to vector<2x32xf32>
    %403 = arith.addf %400, %402 : vector<2x32xf32>
    %404 = vector.shape_cast %403 : vector<2x32xf32> to vector<2x1x32xf32>
    %c0_149 = arith.constant 0 : index
    %c4_150 = arith.constant 4 : index
    %c0_151 = arith.constant 0 : index
    %405 = vector.load %arg4[%c0_149, %c4_150, %c0_151] : memref<2x8x32xf32, #tpu.memory_space<vmem>>, vector<2x1x32xf32>
    tpu.vector_store %arg4[%c0_149, %c4_150, %c0_151], %404 {strides = array<i32>} : memref<2x8x32xf32, #tpu.memory_space<vmem>>, vector<2x1x32xf32>,
    %406 = vector.extract_strided_slice %0 {offsets = [0, 5, 0], sizes = [2, 1, 64], strides = [1, 1, 1]} : vector<2x8x64xf32> to vector<2x1x64xf32>
    %407 = vector.shape_cast %406 : vector<2x1x64xf32> to vector<2x64xf32>
    %408 = arith.truncf %407 : vector<2x64xf32> to vector<2x64xbf16>
    %c5 = arith.constant 5 : index
    %c0_152 = arith.constant 0 : index
    %c0_153 = arith.constant 0 : index
    %409 = vector.load %arg2[%c5, %c0_152, %c0_153] : memref<8x64x32xbf16, #tpu.memory_space<vmem>>, vector<1x64x32xbf16>
    %410 = vector.shape_cast %409 : vector<1x64x32xbf16> to vector<64x32xbf16>
    %cst_154 = arith.constant dense<0.000000e+00> : vector<2x32xf32>
    %411 = tpu.matmul %408, %410, %cst_154 {dimension_numbers = #tpu.dot_dimension_numbers<[1], [0], [0], [1], [0, 0, 1, 1], [], []>} : vector<2x64xbf16>, vector<64x32xbf16>, vector<2x32xf32> -> vector<2x32xf32>
    %c5_155 = arith.constant 5 : index
    %c0_156 = arith.constant 0 : index
    %c0_157 = arith.constant 0 : index
    %412 = vector.load %arg3[%c5_155, %c0_156, %c0_157] : memref<8x4x32xf32, #tpu.memory_space<vmem>>, vector<1x4x32xf32>
    %413 = vector.shape_cast %412 : vector<1x4x32xf32> to vector<4x32xf32>
    %414 = vector.extract_strided_slice %413 {offsets = [0, 0], sizes = [1, 32], strides = [1, 1]} : vector<4x32xf32> to vector<1x32xf32>
    %415 = vector.broadcast %414 : vector<1x32xf32> to vector<2x32xf32>
    %416 = arith.addf %411, %415 : vector<2x32xf32>
    %417 = vector.extract_strided_slice %413 {offsets = [1, 0], sizes = [1, 32], strides = [1, 1]} : vector<4x32xf32> to vector<1x32xf32>
    %418 = vector.extract_strided_slice %413 {offsets = [2, 0], sizes = [1, 32], strides = [1, 1]} : vector<4x32xf32> to vector<1x32xf32>
    %cst_158 = arith.constant dense<0.000000e+00> : vector<2xf32>
    %419 = vector.multi_reduction <add>, %416, %cst_158 [1] : vector<2x32xf32> to vector<2xf32>
    %420 = vector.shape_cast %419 : vector<2xf32> to vector<2x1xf32>
    %cst_159 = arith.constant 3.200000e+01 : f32
    %421 = vector.broadcast %cst_159 : f32 to vector<2x1xf32>
    %422 = arith.divf %420, %421 : vector<2x1xf32>
    %423 = vector.broadcast %422 : vector<2x1xf32> to vector<2x32xf32>
    %424 = arith.subf %416, %423 : vector<2x32xf32>
    %425 = arith.mulf %424, %424 : vector<2x32xf32>
    %cst_160 = arith.constant dense<0.000000e+00> : vector<2xf32>
    %426 = vector.multi_reduction <add>, %425, %cst_160 [1] : vector<2x32xf32> to vector<2xf32>
    %427 = vector.shape_cast %426 : vector<2xf32> to vector<2x1xf32>
    %cst_161 = arith.constant 3.200000e+01 : f32
    %428 = vector.broadcast %cst_161 : f32 to vector<2x1xf32>
    %429 = arith.divf %427, %428 : vector<2x1xf32>
    %430 = vector.broadcast %422 : vector<2x1xf32> to vector<2x32xf32>
    %431 = arith.subf %416, %430 : vector<2x32xf32>
    %cst_162 = arith.constant 9.99999974E-6 : f32
    %432 = vector.broadcast %cst_162 : f32 to vector<2x1xf32>
    %433 = arith.addf %429, %432 : vector<2x1xf32>
    %434 = math.rsqrt %433 : vector<2x1xf32>
    %435 = vector.broadcast %434 : vector<2x1xf32> to vector<2x32xf32>
    %436 = arith.mulf %431, %435 : vector<2x32xf32>
    %437 = vector.broadcast %417 : vector<1x32xf32> to vector<2x32xf32>
    %438 = arith.mulf %436, %437 : vector<2x32xf32>
    %439 = vector.broadcast %418 : vector<1x32xf32> to vector<2x32xf32>
    %440 = arith.addf %438, %439 : vector<2x32xf32>
    %cst_163 = arith.constant 5.000000e-01 : f32
    %441 = vector.broadcast %cst_163 : f32 to vector<2x32xf32>
    %442 = arith.mulf %441, %440 : vector<2x32xf32>
    %cst_164 = arith.constant 0.707106769 : f32
    %443 = vector.broadcast %cst_164 : f32 to vector<2x32xf32>
    %444 = arith.mulf %440, %443 : vector<2x32xf32>
    %cst_165 = arith.constant 0.000000e+00 : f32
    %445 = vector.broadcast %cst_165 : f32 to vector<2x32xf32>
    %446 = arith.cmpf oge, %444, %445 : vector<2x32xf32>
    %cst_166 = arith.constant 1.000000e+00 : f32
    %cst_167 = arith.constant -1.000000e+00 : f32
    %447 = vector.broadcast %cst_166 : f32 to vector<2x32xf32>
    %448 = vector.broadcast %cst_167 : f32 to vector<2x32xf32>
    %449 = arith.select %446, %447, %448 : vector<2x32xi1>, vector<2x32xf32>
    %450 = math.absf %444 : vector<2x32xf32>
    %cst_168 = arith.constant 0.327591091 : f32
    %451 = vector.broadcast %cst_168 : f32 to vector<2x32xf32>
    %452 = arith.mulf %451, %450 : vector<2x32xf32>
    %cst_169 = arith.constant 1.000000e+00 : f32
    %453 = vector.broadcast %cst_169 : f32 to vector<2x32xf32>
    %454 = arith.addf %453, %452 : vector<2x32xf32>
    %cst_170 = arith.constant 1.000000e+00 : f32
    %455 = vector.broadcast %cst_170 : f32 to vector<2x32xf32>
    %456 = arith.divf %455, %454 : vector<2x32xf32>
    %cst_171 = arith.constant 1.06140542 : f32
    %457 = vector.broadcast %cst_171 : f32 to vector<2x32xf32>
    %458 = arith.mulf %457, %456 : vector<2x32xf32>
    %cst_172 = arith.constant -1.45315206 : f32
    %459 = vector.broadcast %cst_172 : f32 to vector<2x32xf32>
    %460 = arith.addf %458, %459 : vector<2x32xf32>
    %461 = arith.mulf %460, %456 : vector<2x32xf32>
    %cst_173 = arith.constant 1.42141378 : f32
    %462 = vector.broadcast %cst_173 : f32 to vector<2x32xf32>
    %463 = arith.addf %461, %462 : vector<2x32xf32>
    %464 = arith.mulf %463, %456 : vector<2x32xf32>
    %cst_174 = arith.constant -0.284496725 : f32
    %465 = vector.broadcast %cst_174 : f32 to vector<2x32xf32>
    %466 = arith.addf %464, %465 : vector<2x32xf32>
    %467 = arith.mulf %466, %456 : vector<2x32xf32>
    %cst_175 = arith.constant 0.254829586 : f32
    %468 = vector.broadcast %cst_175 : f32 to vector<2x32xf32>
    %469 = arith.addf %467, %468 : vector<2x32xf32>
    %470 = arith.mulf %469, %456 : vector<2x32xf32>
    %cst_176 = arith.constant 0.000000e+00 : f32
    %471 = vector.broadcast %cst_176 : f32 to vector<2x32xf32>
    %472 = arith.subf %471, %450 : vector<2x32xf32>
    %473 = arith.mulf %472, %450 : vector<2x32xf32>
    %474 = math.exp %473 : vector<2x32xf32>
    %475 = arith.mulf %470, %474 : vector<2x32xf32>
    %cst_177 = arith.constant 1.000000e+00 : f32
    %476 = vector.broadcast %cst_177 : f32 to vector<2x32xf32>
    %477 = arith.subf %476, %475 : vector<2x32xf32>
    %478 = arith.mulf %449, %477 : vector<2x32xf32>
    %cst_178 = arith.constant 1.000000e+00 : f32
    %479 = vector.broadcast %cst_178 : f32 to vector<2x32xf32>
    %480 = arith.addf %479, %478 : vector<2x32xf32>
    %481 = arith.mulf %442, %480 : vector<2x32xf32>
    %482 = vector.extract_strided_slice %413 {offsets = [3, 0], sizes = [1, 32], strides = [1, 1]} : vector<4x32xf32> to vector<1x32xf32>
    %483 = vector.broadcast %482 : vector<1x32xf32> to vector<2x32xf32>
    %484 = arith.addf %481, %483 : vector<2x32xf32>
    %485 = vector.shape_cast %484 : vector<2x32xf32> to vector<2x1x32xf32>
    %c0_179 = arith.constant 0 : index
    %c5_180 = arith.constant 5 : index
    %c0_181 = arith.constant 0 : index
    %486 = vector.load %arg4[%c0_179, %c5_180, %c0_181] : memref<2x8x32xf32, #tpu.memory_space<vmem>>, vector<2x1x32xf32>
    tpu.vector_store %arg4[%c0_179, %c5_180, %c0_181], %485 {strides = array<i32>} : memref<2x8x32xf32, #tpu.memory_space<vmem>>, vector<2x1x32xf32>,
    %487 = vector.extract_strided_slice %0 {offsets = [0, 6, 0], sizes = [2, 1, 64], strides = [1, 1, 1]} : vector<2x8x64xf32> to vector<2x1x64xf32>
    %488 = vector.shape_cast %487 : vector<2x1x64xf32> to vector<2x64xf32>
    %489 = arith.truncf %488 : vector<2x64xf32> to vector<2x64xbf16>
    %c6 = arith.constant 6 : index
    %c0_182 = arith.constant 0 : index
    %c0_183 = arith.constant 0 : index
    %490 = vector.load %arg2[%c6, %c0_182, %c0_183] : memref<8x64x32xbf16, #tpu.memory_space<vmem>>, vector<1x64x32xbf16>
    %491 = vector.shape_cast %490 : vector<1x64x32xbf16> to vector<64x32xbf16>
    %cst_184 = arith.constant dense<0.000000e+00> : vector<2x32xf32>
    %492 = tpu.matmul %489, %491, %cst_184 {dimension_numbers = #tpu.dot_dimension_numbers<[1], [0], [0], [1], [0, 0, 1, 1], [], []>} : vector<2x64xbf16>, vector<64x32xbf16>, vector<2x32xf32> -> vector<2x32xf32>
    %c6_185 = arith.constant 6 : index
    %c0_186 = arith.constant 0 : index
    %c0_187 = arith.constant 0 : index
    %493 = vector.load %arg3[%c6_185, %c0_186, %c0_187] : memref<8x4x32xf32, #tpu.memory_space<vmem>>, vector<1x4x32xf32>
    %494 = vector.shape_cast %493 : vector<1x4x32xf32> to vector<4x32xf32>
    %495 = vector.extract_strided_slice %494 {offsets = [0, 0], sizes = [1, 32], strides = [1, 1]} : vector<4x32xf32> to vector<1x32xf32>
    %496 = vector.broadcast %495 : vector<1x32xf32> to vector<2x32xf32>
    %497 = arith.addf %492, %496 : vector<2x32xf32>
    %498 = vector.extract_strided_slice %494 {offsets = [1, 0], sizes = [1, 32], strides = [1, 1]} : vector<4x32xf32> to vector<1x32xf32>
    %499 = vector.extract_strided_slice %494 {offsets = [2, 0], sizes = [1, 32], strides = [1, 1]} : vector<4x32xf32> to vector<1x32xf32>
    %cst_188 = arith.constant dense<0.000000e+00> : vector<2xf32>
    %500 = vector.multi_reduction <add>, %497, %cst_188 [1] : vector<2x32xf32> to vector<2xf32>
    %501 = vector.shape_cast %500 : vector<2xf32> to vector<2x1xf32>
    %cst_189 = arith.constant 3.200000e+01 : f32
    %502 = vector.broadcast %cst_189 : f32 to vector<2x1xf32>
    %503 = arith.divf %501, %502 : vector<2x1xf32>
    %504 = vector.broadcast %503 : vector<2x1xf32> to vector<2x32xf32>
    %505 = arith.subf %497, %504 : vector<2x32xf32>
    %506 = arith.mulf %505, %505 : vector<2x32xf32>
    %cst_190 = arith.constant dense<0.000000e+00> : vector<2xf32>
    %507 = vector.multi_reduction <add>, %506, %cst_190 [1] : vector<2x32xf32> to vector<2xf32>
    %508 = vector.shape_cast %507 : vector<2xf32> to vector<2x1xf32>
    %cst_191 = arith.constant 3.200000e+01 : f32
    %509 = vector.broadcast %cst_191 : f32 to vector<2x1xf32>
    %510 = arith.divf %508, %509 : vector<2x1xf32>
    %511 = vector.broadcast %503 : vector<2x1xf32> to vector<2x32xf32>
    %512 = arith.subf %497, %511 : vector<2x32xf32>
    %cst_192 = arith.constant 9.99999974E-6 : f32
    %513 = vector.broadcast %cst_192 : f32 to vector<2x1xf32>
    %514 = arith.addf %510, %513 : vector<2x1xf32>
    %515 = math.rsqrt %514 : vector<2x1xf32>
    %516 = vector.broadcast %515 : vector<2x1xf32> to vector<2x32xf32>
    %517 = arith.mulf %512, %516 : vector<2x32xf32>
    %518 = vector.broadcast %498 : vector<1x32xf32> to vector<2x32xf32>
    %519 = arith.mulf %517, %518 : vector<2x32xf32>
    %520 = vector.broadcast %499 : vector<1x32xf32> to vector<2x32xf32>
    %521 = arith.addf %519, %520 : vector<2x32xf32>
    %cst_193 = arith.constant 5.000000e-01 : f32
    %522 = vector.broadcast %cst_193 : f32 to vector<2x32xf32>
    %523 = arith.mulf %522, %521 : vector<2x32xf32>
    %cst_194 = arith.constant 0.707106769 : f32
    %524 = vector.broadcast %cst_194 : f32 to vector<2x32xf32>
    %525 = arith.mulf %521, %524 : vector<2x32xf32>
    %cst_195 = arith.constant 0.000000e+00 : f32
    %526 = vector.broadcast %cst_195 : f32 to vector<2x32xf32>
    %527 = arith.cmpf oge, %525, %526 : vector<2x32xf32>
    %cst_196 = arith.constant 1.000000e+00 : f32
    %cst_197 = arith.constant -1.000000e+00 : f32
    %528 = vector.broadcast %cst_196 : f32 to vector<2x32xf32>
    %529 = vector.broadcast %cst_197 : f32 to vector<2x32xf32>
    %530 = arith.select %527, %528, %529 : vector<2x32xi1>, vector<2x32xf32>
    %531 = math.absf %525 : vector<2x32xf32>
    %cst_198 = arith.constant 0.327591091 : f32
    %532 = vector.broadcast %cst_198 : f32 to vector<2x32xf32>
    %533 = arith.mulf %532, %531 : vector<2x32xf32>
    %cst_199 = arith.constant 1.000000e+00 : f32
    %534 = vector.broadcast %cst_199 : f32 to vector<2x32xf32>
    %535 = arith.addf %534, %533 : vector<2x32xf32>
    %cst_200 = arith.constant 1.000000e+00 : f32
    %536 = vector.broadcast %cst_200 : f32 to vector<2x32xf32>
    %537 = arith.divf %536, %535 : vector<2x32xf32>
    %cst_201 = arith.constant 1.06140542 : f32
    %538 = vector.broadcast %cst_201 : f32 to vector<2x32xf32>
    %539 = arith.mulf %538, %537 : vector<2x32xf32>
    %cst_202 = arith.constant -1.45315206 : f32
    %540 = vector.broadcast %cst_202 : f32 to vector<2x32xf32>
    %541 = arith.addf %539, %540 : vector<2x32xf32>
    %542 = arith.mulf %541, %537 : vector<2x32xf32>
    %cst_203 = arith.constant 1.42141378 : f32
    %543 = vector.broadcast %cst_203 : f32 to vector<2x32xf32>
    %544 = arith.addf %542, %543 : vector<2x32xf32>
    %545 = arith.mulf %544, %537 : vector<2x32xf32>
    %cst_204 = arith.constant -0.284496725 : f32
    %546 = vector.broadcast %cst_204 : f32 to vector<2x32xf32>
    %547 = arith.addf %545, %546 : vector<2x32xf32>
    %548 = arith.mulf %547, %537 : vector<2x32xf32>
    %cst_205 = arith.constant 0.254829586 : f32
    %549 = vector.broadcast %cst_205 : f32 to vector<2x32xf32>
    %550 = arith.addf %548, %549 : vector<2x32xf32>
    %551 = arith.mulf %550, %537 : vector<2x32xf32>
    %cst_206 = arith.constant 0.000000e+00 : f32
    %552 = vector.broadcast %cst_206 : f32 to vector<2x32xf32>
    %553 = arith.subf %552, %531 : vector<2x32xf32>
    %554 = arith.mulf %553, %531 : vector<2x32xf32>
    %555 = math.exp %554 : vector<2x32xf32>
    %556 = arith.mulf %551, %555 : vector<2x32xf32>
    %cst_207 = arith.constant 1.000000e+00 : f32
    %557 = vector.broadcast %cst_207 : f32 to vector<2x32xf32>
    %558 = arith.subf %557, %556 : vector<2x32xf32>
    %559 = arith.mulf %530, %558 : vector<2x32xf32>
    %cst_208 = arith.constant 1.000000e+00 : f32
    %560 = vector.broadcast %cst_208 : f32 to vector<2x32xf32>
    %561 = arith.addf %560, %559 : vector<2x32xf32>
    %562 = arith.mulf %523, %561 : vector<2x32xf32>
    %563 = vector.extract_strided_slice %494 {offsets = [3, 0], sizes = [1, 32], strides = [1, 1]} : vector<4x32xf32> to vector<1x32xf32>
    %564 = vector.broadcast %563 : vector<1x32xf32> to vector<2x32xf32>
    %565 = arith.addf %562, %564 : vector<2x32xf32>
    %566 = vector.shape_cast %565 : vector<2x32xf32> to vector<2x1x32xf32>
    %c0_209 = arith.constant 0 : index
    %c6_210 = arith.constant 6 : index
    %c0_211 = arith.constant 0 : index
    %567 = vector.load %arg4[%c0_209, %c6_210, %c0_211] : memref<2x8x32xf32, #tpu.memory_space<vmem>>, vector<2x1x32xf32>
    tpu.vector_store %arg4[%c0_209, %c6_210, %c0_211], %566 {strides = array<i32>} : memref<2x8x32xf32, #tpu.memory_space<vmem>>, vector<2x1x32xf32>,
    %568 = vector.extract_strided_slice %0 {offsets = [0, 7, 0], sizes = [2, 1, 64], strides = [1, 1, 1]} : vector<2x8x64xf32> to vector<2x1x64xf32>
    %569 = vector.shape_cast %568 : vector<2x1x64xf32> to vector<2x64xf32>
    %570 = arith.truncf %569 : vector<2x64xf32> to vector<2x64xbf16>
    %c7 = arith.constant 7 : index
    %c0_212 = arith.constant 0 : index
    %c0_213 = arith.constant 0 : index
    %571 = vector.load %arg2[%c7, %c0_212, %c0_213] : memref<8x64x32xbf16, #tpu.memory_space<vmem>>, vector<1x64x32xbf16>
    %572 = vector.shape_cast %571 : vector<1x64x32xbf16> to vector<64x32xbf16>
    %cst_214 = arith.constant dense<0.000000e+00> : vector<2x32xf32>
    %573 = tpu.matmul %570, %572, %cst_214 {dimension_numbers = #tpu.dot_dimension_numbers<[1], [0], [0], [1], [0, 0, 1, 1], [], []>} : vector<2x64xbf16>, vector<64x32xbf16>, vector<2x32xf32> -> vector<2x32xf32>
    %c7_215 = arith.constant 7 : index
    %c0_216 = arith.constant 0 : index
    %c0_217 = arith.constant 0 : index
    %574 = vector.load %arg3[%c7_215, %c0_216, %c0_217] : memref<8x4x32xf32, #tpu.memory_space<vmem>>, vector<1x4x32xf32>
    %575 = vector.shape_cast %574 : vector<1x4x32xf32> to vector<4x32xf32>
    %576 = vector.extract_strided_slice %575 {offsets = [0, 0], sizes = [1, 32], strides = [1, 1]} : vector<4x32xf32> to vector<1x32xf32>
    %577 = vector.broadcast %576 : vector<1x32xf32> to vector<2x32xf32>
    %578 = arith.addf %573, %577 : vector<2x32xf32>
    %579 = vector.extract_strided_slice %575 {offsets = [1, 0], sizes = [1, 32], strides = [1, 1]} : vector<4x32xf32> to vector<1x32xf32>
    %580 = vector.extract_strided_slice %575 {offsets = [2, 0], sizes = [1, 32], strides = [1, 1]} : vector<4x32xf32> to vector<1x32xf32>
    %cst_218 = arith.constant dense<0.000000e+00> : vector<2xf32>
    %581 = vector.multi_reduction <add>, %578, %cst_218 [1] : vector<2x32xf32> to vector<2xf32>
    %582 = vector.shape_cast %581 : vector<2xf32> to vector<2x1xf32>
    %cst_219 = arith.constant 3.200000e+01 : f32
    %583 = vector.broadcast %cst_219 : f32 to vector<2x1xf32>
    %584 = arith.divf %582, %583 : vector<2x1xf32>
    %585 = vector.broadcast %584 : vector<2x1xf32> to vector<2x32xf32>
    %586 = arith.subf %578, %585 : vector<2x32xf32>
    %587 = arith.mulf %586, %586 : vector<2x32xf32>
    %cst_220 = arith.constant dense<0.000000e+00> : vector<2xf32>
    %588 = vector.multi_reduction <add>, %587, %cst_220 [1] : vector<2x32xf32> to vector<2xf32>
    %589 = vector.shape_cast %588 : vector<2xf32> to vector<2x1xf32>
    %cst_221 = arith.constant 3.200000e+01 : f32
    %590 = vector.broadcast %cst_221 : f32 to vector<2x1xf32>
    %591 = arith.divf %589, %590 : vector<2x1xf32>
    %592 = vector.broadcast %584 : vector<2x1xf32> to vector<2x32xf32>
    %593 = arith.subf %578, %592 : vector<2x32xf32>
    %cst_222 = arith.constant 9.99999974E-6 : f32
    %594 = vector.broadcast %cst_222 : f32 to vector<2x1xf32>
    %595 = arith.addf %591, %594 : vector<2x1xf32>
    %596 = math.rsqrt %595 : vector<2x1xf32>
    %597 = vector.broadcast %596 : vector<2x1xf32> to vector<2x32xf32>
    %598 = arith.mulf %593, %597 : vector<2x32xf32>
    %599 = vector.broadcast %579 : vector<1x32xf32> to vector<2x32xf32>
    %600 = arith.mulf %598, %599 : vector<2x32xf32>
    %601 = vector.broadcast %580 : vector<1x32xf32> to vector<2x32xf32>
    %602 = arith.addf %600, %601 : vector<2x32xf32>
    %cst_223 = arith.constant 5.000000e-01 : f32
    %603 = vector.broadcast %cst_223 : f32 to vector<2x32xf32>
    %604 = arith.mulf %603, %602 : vector<2x32xf32>
    %cst_224 = arith.constant 0.707106769 : f32
    %605 = vector.broadcast %cst_224 : f32 to vector<2x32xf32>
    %606 = arith.mulf %602, %605 : vector<2x32xf32>
    %cst_225 = arith.constant 0.000000e+00 : f32
    %607 = vector.broadcast %cst_225 : f32 to vector<2x32xf32>
    %608 = arith.cmpf oge, %606, %607 : vector<2x32xf32>
    %cst_226 = arith.constant 1.000000e+00 : f32
    %cst_227 = arith.constant -1.000000e+00 : f32
    %609 = vector.broadcast %cst_226 : f32 to vector<2x32xf32>
    %610 = vector.broadcast %cst_227 : f32 to vector<2x32xf32>
    %611 = arith.select %608, %609, %610 : vector<2x32xi1>, vector<2x32xf32>
    %612 = math.absf %606 : vector<2x32xf32>
    %cst_228 = arith.constant 0.327591091 : f32
    %613 = vector.broadcast %cst_228 : f32 to vector<2x32xf32>
    %614 = arith.mulf %613, %612 : vector<2x32xf32>
    %cst_229 = arith.constant 1.000000e+00 : f32
    %615 = vector.broadcast %cst_229 : f32 to vector<2x32xf32>
    %616 = arith.addf %615, %614 : vector<2x32xf32>
    %cst_230 = arith.constant 1.000000e+00 : f32
    %617 = vector.broadcast %cst_230 : f32 to vector<2x32xf32>
    %618 = arith.divf %617, %616 : vector<2x32xf32>
    %cst_231 = arith.constant 1.06140542 : f32
    %619 = vector.broadcast %cst_231 : f32 to vector<2x32xf32>
    %620 = arith.mulf %619, %618 : vector<2x32xf32>
    %cst_232 = arith.constant -1.45315206 : f32
    %621 = vector.broadcast %cst_232 : f32 to vector<2x32xf32>
    %622 = arith.addf %620, %621 : vector<2x32xf32>
    %623 = arith.mulf %622, %618 : vector<2x32xf32>
    %cst_233 = arith.constant 1.42141378 : f32
    %624 = vector.broadcast %cst_233 : f32 to vector<2x32xf32>
    %625 = arith.addf %623, %624 : vector<2x32xf32>
    %626 = arith.mulf %625, %618 : vector<2x32xf32>
    %cst_234 = arith.constant -0.284496725 : f32
    %627 = vector.broadcast %cst_234 : f32 to vector<2x32xf32>
    %628 = arith.addf %626, %627 : vector<2x32xf32>
    %629 = arith.mulf %628, %618 : vector<2x32xf32>
    %cst_235 = arith.constant 0.254829586 : f32
    %630 = vector.broadcast %cst_235 : f32 to vector<2x32xf32>
    %631 = arith.addf %629, %630 : vector<2x32xf32>
    %632 = arith.mulf %631, %618 : vector<2x32xf32>
    %cst_236 = arith.constant 0.000000e+00 : f32
    %633 = vector.broadcast %cst_236 : f32 to vector<2x32xf32>
    %634 = arith.subf %633, %612 : vector<2x32xf32>
    %635 = arith.mulf %634, %612 : vector<2x32xf32>
    %636 = math.exp %635 : vector<2x32xf32>
    %637 = arith.mulf %632, %636 : vector<2x32xf32>
    %cst_237 = arith.constant 1.000000e+00 : f32
    %638 = vector.broadcast %cst_237 : f32 to vector<2x32xf32>
    %639 = arith.subf %638, %637 : vector<2x32xf32>
    %640 = arith.mulf %611, %639 : vector<2x32xf32>
    %cst_238 = arith.constant 1.000000e+00 : f32
    %641 = vector.broadcast %cst_238 : f32 to vector<2x32xf32>
    %642 = arith.addf %641, %640 : vector<2x32xf32>
    %643 = arith.mulf %604, %642 : vector<2x32xf32>
    %644 = vector.extract_strided_slice %575 {offsets = [3, 0], sizes = [1, 32], strides = [1, 1]} : vector<4x32xf32> to vector<1x32xf32>
    %645 = vector.broadcast %644 : vector<1x32xf32> to vector<2x32xf32>
    %646 = arith.addf %643, %645 : vector<2x32xf32>
    %647 = vector.shape_cast %646 : vector<2x32xf32> to vector<2x1x32xf32>
    %c0_239 = arith.constant 0 : index
    %c7_240 = arith.constant 7 : index
    %c0_241 = arith.constant 0 : index
    %648 = vector.load %arg4[%c0_239, %c7_240, %c0_241] : memref<2x8x32xf32, #tpu.memory_space<vmem>>, vector<2x1x32xf32>
    tpu.vector_store %arg4[%c0_239, %c7_240, %c0_241], %647 {strides = array<i32>} : memref<2x8x32xf32, #tpu.memory_space<vmem>>, vector<2x1x32xf32>,
    return
  }
  func.func @transform_0(%arg0: i32) -> (i32, i32, i32) {
    %c0_i32 = arith.constant 0 : i32
    %c0_i32_0 = arith.constant 0 : i32
    %c0_i32_1 = arith.constant 0 : i32
    return %c0_i32, %arg0, %c0_i32_0 : i32, i32, i32
  }
  func.func @transform_1(%arg0: i32) -> (i32, i32, i32) {
    %c0_i32 = arith.constant 0 : i32
    %c0_i32_0 = arith.constant 0 : i32
    %c0_i32_1 = arith.constant 0 : i32
    return %arg0, %c0_i32, %c0_i32_0 : i32, i32, i32
  }
  func.func @transform_2(%arg0: i32) -> (i32, i32, i32) {
    %c0_i32 = arith.constant 0 : i32
    %c0_i32_0 = arith.constant 0 : i32
    %c0_i32_1 = arith.constant 0 : i32
    return %arg0, %c0_i32, %c0_i32_0 : i32, i32, i32
  }
  func.func @transform_3(%arg0: i32) -> (i32, i32, i32) {
    %c0_i32 = arith.constant 0 : i32
    %c0_i32_0 = arith.constant 0 : i32
    %c0_i32_1 = arith.constant 0 : i32
    return %c0_i32, %arg0, %c0_i32_0 : i32, i32, i32
  }
}

module attributes {stable_mosaic.version = 11 : i64} {
  func.func @encoder_pool_cls_kernel(%arg0: i32, %arg1: i32, %arg2: memref<2x8x32xf32, #tpu.memory_space<vmem>>, %arg3: memref<1x32x96xbf16, #tpu.memory_space<vmem>>, %arg4: memref<1x1x96xf32, #tpu.memory_space<vmem>>, %arg5: memref<1x32x32xbf16, #tpu.memory_space<vmem>>, %arg6: memref<1x1x32xf32, #tpu.memory_space<vmem>>, %arg7: memref<1x1x32xf32, #tpu.memory_space<vmem>>, %arg8: memref<1x1x32xf32, #tpu.memory_space<vmem>>, %arg9: memref<1x32x96xbf16, #tpu.memory_space<vmem>>, %arg10: memref<1x1x96xf32, #tpu.memory_space<vmem>>, %arg11: memref<1x96x32xbf16, #tpu.memory_space<vmem>>, %arg12: memref<1x1x32xf32, #tpu.memory_space<vmem>>, %arg13: memref<1x1x32xf32, #tpu.memory_space<vmem>>, %arg14: memref<1x1x32xf32, #tpu.memory_space<vmem>>, %arg15: memref<32x32xbf16, #tpu.memory_space<vmem>>, %arg16: memref<1x32xf32, #tpu.memory_space<vmem>>, %arg17: memref<32x64xbf16, #tpu.memory_space<vmem>>, %arg18: memref<1x64xf32, #tpu.memory_space<vmem>>, %arg19: memref<32x32xbf16, #tpu.memory_space<vmem>>, %arg20: memref<1x32xf32, #tpu.memory_space<vmem>>, %arg21: memref<1x32xf32, #tpu.memory_space<vmem>>, %arg22: memref<1x32xf32, #tpu.memory_space<vmem>>, %arg23: memref<32x16xbf16, #tpu.memory_space<vmem>>, %arg24: memref<1x16xf32, #tpu.memory_space<vmem>>, %arg25: memref<16x8xbf16, #tpu.memory_space<vmem>>, %arg26: memref<1x8xf32, #tpu.memory_space<vmem>>, %arg27: memref<8x2xbf16, #tpu.memory_space<vmem>>, %arg28: memref<1x2xf32, #tpu.memory_space<vmem>>, %arg29: memref<2x1x2xf32, #tpu.memory_space<vmem>>, %arg30: memref<2x8x32xf32, #tpu.memory_space<vmem>>) attributes {dimension_semantics = [#tpu.dimension_semantics<parallel>, #tpu.dimension_semantics<arbitrary>], iteration_bounds = array<i64: 1, 2>, scalar_prefetch = 0 : i64, scratch_operands = 1 : i64, tpu.core_type = #tpu.core_type<tc>, window_params = [{transform_indices = @transform_0, window_bounds = array<i64: 2, 8, 32>}, {transform_indices = @transform_1, window_bounds = array<i64: 1, 32, 96>}, {transform_indices = @transform_2, window_bounds = array<i64: 1, 1, 96>}, {transform_indices = @transform_3, window_bounds = array<i64: 1, 32, 32>}, {transform_indices = @transform_4, window_bounds = array<i64: 1, 1, 32>}, {transform_indices = @transform_5, window_bounds = array<i64: 1, 1, 32>}, {transform_indices = @transform_6, window_bounds = array<i64: 1, 1, 32>}, {transform_indices = @transform_7, window_bounds = array<i64: 1, 32, 96>}, {transform_indices = @transform_8, window_bounds = array<i64: 1, 1, 96>}, {transform_indices = @transform_9, window_bounds = array<i64: 1, 96, 32>}, {transform_indices = @transform_10, window_bounds = array<i64: 1, 1, 32>}, {transform_indices = @transform_11, window_bounds = array<i64: 1, 1, 32>}, {transform_indices = @transform_12, window_bounds = array<i64: 1, 1, 32>}, {pipeline_mode = #tpu.pipeline_mode<synchronous>, transform_indices = @transform_13, window_bounds = array<i64: 32, 32>}, {pipeline_mode = #tpu.pipeline_mode<synchronous>, transform_indices = @transform_14, window_bounds = array<i64: 1, 32>}, {pipeline_mode = #tpu.pipeline_mode<synchronous>, transform_indices = @transform_15, window_bounds = array<i64: 32, 64>}, {pipeline_mode = #tpu.pipeline_mode<synchronous>, transform_indices = @transform_16, window_bounds = array<i64: 1, 64>}, {pipeline_mode = #tpu.pipeline_mode<synchronous>, transform_indices = @transform_17, window_bounds = array<i64: 32, 32>}, {pipeline_mode = #tpu.pipeline_mode<synchronous>, transform_indices = @transform_18, window_bounds = array<i64: 1, 32>}, {pipeline_mode = #tpu.pipeline_mode<synchronous>, transform_indices = @transform_19, window_bounds = array<i64: 1, 32>}, {pipeline_mode = #tpu.pipeline_mode<synchronous>, transform_indices = @transform_20, window_bounds = array<i64: 1, 32>}, {pipeline_mode = #tpu.pipeline_mode<synchronous>, transform_indices = @transform_21, window_bounds = array<i64: 32, 16>}, {pipeline_mode = #tpu.pipeline_mode<synchronous>, transform_indices = @transform_22, window_bounds = array<i64: 1, 16>}, {pipeline_mode = #tpu.pipeline_mode<synchronous>, transform_indices = @transform_23, window_bounds = array<i64: 16, 8>}, {pipeline_mode = #tpu.pipeline_mode<synchronous>, transform_indices = @transform_24, window_bounds = array<i64: 1, 8>}, {pipeline_mode = #tpu.pipeline_mode<synchronous>, transform_indices = @transform_25, window_bounds = array<i64: 8, 2>}, {pipeline_mode = #tpu.pipeline_mode<synchronous>, transform_indices = @transform_26, window_bounds = array<i64: 1, 2>}, {transform_indices = @transform_27, window_bounds = array<i64: 2, 1, 2>}]} {
    %c0_i32 = arith.constant 0 : i32
    %0 = arith.cmpi eq, %arg1, %c0_i32 : i32
    %1 = arith.extui %0 : i1 to i32
    %c0_i32_0 = arith.constant 0 : i32
    %2 = arith.cmpi ne, %1, %c0_i32_0 : i32
    scf.if %2 {
      %c0_92 = arith.constant 0 : index
      %c0_93 = arith.constant 0 : index
      %c0_94 = arith.constant 0 : index
      %234 = vector.load %arg2[%c0_92, %c0_93, %c0_94] : memref<2x8x32xf32, #tpu.memory_space<vmem>>, vector<2x8x32xf32>
      %c0_95 = arith.constant 0 : index
      %c0_96 = arith.constant 0 : index
      %c0_97 = arith.constant 0 : index
      %235 = vector.load %arg30[%c0_95, %c0_96, %c0_97] : memref<2x8x32xf32, #tpu.memory_space<vmem>>, vector<2x8x32xf32>
      tpu.vector_store %arg30[%c0_95, %c0_96, %c0_97], %234 {strides = array<i32>} : memref<2x8x32xf32, #tpu.memory_space<vmem>>, vector<2x8x32xf32>,
    } else {
    }
    %c0 = arith.constant 0 : index
    %c0_1 = arith.constant 0 : index
    %c0_2 = arith.constant 0 : index
    %3 = vector.load %arg30[%c0, %c0_1, %c0_2] : memref<2x8x32xf32, #tpu.memory_space<vmem>>, vector<2x8x32xf32>
    %4 = vector.shape_cast %3 : vector<2x8x32xf32> to vector<16x32xf32>
    %5 = arith.truncf %4 : vector<16x32xf32> to vector<16x32xbf16>
    %c0_3 = arith.constant 0 : index
    %c0_4 = arith.constant 0 : index
    %c0_5 = arith.constant 0 : index
    %6 = vector.load %arg3[%c0_3, %c0_4, %c0_5] : memref<1x32x96xbf16, #tpu.memory_space<vmem>>, vector<1x32x96xbf16>
    %7 = vector.shape_cast %6 : vector<1x32x96xbf16> to vector<32x96xbf16>
    %cst = arith.constant dense<0.000000e+00> : vector<16x96xf32>
    %8 = tpu.matmul %5, %7, %cst {dimension_numbers = #tpu.dot_dimension_numbers<[1], [0], [0], [1], [0, 0, 1, 1], [], []>} : vector<16x32xbf16>, vector<32x96xbf16>, vector<16x96xf32> -> vector<16x96xf32>
    %c0_6 = arith.constant 0 : index
    %c0_7 = arith.constant 0 : index
    %c0_8 = arith.constant 0 : index
    %9 = vector.load %arg4[%c0_6, %c0_7, %c0_8] : memref<1x1x96xf32, #tpu.memory_space<vmem>>, vector<1x1x96xf32>
    %10 = vector.shape_cast %9 : vector<1x1x96xf32> to vector<1x96xf32>
    %11 = vector.broadcast %10 : vector<1x96xf32> to vector<16x96xf32>
    %12 = arith.addf %8, %11 : vector<16x96xf32>
    %13 = vector.extract_strided_slice %12 {offsets = [0, 0], sizes = [16, 8], strides = [1, 1]} : vector<16x96xf32> to vector<16x8xf32>
    %14 = arith.truncf %13 : vector<16x8xf32> to vector<16x8xbf16>
    %15 = vector.shape_cast %14 : vector<16x8xbf16> to vector<2x8x8xbf16>
    %16 = vector.extract_strided_slice %12 {offsets = [0, 32], sizes = [16, 8], strides = [1, 1]} : vector<16x96xf32> to vector<16x8xf32>
    %17 = arith.truncf %16 : vector<16x8xf32> to vector<16x8xbf16>
    %18 = vector.shape_cast %17 : vector<16x8xbf16> to vector<2x8x8xbf16>
    %19 = vector.extract_strided_slice %12 {offsets = [0, 64], sizes = [16, 8], strides = [1, 1]} : vector<16x96xf32> to vector<16x8xf32>
    %20 = arith.truncf %19 : vector<16x8xf32> to vector<16x8xbf16>
    %21 = vector.shape_cast %20 : vector<16x8xbf16> to vector<2x8x8xbf16>
    "tpu.trace_start"() <{level = 10 : i32, message = "bqd,bkd->bqk"}> : () -> ()
    %cst_9 = arith.constant dense<0.000000e+00> : vector<2x8x8xf32>
    %22 = tpu.matmul %15, %18, %cst_9 {dimension_numbers = #tpu.dot_dimension_numbers<[2], [2], [1], [1], [0, 0, 0, 1, 1, 1], [0], [0]>} : vector<2x8x8xbf16>, vector<2x8x8xbf16>, vector<2x8x8xf32> -> vector<2x8x8xf32>
    "tpu.trace_stop"() : () -> ()
    %cst_10 = arith.constant 0.353553385 : f32
    %23 = vector.broadcast %cst_10 : f32 to vector<2x8x8xf32>
    %24 = arith.mulf %22, %23 : vector<2x8x8xf32>
    %cst_11 = arith.constant dense<0xFF800000> : vector<2x8xf32>
    %25 = vector.multi_reduction <maximumf>, %24, %cst_11 [2] : vector<2x8x8xf32> to vector<2x8xf32>
    %26 = vector.shape_cast %25 : vector<2x8xf32> to vector<2x8x1xf32>
    %27 = vector.broadcast %26 : vector<2x8x1xf32> to vector<2x8x8xf32>
    %28 = arith.subf %24, %27 : vector<2x8x8xf32>
    %29 = math.exp %28 : vector<2x8x8xf32>
    %cst_12 = arith.constant dense<0.000000e+00> : vector<2x8xf32>
    %30 = vector.multi_reduction <add>, %29, %cst_12 [2] : vector<2x8x8xf32> to vector<2x8xf32>
    %31 = vector.shape_cast %30 : vector<2x8xf32> to vector<2x8x1xf32>
    %32 = vector.broadcast %31 : vector<2x8x1xf32> to vector<2x8x8xf32>
    %33 = arith.divf %29, %32 : vector<2x8x8xf32>
    %34 = arith.truncf %33 : vector<2x8x8xf32> to vector<2x8x8xbf16>
    "tpu.trace_start"() <{level = 10 : i32, message = "bqk,bkd->bqd"}> : () -> ()
    %cst_13 = arith.constant dense<0.000000e+00> : vector<2x8x8xf32>
    %35 = tpu.matmul %34, %21, %cst_13 {dimension_numbers = #tpu.dot_dimension_numbers<[2], [1], [1], [2], [0, 0, 0, 1, 1, 2], [0], [0]>} : vector<2x8x8xbf16>, vector<2x8x8xbf16>, vector<2x8x8xf32> -> vector<2x8x8xf32>
    "tpu.trace_stop"() : () -> ()
    %36 = vector.shape_cast %35 : vector<2x8x8xf32> to vector<16x8xf32>
    %37 = vector.extract_strided_slice %12 {offsets = [0, 8], sizes = [16, 8], strides = [1, 1]} : vector<16x96xf32> to vector<16x8xf32>
    %38 = arith.truncf %37 : vector<16x8xf32> to vector<16x8xbf16>
    %39 = vector.shape_cast %38 : vector<16x8xbf16> to vector<2x8x8xbf16>
    %40 = vector.extract_strided_slice %12 {offsets = [0, 40], sizes = [16, 8], strides = [1, 1]} : vector<16x96xf32> to vector<16x8xf32>
    %41 = arith.truncf %40 : vector<16x8xf32> to vector<16x8xbf16>
    %42 = vector.shape_cast %41 : vector<16x8xbf16> to vector<2x8x8xbf16>
    %43 = vector.extract_strided_slice %12 {offsets = [0, 72], sizes = [16, 8], strides = [1, 1]} : vector<16x96xf32> to vector<16x8xf32>
    %44 = arith.truncf %43 : vector<16x8xf32> to vector<16x8xbf16>
    %45 = vector.shape_cast %44 : vector<16x8xbf16> to vector<2x8x8xbf16>
    "tpu.trace_start"() <{level = 10 : i32, message = "bqd,bkd->bqk"}> : () -> ()
    %cst_14 = arith.constant dense<0.000000e+00> : vector<2x8x8xf32>
    %46 = tpu.matmul %39, %42, %cst_14 {dimension_numbers = #tpu.dot_dimension_numbers<[2], [2], [1], [1], [0, 0, 0, 1, 1, 1], [0], [0]>} : vector<2x8x8xbf16>, vector<2x8x8xbf16>, vector<2x8x8xf32> -> vector<2x8x8xf32>
    "tpu.trace_stop"() : () -> ()
    %cst_15 = arith.constant 0.353553385 : f32
    %47 = vector.broadcast %cst_15 : f32 to vector<2x8x8xf32>
    %48 = arith.mulf %46, %47 : vector<2x8x8xf32>
    %cst_16 = arith.constant dense<0xFF800000> : vector<2x8xf32>
    %49 = vector.multi_reduction <maximumf>, %48, %cst_16 [2] : vector<2x8x8xf32> to vector<2x8xf32>
    %50 = vector.shape_cast %49 : vector<2x8xf32> to vector<2x8x1xf32>
    %51 = vector.broadcast %50 : vector<2x8x1xf32> to vector<2x8x8xf32>
    %52 = arith.subf %48, %51 : vector<2x8x8xf32>
    %53 = math.exp %52 : vector<2x8x8xf32>
    %cst_17 = arith.constant dense<0.000000e+00> : vector<2x8xf32>
    %54 = vector.multi_reduction <add>, %53, %cst_17 [2] : vector<2x8x8xf32> to vector<2x8xf32>
    %55 = vector.shape_cast %54 : vector<2x8xf32> to vector<2x8x1xf32>
    %56 = vector.broadcast %55 : vector<2x8x1xf32> to vector<2x8x8xf32>
    %57 = arith.divf %53, %56 : vector<2x8x8xf32>
    %58 = arith.truncf %57 : vector<2x8x8xf32> to vector<2x8x8xbf16>
    "tpu.trace_start"() <{level = 10 : i32, message = "bqk,bkd->bqd"}> : () -> ()
    %cst_18 = arith.constant dense<0.000000e+00> : vector<2x8x8xf32>
    %59 = tpu.matmul %58, %45, %cst_18 {dimension_numbers = #tpu.dot_dimension_numbers<[2], [1], [1], [2], [0, 0, 0, 1, 1, 2], [0], [0]>} : vector<2x8x8xbf16>, vector<2x8x8xbf16>, vector<2x8x8xf32> -> vector<2x8x8xf32>
    "tpu.trace_stop"() : () -> ()
    %60 = vector.shape_cast %59 : vector<2x8x8xf32> to vector<16x8xf32>
    %61 = vector.extract_strided_slice %12 {offsets = [0, 16], sizes = [16, 8], strides = [1, 1]} : vector<16x96xf32> to vector<16x8xf32>
    %62 = arith.truncf %61 : vector<16x8xf32> to vector<16x8xbf16>
    %63 = vector.shape_cast %62 : vector<16x8xbf16> to vector<2x8x8xbf16>
    %64 = vector.extract_strided_slice %12 {offsets = [0, 48], sizes = [16, 8], strides = [1, 1]} : vector<16x96xf32> to vector<16x8xf32>
    %65 = arith.truncf %64 : vector<16x8xf32> to vector<16x8xbf16>
    %66 = vector.shape_cast %65 : vector<16x8xbf16> to vector<2x8x8xbf16>
    %67 = vector.extract_strided_slice %12 {offsets = [0, 80], sizes = [16, 8], strides = [1, 1]} : vector<16x96xf32> to vector<16x8xf32>
    %68 = arith.truncf %67 : vector<16x8xf32> to vector<16x8xbf16>
    %69 = vector.shape_cast %68 : vector<16x8xbf16> to vector<2x8x8xbf16>
    "tpu.trace_start"() <{level = 10 : i32, message = "bqd,bkd->bqk"}> : () -> ()
    %cst_19 = arith.constant dense<0.000000e+00> : vector<2x8x8xf32>
    %70 = tpu.matmul %63, %66, %cst_19 {dimension_numbers = #tpu.dot_dimension_numbers<[2], [2], [1], [1], [0, 0, 0, 1, 1, 1], [0], [0]>} : vector<2x8x8xbf16>, vector<2x8x8xbf16>, vector<2x8x8xf32> -> vector<2x8x8xf32>
    "tpu.trace_stop"() : () -> ()
    %cst_20 = arith.constant 0.353553385 : f32
    %71 = vector.broadcast %cst_20 : f32 to vector<2x8x8xf32>
    %72 = arith.mulf %70, %71 : vector<2x8x8xf32>
    %cst_21 = arith.constant dense<0xFF800000> : vector<2x8xf32>
    %73 = vector.multi_reduction <maximumf>, %72, %cst_21 [2] : vector<2x8x8xf32> to vector<2x8xf32>
    %74 = vector.shape_cast %73 : vector<2x8xf32> to vector<2x8x1xf32>
    %75 = vector.broadcast %74 : vector<2x8x1xf32> to vector<2x8x8xf32>
    %76 = arith.subf %72, %75 : vector<2x8x8xf32>
    %77 = math.exp %76 : vector<2x8x8xf32>
    %cst_22 = arith.constant dense<0.000000e+00> : vector<2x8xf32>
    %78 = vector.multi_reduction <add>, %77, %cst_22 [2] : vector<2x8x8xf32> to vector<2x8xf32>
    %79 = vector.shape_cast %78 : vector<2x8xf32> to vector<2x8x1xf32>
    %80 = vector.broadcast %79 : vector<2x8x1xf32> to vector<2x8x8xf32>
    %81 = arith.divf %77, %80 : vector<2x8x8xf32>
    %82 = arith.truncf %81 : vector<2x8x8xf32> to vector<2x8x8xbf16>
    "tpu.trace_start"() <{level = 10 : i32, message = "bqk,bkd->bqd"}> : () -> ()
    %cst_23 = arith.constant dense<0.000000e+00> : vector<2x8x8xf32>
    %83 = tpu.matmul %82, %69, %cst_23 {dimension_numbers = #tpu.dot_dimension_numbers<[2], [1], [1], [2], [0, 0, 0, 1, 1, 2], [0], [0]>} : vector<2x8x8xbf16>, vector<2x8x8xbf16>, vector<2x8x8xf32> -> vector<2x8x8xf32>
    "tpu.trace_stop"() : () -> ()
    %84 = vector.shape_cast %83 : vector<2x8x8xf32> to vector<16x8xf32>
    %85 = vector.extract_strided_slice %12 {offsets = [0, 24], sizes = [16, 8], strides = [1, 1]} : vector<16x96xf32> to vector<16x8xf32>
    %86 = arith.truncf %85 : vector<16x8xf32> to vector<16x8xbf16>
    %87 = vector.shape_cast %86 : vector<16x8xbf16> to vector<2x8x8xbf16>
    %88 = vector.extract_strided_slice %12 {offsets = [0, 56], sizes = [16, 8], strides = [1, 1]} : vector<16x96xf32> to vector<16x8xf32>
    %89 = arith.truncf %88 : vector<16x8xf32> to vector<16x8xbf16>
    %90 = vector.shape_cast %89 : vector<16x8xbf16> to vector<2x8x8xbf16>
    %91 = vector.extract_strided_slice %12 {offsets = [0, 88], sizes = [16, 8], strides = [1, 1]} : vector<16x96xf32> to vector<16x8xf32>
    %92 = arith.truncf %91 : vector<16x8xf32> to vector<16x8xbf16>
    %93 = vector.shape_cast %92 : vector<16x8xbf16> to vector<2x8x8xbf16>
    "tpu.trace_start"() <{level = 10 : i32, message = "bqd,bkd->bqk"}> : () -> ()
    %cst_24 = arith.constant dense<0.000000e+00> : vector<2x8x8xf32>
    %94 = tpu.matmul %87, %90, %cst_24 {dimension_numbers = #tpu.dot_dimension_numbers<[2], [2], [1], [1], [0, 0, 0, 1, 1, 1], [0], [0]>} : vector<2x8x8xbf16>, vector<2x8x8xbf16>, vector<2x8x8xf32> -> vector<2x8x8xf32>
    "tpu.trace_stop"() : () -> ()
    %cst_25 = arith.constant 0.353553385 : f32
    %95 = vector.broadcast %cst_25 : f32 to vector<2x8x8xf32>
    %96 = arith.mulf %94, %95 : vector<2x8x8xf32>
    %cst_26 = arith.constant dense<0xFF800000> : vector<2x8xf32>
    %97 = vector.multi_reduction <maximumf>, %96, %cst_26 [2] : vector<2x8x8xf32> to vector<2x8xf32>
    %98 = vector.shape_cast %97 : vector<2x8xf32> to vector<2x8x1xf32>
    %99 = vector.broadcast %98 : vector<2x8x1xf32> to vector<2x8x8xf32>
    %100 = arith.subf %96, %99 : vector<2x8x8xf32>
    %101 = math.exp %100 : vector<2x8x8xf32>
    %cst_27 = arith.constant dense<0.000000e+00> : vector<2x8xf32>
    %102 = vector.multi_reduction <add>, %101, %cst_27 [2] : vector<2x8x8xf32> to vector<2x8xf32>
    %103 = vector.shape_cast %102 : vector<2x8xf32> to vector<2x8x1xf32>
    %104 = vector.broadcast %103 : vector<2x8x1xf32> to vector<2x8x8xf32>
    %105 = arith.divf %101, %104 : vector<2x8x8xf32>
    %106 = arith.truncf %105 : vector<2x8x8xf32> to vector<2x8x8xbf16>
    "tpu.trace_start"() <{level = 10 : i32, message = "bqk,bkd->bqd"}> : () -> ()
    %cst_28 = arith.constant dense<0.000000e+00> : vector<2x8x8xf32>
    %107 = tpu.matmul %106, %93, %cst_28 {dimension_numbers = #tpu.dot_dimension_numbers<[2], [1], [1], [2], [0, 0, 0, 1, 1, 2], [0], [0]>} : vector<2x8x8xbf16>, vector<2x8x8xbf16>, vector<2x8x8xf32> -> vector<2x8x8xf32>
    "tpu.trace_stop"() : () -> ()
    %108 = vector.shape_cast %107 : vector<2x8x8xf32> to vector<16x8xf32>
    %109 = tpu.concatenate %36, %60, %84, %108 in 1 : vector<16x8xf32>, vector<16x8xf32>, vector<16x8xf32>, vector<16x8xf32> -> vector<16x32xf32>
    %110 = arith.truncf %109 : vector<16x32xf32> to vector<16x32xbf16>
    %c0_29 = arith.constant 0 : index
    %c0_30 = arith.constant 0 : index
    %c0_31 = arith.constant 0 : index
    %111 = vector.load %arg5[%c0_29, %c0_30, %c0_31] : memref<1x32x32xbf16, #tpu.memory_space<vmem>>, vector<1x32x32xbf16>
    %112 = vector.shape_cast %111 : vector<1x32x32xbf16> to vector<32x32xbf16>
    %cst_32 = arith.constant dense<0.000000e+00> : vector<16x32xf32>
    %113 = tpu.matmul %110, %112, %cst_32 {dimension_numbers = #tpu.dot_dimension_numbers<[1], [0], [0], [1], [0, 0, 1, 1], [], []>} : vector<16x32xbf16>, vector<32x32xbf16>, vector<16x32xf32> -> vector<16x32xf32>
    %c0_33 = arith.constant 0 : index
    %c0_34 = arith.constant 0 : index
    %c0_35 = arith.constant 0 : index
    %114 = vector.load %arg6[%c0_33, %c0_34, %c0_35] : memref<1x1x32xf32, #tpu.memory_space<vmem>>, vector<1x1x32xf32>
    %115 = vector.shape_cast %114 : vector<1x1x32xf32> to vector<1x32xf32>
    %116 = vector.broadcast %115 : vector<1x32xf32> to vector<16x32xf32>
    %117 = arith.addf %113, %116 : vector<16x32xf32>
    %118 = arith.addf %4, %117 : vector<16x32xf32>
    %c0_36 = arith.constant 0 : index
    %c0_37 = arith.constant 0 : index
    %c0_38 = arith.constant 0 : index
    %119 = vector.load %arg7[%c0_36, %c0_37, %c0_38] : memref<1x1x32xf32, #tpu.memory_space<vmem>>, vector<1x1x32xf32>
    %120 = vector.shape_cast %119 : vector<1x1x32xf32> to vector<1x32xf32>
    %c0_39 = arith.constant 0 : index
    %c0_40 = arith.constant 0 : index
    %c0_41 = arith.constant 0 : index
    %121 = vector.load %arg8[%c0_39, %c0_40, %c0_41] : memref<1x1x32xf32, #tpu.memory_space<vmem>>, vector<1x1x32xf32>
    %122 = vector.shape_cast %121 : vector<1x1x32xf32> to vector<1x32xf32>
    %cst_42 = arith.constant dense<0.000000e+00> : vector<16xf32>
    %123 = vector.multi_reduction <add>, %118, %cst_42 [1] : vector<16x32xf32> to vector<16xf32>
    %124 = vector.shape_cast %123 : vector<16xf32> to vector<16x1xf32>
    %cst_43 = arith.constant 3.200000e+01 : f32
    %125 = vector.broadcast %cst_43 : f32 to vector<16x1xf32>
    %126 = arith.divf %124, %125 : vector<16x1xf32>
    %127 = vector.broadcast %126 : vector<16x1xf32> to vector<16x32xf32>
    %128 = arith.subf %118, %127 : vector<16x32xf32>
    %129 = arith.mulf %128, %128 : vector<16x32xf32>
    %cst_44 = arith.constant dense<0.000000e+00> : vector<16xf32>
    %130 = vector.multi_reduction <add>, %129, %cst_44 [1] : vector<16x32xf32> to vector<16xf32>
    %131 = vector.shape_cast %130 : vector<16xf32> to vector<16x1xf32>
    %cst_45 = arith.constant 3.200000e+01 : f32
    %132 = vector.broadcast %cst_45 : f32 to vector<16x1xf32>
    %133 = arith.divf %131, %132 : vector<16x1xf32>
    %134 = vector.broadcast %126 : vector<16x1xf32> to vector<16x32xf32>
    %135 = arith.subf %118, %134 : vector<16x32xf32>
    %cst_46 = arith.constant 9.99999974E-6 : f32
    %136 = vector.broadcast %cst_46 : f32 to vector<16x1xf32>
    %137 = arith.addf %133, %136 : vector<16x1xf32>
    %138 = math.rsqrt %137 : vector<16x1xf32>
    %139 = vector.broadcast %138 : vector<16x1xf32> to vector<16x32xf32>
    %140 = arith.mulf %135, %139 : vector<16x32xf32>
    %141 = vector.broadcast %120 : vector<1x32xf32> to vector<16x32xf32>
    %142 = arith.mulf %140, %141 : vector<16x32xf32>
    %143 = vector.broadcast %122 : vector<1x32xf32> to vector<16x32xf32>
    %144 = arith.addf %142, %143 : vector<16x32xf32>
    %145 = arith.truncf %144 : vector<16x32xf32> to vector<16x32xbf16>
    %c0_47 = arith.constant 0 : index
    %c0_48 = arith.constant 0 : index
    %c0_49 = arith.constant 0 : index
    %146 = vector.load %arg9[%c0_47, %c0_48, %c0_49] : memref<1x32x96xbf16, #tpu.memory_space<vmem>>, vector<1x32x96xbf16>
    %147 = vector.shape_cast %146 : vector<1x32x96xbf16> to vector<32x96xbf16>
    %cst_50 = arith.constant dense<0.000000e+00> : vector<16x96xf32>
    %148 = tpu.matmul %145, %147, %cst_50 {dimension_numbers = #tpu.dot_dimension_numbers<[1], [0], [0], [1], [0, 0, 1, 1], [], []>} : vector<16x32xbf16>, vector<32x96xbf16>, vector<16x96xf32> -> vector<16x96xf32>
    %c0_51 = arith.constant 0 : index
    %c0_52 = arith.constant 0 : index
    %c0_53 = arith.constant 0 : index
    %149 = vector.load %arg10[%c0_51, %c0_52, %c0_53] : memref<1x1x96xf32, #tpu.memory_space<vmem>>, vector<1x1x96xf32>
    %150 = vector.shape_cast %149 : vector<1x1x96xf32> to vector<1x96xf32>
    %151 = vector.broadcast %150 : vector<1x96xf32> to vector<16x96xf32>
    %152 = arith.addf %148, %151 : vector<16x96xf32>
    %cst_54 = arith.constant 5.000000e-01 : f32
    %153 = vector.broadcast %cst_54 : f32 to vector<16x96xf32>
    %154 = arith.mulf %153, %152 : vector<16x96xf32>
    %cst_55 = arith.constant 0.707106769 : f32
    %155 = vector.broadcast %cst_55 : f32 to vector<16x96xf32>
    %156 = arith.mulf %152, %155 : vector<16x96xf32>
    %cst_56 = arith.constant 0.000000e+00 : f32
    %157 = vector.broadcast %cst_56 : f32 to vector<16x96xf32>
    %158 = arith.cmpf oge, %156, %157 : vector<16x96xf32>
    %cst_57 = arith.constant 1.000000e+00 : f32
    %cst_58 = arith.constant -1.000000e+00 : f32
    %159 = vector.broadcast %cst_57 : f32 to vector<16x96xf32>
    %160 = vector.broadcast %cst_58 : f32 to vector<16x96xf32>
    %161 = arith.select %158, %159, %160 : vector<16x96xi1>, vector<16x96xf32>
    %162 = math.absf %156 : vector<16x96xf32>
    %cst_59 = arith.constant 0.327591091 : f32
    %163 = vector.broadcast %cst_59 : f32 to vector<16x96xf32>
    %164 = arith.mulf %163, %162 : vector<16x96xf32>
    %cst_60 = arith.constant 1.000000e+00 : f32
    %165 = vector.broadcast %cst_60 : f32 to vector<16x96xf32>
    %166 = arith.addf %165, %164 : vector<16x96xf32>
    %cst_61 = arith.constant 1.000000e+00 : f32
    %167 = vector.broadcast %cst_61 : f32 to vector<16x96xf32>
    %168 = arith.divf %167, %166 : vector<16x96xf32>
    %cst_62 = arith.constant 1.06140542 : f32
    %169 = vector.broadcast %cst_62 : f32 to vector<16x96xf32>
    %170 = arith.mulf %169, %168 : vector<16x96xf32>
    %cst_63 = arith.constant -1.45315206 : f32
    %171 = vector.broadcast %cst_63 : f32 to vector<16x96xf32>
    %172 = arith.addf %170, %171 : vector<16x96xf32>
    %173 = arith.mulf %172, %168 : vector<16x96xf32>
    %cst_64 = arith.constant 1.42141378 : f32
    %174 = vector.broadcast %cst_64 : f32 to vector<16x96xf32>
    %175 = arith.addf %173, %174 : vector<16x96xf32>
    %176 = arith.mulf %175, %168 : vector<16x96xf32>
    %cst_65 = arith.constant -0.284496725 : f32
    %177 = vector.broadcast %cst_65 : f32 to vector<16x96xf32>
    %178 = arith.addf %176, %177 : vector<16x96xf32>
    %179 = arith.mulf %178, %168 : vector<16x96xf32>
    %cst_66 = arith.constant 0.254829586 : f32
    %180 = vector.broadcast %cst_66 : f32 to vector<16x96xf32>
    %181 = arith.addf %179, %180 : vector<16x96xf32>
    %182 = arith.mulf %181, %168 : vector<16x96xf32>
    %cst_67 = arith.constant 0.000000e+00 : f32
    %183 = vector.broadcast %cst_67 : f32 to vector<16x96xf32>
    %184 = arith.subf %183, %162 : vector<16x96xf32>
    %185 = arith.mulf %184, %162 : vector<16x96xf32>
    %186 = math.exp %185 : vector<16x96xf32>
    %187 = arith.mulf %182, %186 : vector<16x96xf32>
    %cst_68 = arith.constant 1.000000e+00 : f32
    %188 = vector.broadcast %cst_68 : f32 to vector<16x96xf32>
    %189 = arith.subf %188, %187 : vector<16x96xf32>
    %190 = arith.mulf %161, %189 : vector<16x96xf32>
    %cst_69 = arith.constant 1.000000e+00 : f32
    %191 = vector.broadcast %cst_69 : f32 to vector<16x96xf32>
    %192 = arith.addf %191, %190 : vector<16x96xf32>
    %193 = arith.mulf %154, %192 : vector<16x96xf32>
    %194 = arith.truncf %193 : vector<16x96xf32> to vector<16x96xbf16>
    %c0_70 = arith.constant 0 : index
    %c0_71 = arith.constant 0 : index
    %c0_72 = arith.constant 0 : index
    %195 = vector.load %arg11[%c0_70, %c0_71, %c0_72] : memref<1x96x32xbf16, #tpu.memory_space<vmem>>, vector<1x96x32xbf16>
    %196 = vector.shape_cast %195 : vector<1x96x32xbf16> to vector<96x32xbf16>
    %cst_73 = arith.constant dense<0.000000e+00> : vector<16x32xf32>
    %197 = tpu.matmul %194, %196, %cst_73 {dimension_numbers = #tpu.dot_dimension_numbers<[1], [0], [0], [1], [0, 0, 1, 1], [], []>} : vector<16x96xbf16>, vector<96x32xbf16>, vector<16x32xf32> -> vector<16x32xf32>
    %c0_74 = arith.constant 0 : index
    %c0_75 = arith.constant 0 : index
    %c0_76 = arith.constant 0 : index
    %198 = vector.load %arg12[%c0_74, %c0_75, %c0_76] : memref<1x1x32xf32, #tpu.memory_space<vmem>>, vector<1x1x32xf32>
    %199 = vector.shape_cast %198 : vector<1x1x32xf32> to vector<1x32xf32>
    %200 = vector.broadcast %199 : vector<1x32xf32> to vector<16x32xf32>
    %201 = arith.addf %197, %200 : vector<16x32xf32>
    %202 = arith.addf %144, %201 : vector<16x32xf32>
    %c0_77 = arith.constant 0 : index
    %c0_78 = arith.constant 0 : index
    %c0_79 = arith.constant 0 : index
    %203 = vector.load %arg13[%c0_77, %c0_78, %c0_79] : memref<1x1x32xf32, #tpu.memory_space<vmem>>, vector<1x1x32xf32>
    %204 = vector.shape_cast %203 : vector<1x1x32xf32> to vector<1x32xf32>
    %c0_80 = arith.constant 0 : index
    %c0_81 = arith.constant 0 : index
    %c0_82 = arith.constant 0 : index
    %205 = vector.load %arg14[%c0_80, %c0_81, %c0_82] : memref<1x1x32xf32, #tpu.memory_space<vmem>>, vector<1x1x32xf32>
    %206 = vector.shape_cast %205 : vector<1x1x32xf32> to vector<1x32xf32>
    %cst_83 = arith.constant dense<0.000000e+00> : vector<16xf32>
    %207 = vector.multi_reduction <add>, %202, %cst_83 [1] : vector<16x32xf32> to vector<16xf32>
    %208 = vector.shape_cast %207 : vector<16xf32> to vector<16x1xf32>
    %cst_84 = arith.constant 3.200000e+01 : f32
    %209 = vector.broadcast %cst_84 : f32 to vector<16x1xf32>
    %210 = arith.divf %208, %209 : vector<16x1xf32>
    %211 = vector.broadcast %210 : vector<16x1xf32> to vector<16x32xf32>
    %212 = arith.subf %202, %211 : vector<16x32xf32>
    %213 = arith.mulf %212, %212 : vector<16x32xf32>
    %cst_85 = arith.constant dense<0.000000e+00> : vector<16xf32>
    %214 = vector.multi_reduction <add>, %213, %cst_85 [1] : vector<16x32xf32> to vector<16xf32>
    %215 = vector.shape_cast %214 : vector<16xf32> to vector<16x1xf32>
    %cst_86 = arith.constant 3.200000e+01 : f32
    %216 = vector.broadcast %cst_86 : f32 to vector<16x1xf32>
    %217 = arith.divf %215, %216 : vector<16x1xf32>
    %218 = vector.broadcast %210 : vector<16x1xf32> to vector<16x32xf32>
    %219 = arith.subf %202, %218 : vector<16x32xf32>
    %cst_87 = arith.constant 9.99999974E-6 : f32
    %220 = vector.broadcast %cst_87 : f32 to vector<16x1xf32>
    %221 = arith.addf %217, %220 : vector<16x1xf32>
    %222 = math.rsqrt %221 : vector<16x1xf32>
    %223 = vector.broadcast %222 : vector<16x1xf32> to vector<16x32xf32>
    %224 = arith.mulf %219, %223 : vector<16x32xf32>
    %225 = vector.broadcast %204 : vector<1x32xf32> to vector<16x32xf32>
    %226 = arith.mulf %224, %225 : vector<16x32xf32>
    %227 = vector.broadcast %206 : vector<1x32xf32> to vector<16x32xf32>
    %228 = arith.addf %226, %227 : vector<16x32xf32>
    %229 = vector.shape_cast %228 : vector<16x32xf32> to vector<2x8x32xf32>
    %c0_88 = arith.constant 0 : index
    %c0_89 = arith.constant 0 : index
    %c0_90 = arith.constant 0 : index
    %230 = vector.load %arg30[%c0_88, %c0_89, %c0_90] : memref<2x8x32xf32, #tpu.memory_space<vmem>>, vector<2x8x32xf32>
    tpu.vector_store %arg30[%c0_88, %c0_89, %c0_90], %229 {strides = array<i32>} : memref<2x8x32xf32, #tpu.memory_space<vmem>>, vector<2x8x32xf32>,
    %c1_i32 = arith.constant 1 : i32
    %231 = arith.cmpi eq, %arg1, %c1_i32 : i32
    %232 = arith.extui %231 : i1 to i32
    %c0_i32_91 = arith.constant 0 : i32
    %233 = arith.cmpi ne, %232, %c0_i32_91 : i32
    scf.if %233 {
      %234 = vector.shape_cast %228 : vector<16x32xf32> to vector<2x8x32xf32>
      %cst_92 = arith.constant dense<0.000000e+00> : vector<2x32xf32>
      %235 = vector.multi_reduction <add>, %234, %cst_92 [1] : vector<2x8x32xf32> to vector<2x32xf32>
      %cst_93 = arith.constant 8.000000e+00 : f32
      %236 = vector.broadcast %cst_93 : f32 to vector<2x32xf32>
      %237 = arith.divf %235, %236 : vector<2x32xf32>
      %238 = arith.truncf %237 : vector<2x32xf32> to vector<2x32xbf16>
      %c0_94 = arith.constant 0 : index
      %c0_95 = arith.constant 0 : index
      %239 = vector.load %arg15[%c0_94, %c0_95] : memref<32x32xbf16, #tpu.memory_space<vmem>>, vector<32x32xbf16>
      %cst_96 = arith.constant dense<0.000000e+00> : vector<2x32xf32>
      %240 = tpu.matmul %238, %239, %cst_96 {dimension_numbers = #tpu.dot_dimension_numbers<[1], [0], [0], [1], [0, 0, 1, 1], [], []>} : vector<2x32xbf16>, vector<32x32xbf16>, vector<2x32xf32> -> vector<2x32xf32>
      %c0_97 = arith.constant 0 : index
      %c0_98 = arith.constant 0 : index
      %241 = vector.load %arg16[%c0_97, %c0_98] : memref<1x32xf32, #tpu.memory_space<vmem>>, vector<1x32xf32>
      %242 = vector.broadcast %241 : vector<1x32xf32> to vector<2x32xf32>
      %243 = arith.addf %240, %242 : vector<2x32xf32>
      %244 = arith.truncf %228 : vector<16x32xf32> to vector<16x32xbf16>
      %c0_99 = arith.constant 0 : index
      %c0_100 = arith.constant 0 : index
      %245 = vector.load %arg17[%c0_99, %c0_100] : memref<32x64xbf16, #tpu.memory_space<vmem>>, vector<32x64xbf16>
      %cst_101 = arith.constant dense<0.000000e+00> : vector<16x64xf32>
      %246 = tpu.matmul %244, %245, %cst_101 {dimension_numbers = #tpu.dot_dimension_numbers<[1], [0], [0], [1], [0, 0, 1, 1], [], []>} : vector<16x32xbf16>, vector<32x64xbf16>, vector<16x64xf32> -> vector<16x64xf32>
      %c0_102 = arith.constant 0 : index
      %c0_103 = arith.constant 0 : index
      %247 = vector.load %arg18[%c0_102, %c0_103] : memref<1x64xf32, #tpu.memory_space<vmem>>, vector<1x64xf32>
      %248 = vector.broadcast %247 : vector<1x64xf32> to vector<16x64xf32>
      %249 = arith.addf %246, %248 : vector<16x64xf32>
      %250 = vector.extract_strided_slice %243 {offsets = [0, 0], sizes = [2, 8], strides = [1, 1]} : vector<2x32xf32> to vector<2x8xf32>
      %251 = arith.truncf %250 : vector<2x8xf32> to vector<2x8xbf16>
      %252 = vector.shape_cast %251 : vector<2x8xbf16> to vector<2x1x8xbf16>
      %253 = vector.extract_strided_slice %249 {offsets = [0, 0], sizes = [16, 8], strides = [1, 1]} : vector<16x64xf32> to vector<16x8xf32>
      %254 = arith.truncf %253 : vector<16x8xf32> to vector<16x8xbf16>
      %255 = vector.shape_cast %254 : vector<16x8xbf16> to vector<2x8x8xbf16>
      %256 = vector.extract_strided_slice %249 {offsets = [0, 32], sizes = [16, 8], strides = [1, 1]} : vector<16x64xf32> to vector<16x8xf32>
      %257 = arith.truncf %256 : vector<16x8xf32> to vector<16x8xbf16>
      %258 = vector.shape_cast %257 : vector<16x8xbf16> to vector<2x8x8xbf16>
      "tpu.trace_start"() <{level = 10 : i32, message = "bqd,bkd->bqk"}> : () -> ()
      %cst_104 = arith.constant dense<0.000000e+00> : vector<2x1x8xf32>
      %259 = tpu.matmul %252, %255, %cst_104 {dimension_numbers = #tpu.dot_dimension_numbers<[2], [2], [1], [1], [0, 0, 0, 1, 1, 1], [0], [0]>} : vector<2x1x8xbf16>, vector<2x8x8xbf16>, vector<2x1x8xf32> -> vector<2x1x8xf32>
      "tpu.trace_stop"() : () -> ()
      %cst_105 = arith.constant 0.353553385 : f32
      %260 = vector.broadcast %cst_105 : f32 to vector<2x1x8xf32>
      %261 = arith.mulf %259, %260 : vector<2x1x8xf32>
      %cst_106 = arith.constant dense<0xFF800000> : vector<2x1xf32>
      %262 = vector.multi_reduction <maximumf>, %261, %cst_106 [2] : vector<2x1x8xf32> to vector<2x1xf32>
      %263 = vector.shape_cast %262 : vector<2x1xf32> to vector<2x1x1xf32>
      %264 = vector.broadcast %263 : vector<2x1x1xf32> to vector<2x1x8xf32>
      %265 = arith.subf %261, %264 : vector<2x1x8xf32>
      %266 = math.exp %265 : vector<2x1x8xf32>
      %cst_107 = arith.constant dense<0.000000e+00> : vector<2x1xf32>
      %267 = vector.multi_reduction <add>, %266, %cst_107 [2] : vector<2x1x8xf32> to vector<2x1xf32>
      %268 = vector.shape_cast %267 : vector<2x1xf32> to vector<2x1x1xf32>
      %269 = vector.broadcast %268 : vector<2x1x1xf32> to vector<2x1x8xf32>
      %270 = arith.divf %266, %269 : vector<2x1x8xf32>
      %271 = arith.truncf %270 : vector<2x1x8xf32> to vector<2x1x8xbf16>
      "tpu.trace_start"() <{level = 10 : i32, message = "bqk,bkd->bqd"}> : () -> ()
      %cst_108 = arith.constant dense<0.000000e+00> : vector<2x1x8xf32>
      %272 = tpu.matmul %271, %258, %cst_108 {dimension_numbers = #tpu.dot_dimension_numbers<[2], [1], [1], [2], [0, 0, 0, 1, 1, 2], [0], [0]>} : vector<2x1x8xbf16>, vector<2x8x8xbf16>, vector<2x1x8xf32> -> vector<2x1x8xf32>
      "tpu.trace_stop"() : () -> ()
      %273 = vector.shape_cast %272 : vector<2x1x8xf32> to vector<2x8xf32>
      %274 = vector.extract_strided_slice %243 {offsets = [0, 8], sizes = [2, 8], strides = [1, 1]} : vector<2x32xf32> to vector<2x8xf32>
      %275 = arith.truncf %274 : vector<2x8xf32> to vector<2x8xbf16>
      %276 = vector.shape_cast %275 : vector<2x8xbf16> to vector<2x1x8xbf16>
      %277 = vector.extract_strided_slice %249 {offsets = [0, 8], sizes = [16, 8], strides = [1, 1]} : vector<16x64xf32> to vector<16x8xf32>
      %278 = arith.truncf %277 : vector<16x8xf32> to vector<16x8xbf16>
      %279 = vector.shape_cast %278 : vector<16x8xbf16> to vector<2x8x8xbf16>
      %280 = vector.extract_strided_slice %249 {offsets = [0, 40], sizes = [16, 8], strides = [1, 1]} : vector<16x64xf32> to vector<16x8xf32>
      %281 = arith.truncf %280 : vector<16x8xf32> to vector<16x8xbf16>
      %282 = vector.shape_cast %281 : vector<16x8xbf16> to vector<2x8x8xbf16>
      "tpu.trace_start"() <{level = 10 : i32, message = "bqd,bkd->bqk"}> : () -> ()
      %cst_109 = arith.constant dense<0.000000e+00> : vector<2x1x8xf32>
      %283 = tpu.matmul %276, %279, %cst_109 {dimension_numbers = #tpu.dot_dimension_numbers<[2], [2], [1], [1], [0, 0, 0, 1, 1, 1], [0], [0]>} : vector<2x1x8xbf16>, vector<2x8x8xbf16>, vector<2x1x8xf32> -> vector<2x1x8xf32>
      "tpu.trace_stop"() : () -> ()
      %cst_110 = arith.constant 0.353553385 : f32
      %284 = vector.broadcast %cst_110 : f32 to vector<2x1x8xf32>
      %285 = arith.mulf %283, %284 : vector<2x1x8xf32>
      %cst_111 = arith.constant dense<0xFF800000> : vector<2x1xf32>
      %286 = vector.multi_reduction <maximumf>, %285, %cst_111 [2] : vector<2x1x8xf32> to vector<2x1xf32>
      %287 = vector.shape_cast %286 : vector<2x1xf32> to vector<2x1x1xf32>
      %288 = vector.broadcast %287 : vector<2x1x1xf32> to vector<2x1x8xf32>
      %289 = arith.subf %285, %288 : vector<2x1x8xf32>
      %290 = math.exp %289 : vector<2x1x8xf32>
      %cst_112 = arith.constant dense<0.000000e+00> : vector<2x1xf32>
      %291 = vector.multi_reduction <add>, %290, %cst_112 [2] : vector<2x1x8xf32> to vector<2x1xf32>
      %292 = vector.shape_cast %291 : vector<2x1xf32> to vector<2x1x1xf32>
      %293 = vector.broadcast %292 : vector<2x1x1xf32> to vector<2x1x8xf32>
      %294 = arith.divf %290, %293 : vector<2x1x8xf32>
      %295 = arith.truncf %294 : vector<2x1x8xf32> to vector<2x1x8xbf16>
      "tpu.trace_start"() <{level = 10 : i32, message = "bqk,bkd->bqd"}> : () -> ()
      %cst_113 = arith.constant dense<0.000000e+00> : vector<2x1x8xf32>
      %296 = tpu.matmul %295, %282, %cst_113 {dimension_numbers = #tpu.dot_dimension_numbers<[2], [1], [1], [2], [0, 0, 0, 1, 1, 2], [0], [0]>} : vector<2x1x8xbf16>, vector<2x8x8xbf16>, vector<2x1x8xf32> -> vector<2x1x8xf32>
      "tpu.trace_stop"() : () -> ()
      %297 = vector.shape_cast %296 : vector<2x1x8xf32> to vector<2x8xf32>
      %298 = vector.extract_strided_slice %243 {offsets = [0, 16], sizes = [2, 8], strides = [1, 1]} : vector<2x32xf32> to vector<2x8xf32>
      %299 = arith.truncf %298 : vector<2x8xf32> to vector<2x8xbf16>
      %300 = vector.shape_cast %299 : vector<2x8xbf16> to vector<2x1x8xbf16>
      %301 = vector.extract_strided_slice %249 {offsets = [0, 16], sizes = [16, 8], strides = [1, 1]} : vector<16x64xf32> to vector<16x8xf32>
      %302 = arith.truncf %301 : vector<16x8xf32> to vector<16x8xbf16>
      %303 = vector.shape_cast %302 : vector<16x8xbf16> to vector<2x8x8xbf16>
      %304 = vector.extract_strided_slice %249 {offsets = [0, 48], sizes = [16, 8], strides = [1, 1]} : vector<16x64xf32> to vector<16x8xf32>
      %305 = arith.truncf %304 : vector<16x8xf32> to vector<16x8xbf16>
      %306 = vector.shape_cast %305 : vector<16x8xbf16> to vector<2x8x8xbf16>
      "tpu.trace_start"() <{level = 10 : i32, message = "bqd,bkd->bqk"}> : () -> ()
      %cst_114 = arith.constant dense<0.000000e+00> : vector<2x1x8xf32>
      %307 = tpu.matmul %300, %303, %cst_114 {dimension_numbers = #tpu.dot_dimension_numbers<[2], [2], [1], [1], [0, 0, 0, 1, 1, 1], [0], [0]>} : vector<2x1x8xbf16>, vector<2x8x8xbf16>, vector<2x1x8xf32> -> vector<2x1x8xf32>
      "tpu.trace_stop"() : () -> ()
      %cst_115 = arith.constant 0.353553385 : f32
      %308 = vector.broadcast %cst_115 : f32 to vector<2x1x8xf32>
      %309 = arith.mulf %307, %308 : vector<2x1x8xf32>
      %cst_116 = arith.constant dense<0xFF800000> : vector<2x1xf32>
      %310 = vector.multi_reduction <maximumf>, %309, %cst_116 [2] : vector<2x1x8xf32> to vector<2x1xf32>
      %311 = vector.shape_cast %310 : vector<2x1xf32> to vector<2x1x1xf32>
      %312 = vector.broadcast %311 : vector<2x1x1xf32> to vector<2x1x8xf32>
      %313 = arith.subf %309, %312 : vector<2x1x8xf32>
      %314 = math.exp %313 : vector<2x1x8xf32>
      %cst_117 = arith.constant dense<0.000000e+00> : vector<2x1xf32>
      %315 = vector.multi_reduction <add>, %314, %cst_117 [2] : vector<2x1x8xf32> to vector<2x1xf32>
      %316 = vector.shape_cast %315 : vector<2x1xf32> to vector<2x1x1xf32>
      %317 = vector.broadcast %316 : vector<2x1x1xf32> to vector<2x1x8xf32>
      %318 = arith.divf %314, %317 : vector<2x1x8xf32>
      %319 = arith.truncf %318 : vector<2x1x8xf32> to vector<2x1x8xbf16>
      "tpu.trace_start"() <{level = 10 : i32, message = "bqk,bkd->bqd"}> : () -> ()
      %cst_118 = arith.constant dense<0.000000e+00> : vector<2x1x8xf32>
      %320 = tpu.matmul %319, %306, %cst_118 {dimension_numbers = #tpu.dot_dimension_numbers<[2], [1], [1], [2], [0, 0, 0, 1, 1, 2], [0], [0]>} : vector<2x1x8xbf16>, vector<2x8x8xbf16>, vector<2x1x8xf32> -> vector<2x1x8xf32>
      "tpu.trace_stop"() : () -> ()
      %321 = vector.shape_cast %320 : vector<2x1x8xf32> to vector<2x8xf32>
      %322 = vector.extract_strided_slice %243 {offsets = [0, 24], sizes = [2, 8], strides = [1, 1]} : vector<2x32xf32> to vector<2x8xf32>
      %323 = arith.truncf %322 : vector<2x8xf32> to vector<2x8xbf16>
      %324 = vector.shape_cast %323 : vector<2x8xbf16> to vector<2x1x8xbf16>
      %325 = vector.extract_strided_slice %249 {offsets = [0, 24], sizes = [16, 8], strides = [1, 1]} : vector<16x64xf32> to vector<16x8xf32>
      %326 = arith.truncf %325 : vector<16x8xf32> to vector<16x8xbf16>
      %327 = vector.shape_cast %326 : vector<16x8xbf16> to vector<2x8x8xbf16>
      %328 = vector.extract_strided_slice %249 {offsets = [0, 56], sizes = [16, 8], strides = [1, 1]} : vector<16x64xf32> to vector<16x8xf32>
      %329 = arith.truncf %328 : vector<16x8xf32> to vector<16x8xbf16>
      %330 = vector.shape_cast %329 : vector<16x8xbf16> to vector<2x8x8xbf16>
      "tpu.trace_start"() <{level = 10 : i32, message = "bqd,bkd->bqk"}> : () -> ()
      %cst_119 = arith.constant dense<0.000000e+00> : vector<2x1x8xf32>
      %331 = tpu.matmul %324, %327, %cst_119 {dimension_numbers = #tpu.dot_dimension_numbers<[2], [2], [1], [1], [0, 0, 0, 1, 1, 1], [0], [0]>} : vector<2x1x8xbf16>, vector<2x8x8xbf16>, vector<2x1x8xf32> -> vector<2x1x8xf32>
      "tpu.trace_stop"() : () -> ()
      %cst_120 = arith.constant 0.353553385 : f32
      %332 = vector.broadcast %cst_120 : f32 to vector<2x1x8xf32>
      %333 = arith.mulf %331, %332 : vector<2x1x8xf32>
      %cst_121 = arith.constant dense<0xFF800000> : vector<2x1xf32>
      %334 = vector.multi_reduction <maximumf>, %333, %cst_121 [2] : vector<2x1x8xf32> to vector<2x1xf32>
      %335 = vector.shape_cast %334 : vector<2x1xf32> to vector<2x1x1xf32>
      %336 = vector.broadcast %335 : vector<2x1x1xf32> to vector<2x1x8xf32>
      %337 = arith.subf %333, %336 : vector<2x1x8xf32>
      %338 = math.exp %337 : vector<2x1x8xf32>
      %cst_122 = arith.constant dense<0.000000e+00> : vector<2x1xf32>
      %339 = vector.multi_reduction <add>, %338, %cst_122 [2] : vector<2x1x8xf32> to vector<2x1xf32>
      %340 = vector.shape_cast %339 : vector<2x1xf32> to vector<2x1x1xf32>
      %341 = vector.broadcast %340 : vector<2x1x1xf32> to vector<2x1x8xf32>
      %342 = arith.divf %338, %341 : vector<2x1x8xf32>
      %343 = arith.truncf %342 : vector<2x1x8xf32> to vector<2x1x8xbf16>
      "tpu.trace_start"() <{level = 10 : i32, message = "bqk,bkd->bqd"}> : () -> ()
      %cst_123 = arith.constant dense<0.000000e+00> : vector<2x1x8xf32>
      %344 = tpu.matmul %343, %330, %cst_123 {dimension_numbers = #tpu.dot_dimension_numbers<[2], [1], [1], [2], [0, 0, 0, 1, 1, 2], [0], [0]>} : vector<2x1x8xbf16>, vector<2x8x8xbf16>, vector<2x1x8xf32> -> vector<2x1x8xf32>
      "tpu.trace_stop"() : () -> ()
      %345 = vector.shape_cast %344 : vector<2x1x8xf32> to vector<2x8xf32>
      %346 = tpu.concatenate %273, %297, %321, %345 in 1 : vector<2x8xf32>, vector<2x8xf32>, vector<2x8xf32>, vector<2x8xf32> -> vector<2x32xf32>
      %347 = arith.truncf %346 : vector<2x32xf32> to vector<2x32xbf16>
      %c0_124 = arith.constant 0 : index
      %c0_125 = arith.constant 0 : index
      %348 = vector.load %arg19[%c0_124, %c0_125] : memref<32x32xbf16, #tpu.memory_space<vmem>>, vector<32x32xbf16>
      %cst_126 = arith.constant dense<0.000000e+00> : vector<2x32xf32>
      %349 = tpu.matmul %347, %348, %cst_126 {dimension_numbers = #tpu.dot_dimension_numbers<[1], [0], [0], [1], [0, 0, 1, 1], [], []>} : vector<2x32xbf16>, vector<32x32xbf16>, vector<2x32xf32> -> vector<2x32xf32>
      %c0_127 = arith.constant 0 : index
      %c0_128 = arith.constant 0 : index
      %350 = vector.load %arg20[%c0_127, %c0_128] : memref<1x32xf32, #tpu.memory_space<vmem>>, vector<1x32xf32>
      %351 = vector.broadcast %350 : vector<1x32xf32> to vector<2x32xf32>
      %352 = arith.addf %349, %351 : vector<2x32xf32>
      %c0_129 = arith.constant 0 : index
      %c0_130 = arith.constant 0 : index
      %353 = vector.load %arg21[%c0_129, %c0_130] : memref<1x32xf32, #tpu.memory_space<vmem>>, vector<1x32xf32>
      %c0_131 = arith.constant 0 : index
      %c0_132 = arith.constant 0 : index
      %354 = vector.load %arg22[%c0_131, %c0_132] : memref<1x32xf32, #tpu.memory_space<vmem>>, vector<1x32xf32>
      %cst_133 = arith.constant dense<0.000000e+00> : vector<2xf32>
      %355 = vector.multi_reduction <add>, %352, %cst_133 [1] : vector<2x32xf32> to vector<2xf32>
      %356 = vector.shape_cast %355 : vector<2xf32> to vector<2x1xf32>
      %cst_134 = arith.constant 3.200000e+01 : f32
      %357 = vector.broadcast %cst_134 : f32 to vector<2x1xf32>
      %358 = arith.divf %356, %357 : vector<2x1xf32>
      %359 = vector.broadcast %358 : vector<2x1xf32> to vector<2x32xf32>
      %360 = arith.subf %352, %359 : vector<2x32xf32>
      %361 = arith.mulf %360, %360 : vector<2x32xf32>
      %cst_135 = arith.constant dense<0.000000e+00> : vector<2xf32>
      %362 = vector.multi_reduction <add>, %361, %cst_135 [1] : vector<2x32xf32> to vector<2xf32>
      %363 = vector.shape_cast %362 : vector<2xf32> to vector<2x1xf32>
      %cst_136 = arith.constant 3.200000e+01 : f32
      %364 = vector.broadcast %cst_136 : f32 to vector<2x1xf32>
      %365 = arith.divf %363, %364 : vector<2x1xf32>
      %366 = vector.broadcast %358 : vector<2x1xf32> to vector<2x32xf32>
      %367 = arith.subf %352, %366 : vector<2x32xf32>
      %cst_137 = arith.constant 9.99999974E-6 : f32
      %368 = vector.broadcast %cst_137 : f32 to vector<2x1xf32>
      %369 = arith.addf %365, %368 : vector<2x1xf32>
      %370 = math.rsqrt %369 : vector<2x1xf32>
      %371 = vector.broadcast %370 : vector<2x1xf32> to vector<2x32xf32>
      %372 = arith.mulf %367, %371 : vector<2x32xf32>
      %373 = vector.broadcast %353 : vector<1x32xf32> to vector<2x32xf32>
      %374 = arith.mulf %372, %373 : vector<2x32xf32>
      %375 = vector.broadcast %354 : vector<1x32xf32> to vector<2x32xf32>
      %376 = arith.addf %374, %375 : vector<2x32xf32>
      %377 = arith.truncf %376 : vector<2x32xf32> to vector<2x32xbf16>
      %c0_138 = arith.constant 0 : index
      %c0_139 = arith.constant 0 : index
      %378 = vector.load %arg23[%c0_138, %c0_139] : memref<32x16xbf16, #tpu.memory_space<vmem>>, vector<32x16xbf16>
      %cst_140 = arith.constant dense<0.000000e+00> : vector<2x16xf32>
      %379 = tpu.matmul %377, %378, %cst_140 {dimension_numbers = #tpu.dot_dimension_numbers<[1], [0], [0], [1], [0, 0, 1, 1], [], []>} : vector<2x32xbf16>, vector<32x16xbf16>, vector<2x16xf32> -> vector<2x16xf32>
      %c0_141 = arith.constant 0 : index
      %c0_142 = arith.constant 0 : index
      %380 = vector.load %arg24[%c0_141, %c0_142] : memref<1x16xf32, #tpu.memory_space<vmem>>, vector<1x16xf32>
      %381 = vector.broadcast %380 : vector<1x16xf32> to vector<2x16xf32>
      %382 = arith.addf %379, %381 : vector<2x16xf32>
      %cst_143 = arith.constant 5.000000e-01 : f32
      %383 = vector.broadcast %cst_143 : f32 to vector<2x16xf32>
      %384 = arith.mulf %383, %382 : vector<2x16xf32>
      %cst_144 = arith.constant 0.707106769 : f32
      %385 = vector.broadcast %cst_144 : f32 to vector<2x16xf32>
      %386 = arith.mulf %382, %385 : vector<2x16xf32>
      %cst_145 = arith.constant 0.000000e+00 : f32
      %387 = vector.broadcast %cst_145 : f32 to vector<2x16xf32>
      %388 = arith.cmpf oge, %386, %387 : vector<2x16xf32>
      %cst_146 = arith.constant 1.000000e+00 : f32
      %cst_147 = arith.constant -1.000000e+00 : f32
      %389 = vector.broadcast %cst_146 : f32 to vector<2x16xf32>
      %390 = vector.broadcast %cst_147 : f32 to vector<2x16xf32>
      %391 = arith.select %388, %389, %390 : vector<2x16xi1>, vector<2x16xf32>
      %392 = math.absf %386 : vector<2x16xf32>
      %cst_148 = arith.constant 0.327591091 : f32
      %393 = vector.broadcast %cst_148 : f32 to vector<2x16xf32>
      %394 = arith.mulf %393, %392 : vector<2x16xf32>
      %cst_149 = arith.constant 1.000000e+00 : f32
      %395 = vector.broadcast %cst_149 : f32 to vector<2x16xf32>
      %396 = arith.addf %395, %394 : vector<2x16xf32>
      %cst_150 = arith.constant 1.000000e+00 : f32
      %397 = vector.broadcast %cst_150 : f32 to vector<2x16xf32>
      %398 = arith.divf %397, %396 : vector<2x16xf32>
      %cst_151 = arith.constant 1.06140542 : f32
      %399 = vector.broadcast %cst_151 : f32 to vector<2x16xf32>
      %400 = arith.mulf %399, %398 : vector<2x16xf32>
      %cst_152 = arith.constant -1.45315206 : f32
      %401 = vector.broadcast %cst_152 : f32 to vector<2x16xf32>
      %402 = arith.addf %400, %401 : vector<2x16xf32>
      %403 = arith.mulf %402, %398 : vector<2x16xf32>
      %cst_153 = arith.constant 1.42141378 : f32
      %404 = vector.broadcast %cst_153 : f32 to vector<2x16xf32>
      %405 = arith.addf %403, %404 : vector<2x16xf32>
      %406 = arith.mulf %405, %398 : vector<2x16xf32>
      %cst_154 = arith.constant -0.284496725 : f32
      %407 = vector.broadcast %cst_154 : f32 to vector<2x16xf32>
      %408 = arith.addf %406, %407 : vector<2x16xf32>
      %409 = arith.mulf %408, %398 : vector<2x16xf32>
      %cst_155 = arith.constant 0.254829586 : f32
      %410 = vector.broadcast %cst_155 : f32 to vector<2x16xf32>
      %411 = arith.addf %409, %410 : vector<2x16xf32>
      %412 = arith.mulf %411, %398 : vector<2x16xf32>
      %cst_156 = arith.constant 0.000000e+00 : f32
      %413 = vector.broadcast %cst_156 : f32 to vector<2x16xf32>
      %414 = arith.subf %413, %392 : vector<2x16xf32>
      %415 = arith.mulf %414, %392 : vector<2x16xf32>
      %416 = math.exp %415 : vector<2x16xf32>
      %417 = arith.mulf %412, %416 : vector<2x16xf32>
      %cst_157 = arith.constant 1.000000e+00 : f32
      %418 = vector.broadcast %cst_157 : f32 to vector<2x16xf32>
      %419 = arith.subf %418, %417 : vector<2x16xf32>
      %420 = arith.mulf %391, %419 : vector<2x16xf32>
      %cst_158 = arith.constant 1.000000e+00 : f32
      %421 = vector.broadcast %cst_158 : f32 to vector<2x16xf32>
      %422 = arith.addf %421, %420 : vector<2x16xf32>
      %423 = arith.mulf %384, %422 : vector<2x16xf32>
      %424 = arith.truncf %423 : vector<2x16xf32> to vector<2x16xbf16>
      %c0_159 = arith.constant 0 : index
      %c0_160 = arith.constant 0 : index
      %425 = vector.load %arg25[%c0_159, %c0_160] : memref<16x8xbf16, #tpu.memory_space<vmem>>, vector<16x8xbf16>
      %cst_161 = arith.constant dense<0.000000e+00> : vector<2x8xf32>
      %426 = tpu.matmul %424, %425, %cst_161 {dimension_numbers = #tpu.dot_dimension_numbers<[1], [0], [0], [1], [0, 0, 1, 1], [], []>} : vector<2x16xbf16>, vector<16x8xbf16>, vector<2x8xf32> -> vector<2x8xf32>
      %c0_162 = arith.constant 0 : index
      %c0_163 = arith.constant 0 : index
      %427 = vector.load %arg26[%c0_162, %c0_163] : memref<1x8xf32, #tpu.memory_space<vmem>>, vector<1x8xf32>
      %428 = vector.broadcast %427 : vector<1x8xf32> to vector<2x8xf32>
      %429 = arith.addf %426, %428 : vector<2x8xf32>
      %cst_164 = arith.constant 5.000000e-01 : f32
      %430 = vector.broadcast %cst_164 : f32 to vector<2x8xf32>
      %431 = arith.mulf %430, %429 : vector<2x8xf32>
      %cst_165 = arith.constant 0.707106769 : f32
      %432 = vector.broadcast %cst_165 : f32 to vector<2x8xf32>
      %433 = arith.mulf %429, %432 : vector<2x8xf32>
      %cst_166 = arith.constant 0.000000e+00 : f32
      %434 = vector.broadcast %cst_166 : f32 to vector<2x8xf32>
      %435 = arith.cmpf oge, %433, %434 : vector<2x8xf32>
      %cst_167 = arith.constant 1.000000e+00 : f32
      %cst_168 = arith.constant -1.000000e+00 : f32
      %436 = vector.broadcast %cst_167 : f32 to vector<2x8xf32>
      %437 = vector.broadcast %cst_168 : f32 to vector<2x8xf32>
      %438 = arith.select %435, %436, %437 : vector<2x8xi1>, vector<2x8xf32>
      %439 = math.absf %433 : vector<2x8xf32>
      %cst_169 = arith.constant 0.327591091 : f32
      %440 = vector.broadcast %cst_169 : f32 to vector<2x8xf32>
      %441 = arith.mulf %440, %439 : vector<2x8xf32>
      %cst_170 = arith.constant 1.000000e+00 : f32
      %442 = vector.broadcast %cst_170 : f32 to vector<2x8xf32>
      %443 = arith.addf %442, %441 : vector<2x8xf32>
      %cst_171 = arith.constant 1.000000e+00 : f32
      %444 = vector.broadcast %cst_171 : f32 to vector<2x8xf32>
      %445 = arith.divf %444, %443 : vector<2x8xf32>
      %cst_172 = arith.constant 1.06140542 : f32
      %446 = vector.broadcast %cst_172 : f32 to vector<2x8xf32>
      %447 = arith.mulf %446, %445 : vector<2x8xf32>
      %cst_173 = arith.constant -1.45315206 : f32
      %448 = vector.broadcast %cst_173 : f32 to vector<2x8xf32>
      %449 = arith.addf %447, %448 : vector<2x8xf32>
      %450 = arith.mulf %449, %445 : vector<2x8xf32>
      %cst_174 = arith.constant 1.42141378 : f32
      %451 = vector.broadcast %cst_174 : f32 to vector<2x8xf32>
      %452 = arith.addf %450, %451 : vector<2x8xf32>
      %453 = arith.mulf %452, %445 : vector<2x8xf32>
      %cst_175 = arith.constant -0.284496725 : f32
      %454 = vector.broadcast %cst_175 : f32 to vector<2x8xf32>
      %455 = arith.addf %453, %454 : vector<2x8xf32>
      %456 = arith.mulf %455, %445 : vector<2x8xf32>
      %cst_176 = arith.constant 0.254829586 : f32
      %457 = vector.broadcast %cst_176 : f32 to vector<2x8xf32>
      %458 = arith.addf %456, %457 : vector<2x8xf32>
      %459 = arith.mulf %458, %445 : vector<2x8xf32>
      %cst_177 = arith.constant 0.000000e+00 : f32
      %460 = vector.broadcast %cst_177 : f32 to vector<2x8xf32>
      %461 = arith.subf %460, %439 : vector<2x8xf32>
      %462 = arith.mulf %461, %439 : vector<2x8xf32>
      %463 = math.exp %462 : vector<2x8xf32>
      %464 = arith.mulf %459, %463 : vector<2x8xf32>
      %cst_178 = arith.constant 1.000000e+00 : f32
      %465 = vector.broadcast %cst_178 : f32 to vector<2x8xf32>
      %466 = arith.subf %465, %464 : vector<2x8xf32>
      %467 = arith.mulf %438, %466 : vector<2x8xf32>
      %cst_179 = arith.constant 1.000000e+00 : f32
      %468 = vector.broadcast %cst_179 : f32 to vector<2x8xf32>
      %469 = arith.addf %468, %467 : vector<2x8xf32>
      %470 = arith.mulf %431, %469 : vector<2x8xf32>
      %471 = arith.truncf %470 : vector<2x8xf32> to vector<2x8xbf16>
      %c0_180 = arith.constant 0 : index
      %c0_181 = arith.constant 0 : index
      %472 = vector.load %arg27[%c0_180, %c0_181] : memref<8x2xbf16, #tpu.memory_space<vmem>>, vector<8x2xbf16>
      %cst_182 = arith.constant dense<0.000000e+00> : vector<2x2xf32>
      %473 = tpu.matmul %471, %472, %cst_182 {dimension_numbers = #tpu.dot_dimension_numbers<[1], [0], [0], [1], [0, 0, 1, 1], [], []>} : vector<2x8xbf16>, vector<8x2xbf16>, vector<2x2xf32> -> vector<2x2xf32>
      %c0_183 = arith.constant 0 : index
      %c0_184 = arith.constant 0 : index
      %474 = vector.load %arg28[%c0_183, %c0_184] : memref<1x2xf32, #tpu.memory_space<vmem>>, vector<1x2xf32>
      %475 = vector.broadcast %474 : vector<1x2xf32> to vector<2x2xf32>
      %476 = arith.addf %473, %475 : vector<2x2xf32>
      %477 = vector.shape_cast %476 : vector<2x2xf32> to vector<2x1x2xf32>
      %c0_185 = arith.constant 0 : index
      %c0_186 = arith.constant 0 : index
      %c0_187 = arith.constant 0 : index
      %478 = vector.load %arg29[%c0_185, %c0_186, %c0_187] : memref<2x1x2xf32, #tpu.memory_space<vmem>>, vector<2x1x2xf32>
      tpu.vector_store %arg29[%c0_185, %c0_186, %c0_187], %477 {strides = array<i32>} : memref<2x1x2xf32, #tpu.memory_space<vmem>>, vector<2x1x2xf32>,
    } else {
    }
    return
  }
  func.func @transform_0(%arg0: i32, %arg1: i32) -> (i32, i32, i32) {
    %c0_i32 = arith.constant 0 : i32
    %c0_i32_0 = arith.constant 0 : i32
    %c0_i32_1 = arith.constant 0 : i32
    return %arg0, %c0_i32, %c0_i32_0 : i32, i32, i32
  }
  func.func @transform_1(%arg0: i32, %arg1: i32) -> (i32, i32, i32) {
    %c0_i32 = arith.constant 0 : i32
    %c0_i32_0 = arith.constant 0 : i32
    %c0_i32_1 = arith.constant 0 : i32
    return %arg1, %c0_i32, %c0_i32_0 : i32, i32, i32
  }
  func.func @transform_2(%arg0: i32, %arg1: i32) -> (i32, i32, i32) {
    %c0_i32 = arith.constant 0 : i32
    %c0_i32_0 = arith.constant 0 : i32
    %c0_i32_1 = arith.constant 0 : i32
    return %arg1, %c0_i32, %c0_i32_0 : i32, i32, i32
  }
  func.func @transform_3(%arg0: i32, %arg1: i32) -> (i32, i32, i32) {
    %c0_i32 = arith.constant 0 : i32
    %c0_i32_0 = arith.constant 0 : i32
    %c0_i32_1 = arith.constant 0 : i32
    return %arg1, %c0_i32, %c0_i32_0 : i32, i32, i32
  }
  func.func @transform_4(%arg0: i32, %arg1: i32) -> (i32, i32, i32) {
    %c0_i32 = arith.constant 0 : i32
    %c0_i32_0 = arith.constant 0 : i32
    %c0_i32_1 = arith.constant 0 : i32
    return %arg1, %c0_i32, %c0_i32_0 : i32, i32, i32
  }
  func.func @transform_5(%arg0: i32, %arg1: i32) -> (i32, i32, i32) {
    %c0_i32 = arith.constant 0 : i32
    %c0_i32_0 = arith.constant 0 : i32
    %c0_i32_1 = arith.constant 0 : i32
    return %arg1, %c0_i32, %c0_i32_0 : i32, i32, i32
  }
  func.func @transform_6(%arg0: i32, %arg1: i32) -> (i32, i32, i32) {
    %c0_i32 = arith.constant 0 : i32
    %c0_i32_0 = arith.constant 0 : i32
    %c0_i32_1 = arith.constant 0 : i32
    return %arg1, %c0_i32, %c0_i32_0 : i32, i32, i32
  }
  func.func @transform_7(%arg0: i32, %arg1: i32) -> (i32, i32, i32) {
    %c0_i32 = arith.constant 0 : i32
    %c0_i32_0 = arith.constant 0 : i32
    %c0_i32_1 = arith.constant 0 : i32
    return %arg1, %c0_i32, %c0_i32_0 : i32, i32, i32
  }
  func.func @transform_8(%arg0: i32, %arg1: i32) -> (i32, i32, i32) {
    %c0_i32 = arith.constant 0 : i32
    %c0_i32_0 = arith.constant 0 : i32
    %c0_i32_1 = arith.constant 0 : i32
    return %arg1, %c0_i32, %c0_i32_0 : i32, i32, i32
  }
  func.func @transform_9(%arg0: i32, %arg1: i32) -> (i32, i32, i32) {
    %c0_i32 = arith.constant 0 : i32
    %c0_i32_0 = arith.constant 0 : i32
    %c0_i32_1 = arith.constant 0 : i32
    return %arg1, %c0_i32, %c0_i32_0 : i32, i32, i32
  }
  func.func @transform_10(%arg0: i32, %arg1: i32) -> (i32, i32, i32) {
    %c0_i32 = arith.constant 0 : i32
    %c0_i32_0 = arith.constant 0 : i32
    %c0_i32_1 = arith.constant 0 : i32
    return %arg1, %c0_i32, %c0_i32_0 : i32, i32, i32
  }
  func.func @transform_11(%arg0: i32, %arg1: i32) -> (i32, i32, i32) {
    %c0_i32 = arith.constant 0 : i32
    %c0_i32_0 = arith.constant 0 : i32
    %c0_i32_1 = arith.constant 0 : i32
    return %arg1, %c0_i32, %c0_i32_0 : i32, i32, i32
  }
  func.func @transform_12(%arg0: i32, %arg1: i32) -> (i32, i32, i32) {
    %c0_i32 = arith.constant 0 : i32
    %c0_i32_0 = arith.constant 0 : i32
    %c0_i32_1 = arith.constant 0 : i32
    return %arg1, %c0_i32, %c0_i32_0 : i32, i32, i32
  }
  func.func @transform_13(%arg0: i32, %arg1: i32) -> (i32, i32) {
    %c0_i32 = arith.constant 0 : i32
    %c0_i32_0 = arith.constant 0 : i32
    %c0_i32_1 = arith.constant 0 : i32
    return %c0_i32, %c0_i32_0 : i32, i32
  }
  func.func @transform_14(%arg0: i32, %arg1: i32) -> (i32, i32) {
    %c0_i32 = arith.constant 0 : i32
    %c0_i32_0 = arith.constant 0 : i32
    %c0_i32_1 = arith.constant 0 : i32
    return %c0_i32, %c0_i32_0 : i32, i32
  }
  func.func @transform_15(%arg0: i32, %arg1: i32) -> (i32, i32) {
    %c0_i32 = arith.constant 0 : i32
    %c0_i32_0 = arith.constant 0 : i32
    %c0_i32_1 = arith.constant 0 : i32
    return %c0_i32, %c0_i32_0 : i32, i32
  }
  func.func @transform_16(%arg0: i32, %arg1: i32) -> (i32, i32) {
    %c0_i32 = arith.constant 0 : i32
    %c0_i32_0 = arith.constant 0 : i32
    %c0_i32_1 = arith.constant 0 : i32
    return %c0_i32, %c0_i32_0 : i32, i32
  }
  func.func @transform_17(%arg0: i32, %arg1: i32) -> (i32, i32) {
    %c0_i32 = arith.constant 0 : i32
    %c0_i32_0 = arith.constant 0 : i32
    %c0_i32_1 = arith.constant 0 : i32
    return %c0_i32, %c0_i32_0 : i32, i32
  }
  func.func @transform_18(%arg0: i32, %arg1: i32) -> (i32, i32) {
    %c0_i32 = arith.constant 0 : i32
    %c0_i32_0 = arith.constant 0 : i32
    %c0_i32_1 = arith.constant 0 : i32
    return %c0_i32, %c0_i32_0 : i32, i32
  }
  func.func @transform_19(%arg0: i32, %arg1: i32) -> (i32, i32) {
    %c0_i32 = arith.constant 0 : i32
    %c0_i32_0 = arith.constant 0 : i32
    %c0_i32_1 = arith.constant 0 : i32
    return %c0_i32, %c0_i32_0 : i32, i32
  }
  func.func @transform_20(%arg0: i32, %arg1: i32) -> (i32, i32) {
    %c0_i32 = arith.constant 0 : i32
    %c0_i32_0 = arith.constant 0 : i32
    %c0_i32_1 = arith.constant 0 : i32
    return %c0_i32, %c0_i32_0 : i32, i32
  }
  func.func @transform_21(%arg0: i32, %arg1: i32) -> (i32, i32) {
    %c0_i32 = arith.constant 0 : i32
    %c0_i32_0 = arith.constant 0 : i32
    %c0_i32_1 = arith.constant 0 : i32
    return %c0_i32, %c0_i32_0 : i32, i32
  }
  func.func @transform_22(%arg0: i32, %arg1: i32) -> (i32, i32) {
    %c0_i32 = arith.constant 0 : i32
    %c0_i32_0 = arith.constant 0 : i32
    %c0_i32_1 = arith.constant 0 : i32
    return %c0_i32, %c0_i32_0 : i32, i32
  }
  func.func @transform_23(%arg0: i32, %arg1: i32) -> (i32, i32) {
    %c0_i32 = arith.constant 0 : i32
    %c0_i32_0 = arith.constant 0 : i32
    %c0_i32_1 = arith.constant 0 : i32
    return %c0_i32, %c0_i32_0 : i32, i32
  }
  func.func @transform_24(%arg0: i32, %arg1: i32) -> (i32, i32) {
    %c0_i32 = arith.constant 0 : i32
    %c0_i32_0 = arith.constant 0 : i32
    %c0_i32_1 = arith.constant 0 : i32
    return %c0_i32, %c0_i32_0 : i32, i32
  }
  func.func @transform_25(%arg0: i32, %arg1: i32) -> (i32, i32) {
    %c0_i32 = arith.constant 0 : i32
    %c0_i32_0 = arith.constant 0 : i32
    %c0_i32_1 = arith.constant 0 : i32
    return %c0_i32, %c0_i32_0 : i32, i32
  }
  func.func @transform_26(%arg0: i32, %arg1: i32) -> (i32, i32) {
    %c0_i32 = arith.constant 0 : i32
    %c0_i32_0 = arith.constant 0 : i32
    %c0_i32_1 = arith.constant 0 : i32
    return %c0_i32, %c0_i32_0 : i32, i32
  }
  func.func @transform_27(%arg0: i32, %arg1: i32) -> (i32, i32, i32) {
    %c0_i32 = arith.constant 0 : i32
    %c0_i32_0 = arith.constant 0 : i32
    %c0_i32_1 = arith.constant 0 : i32
    return %arg0, %c0_i32, %c0_i32_0 : i32, i32, i32
  }
}

</mosaic_0001>

<bundles_post_ra>
// kernel: forward.2
= control target key start
LH: loop header
LB: loop body
LE: loop exit
PB: predicated region body
PF: predicated region fallthrough
CT: control target
= control target key end

     0   :  { %v1695_v0 = vmov 0.0   ;;  %vm1696_vm0 = vmmov 0   ;;  %vm37_vm1 = vcmask 1041409   ;;  %vm64_vm2 = vcmask 523264   ;;  %s2322_s1 = inlined_call_operand.vmem [shape: bf16[8,64,32], index: 1, kind: input, shape index: {}]   ;;  %s2323_s0 = inlined_call_operand.vmem [shape: f32[2,8,64], index: 0, kind: input, shape index: {}]   ;;  %s2324_s2 = inlined_call_operand.vmem [shape: f32[8,4,32], index: 2, kind: input, shape index: {}]   ;;  %s2325_s3 = inlined_call_operand.vmem [shape: f32[2,8,32], index: 3, kind: output, shape index: {}]  }
   0x1   :  { %1515 = vmatprep.subr.bf16.mxu0 %v1695_v0  ;;  %1527 = vmatprep.subr.bf16.mxu1 %v1695_v0  ;;  %v1615_v1 = vld [vmem:[%s2322_s1] sm:$0xff]   ;;  %v1617_v3 = vld [vmem:[%s2322_s1 + $0x8] sm:$0xff]   ;;  %v1619_v5 = vld [vmem:[%s2322_s1 + $0x10] sm:$0xff]   ;;  %vm108_vm3 = vcmask 254976   ;;  %vm190_vm6 = vcmask 253952  }
   0x2   :  { %v1616_v2 = vld [vmem:[%s2322_s1 + $0x20] sm:$0xff]   ;;  %1523 = vmatprep.mubr.msk.bf16.mxu0 %vm1696_vm0, %v1695_v0  ;;  %1535 = vmatprep.mubr.msk.bf16.mxu1 %vm1696_vm0, %v1695_v0  ;;  %v1618_v4 = vld [vmem:[%s2322_s1 + $0x28] sm:$0xff]   ;;  %v1620_v6 = vld [vmem:[%s2322_s1 + $0x30] sm:$0xff]  }
   0x3   :  { %1516 = vmatpush3.bf16.msra.mxu0 %v1615_v1  ;;  %1528 = vmatpush3.bf16.msra.mxu1 %v1616_v2  ;;  %v15_v7 = vld [vmem:[%s2323_s0] sm:$0xff]  ;;  %v16_v8 = vld [vmem:[%s2323_s0 + $0x8] sm:$0xff]  ;;  %v1621_v11 = vld [vmem:[%s2322_s1 + $0x18] sm:$0xff]  }
   0x4   :  { %1517 = vmatprep.subr.bf16.mxu0 %v1695_v0  ;;  %1529 = vmatprep.subr.bf16.mxu1 %v1695_v0  ;;  %v17_v9 = vpack.c.bf16 %v15_v7, %v15_v7  ;;  %v18_v10 = vpack.c.bf16 %v16_v8, %v16_v8  ;;  %v1622_v12 = vld [vmem:[%s2322_s1 + $0x38] sm:$0xff]   ;;  %v1623_v17 = vld [vmem:[%s2322_s1 + $0x40] sm:$0xff]   ;;  %v1625_v23 = vld [vmem:[%s2322_s1 + $0x48] sm:$0xff]  }
   0x5   :  { %v1624_v20 = vld [vmem:[%s2322_s1 + $0x60] sm:$0xff]   ;;  %v1626_v24 = vld [vmem:[%s2322_s1 + $0x68] sm:$0xff]   ;;  %v1627_v25 = vld [vmem:[%s2322_s1 + $0x50] sm:$0xff]  }
   0x6   :  { %v1760_v13 = vunpack.c.l.b16 %v17_v9  ;;  %v1762_v14 = vunpack.c.l.b16 %v18_v10  ;;  %v1628_v26 = vld [vmem:[%s2322_s1 + $0x70] sm:$0xff]   ;;  %v1629_v31 = vld [vmem:[%s2322_s1 + $0x58] sm:$0xff]   ;;  %v1631_v37 = vld [vmem:[%s2322_s1 + $0x80] sm:$0xff]  }
   0x7   :  { %1518 = vmatpush3.bf16.msra.mxu0 %v1617_v3  ;;  %1530 = vmatpush3.bf16.msra.mxu1 %v1618_v4  ;;  %v1630_v32 = vld [vmem:[%s2322_s1 + $0x78] sm:$0xff]   ;;  %v1632_v38 = vld [vmem:[%s2322_s1 + $0xa0] sm:$0xff]   ;;  %v1633_v39 = vld [vmem:[%s2322_s1 + $0x88] sm:$0xff]  }
   0x8   :  { %1519 = vmatprep.subr.bf16.mxu0 %v1695_v0  ;;  %1531 = vmatprep.subr.bf16.mxu1 %v1695_v0  ;;  %v36_v15 = vrot.slane %v1762_v14, 7  ;;  %v208_v16 = vrot.slane %v1760_v13, 1  ;;  %v375_v27 = vrot.slane %v1760_v13, 2  ;;  %v376_v28 = vrot.slane %v1762_v14, 1  ;;  %v1634_v40 = vld [vmem:[%s2322_s1 + $0xa8] sm:$0xff]   ;;  %v1635_v41 = vld [vmem:[%s2322_s1 + $0x90] sm:$0xff]  }
   0x9   :  { %v543_v29 = vrot.slane %v1760_v13, 3  ;;  %v544_v30 = vrot.slane %v1762_v14, 2  ;;  %v1636_v42 = vld [vmem:[%s2322_s1 + $0xb0] sm:$0xff]   ;;  %v711_v43 = vrot.slane %v1760_v13, 4  ;;  %v712_v44 = vrot.slane %v1762_v14, 3  ;;  %v1637_v47 = vld [vmem:[%s2322_s1 + $0x98] sm:$0xff]  }
   0xa   :  { %v38_v18 = vsel %vm37_vm1, %v36_v15, %v1760_v13  ;;  %v209_v19 = vsel %vm37_vm1, %v1762_v14, %v208_v16  ;;  %v377_v33 = vsel %vm37_vm1, %v376_v28, %v375_v27  ;;  %v879_v45 = vrot.slane %v1760_v13, 5  ;;  %v1638_v48 = vld [vmem:[%s2322_s1 + $0xb8] sm:$0xff]   ;;  %v1639_v53 = vld [vmem:[%s2322_s1 + $0xc0] sm:$0xff]   ;;  %v1641_v55 = vld [vmem:[%s2322_s1 + $0xc8] sm:$0xff]  }
   0xb   :  { %1520 = vmatpush3.bf16.msra.mxu0 %v1619_v5  ;;  %1532 = vmatpush3.bf16.msra.mxu1 %v1620_v6  ;;  %v39_v21 = vpack.c.b16 %v38_v18, %v38_v18  ;;  %v210_v22 = vpack.c.b16 %v209_v19, %v209_v19  ;;  %v545_v34 = vsel %vm37_vm1, %v544_v30, %v543_v29  ;;  %v880_v46 = vrot.slane %v1762_v14, 4  ;;  %v1640_v54 = vld [vmem:[%s2322_s1 + $0xe0] sm:$0xff]   ;;  %v1642_v56 = vld [vmem:[%s2322_s1 + $0xe8] sm:$0xff]   ;;  %v1643_v57 = vld [vmem:[%s2322_s1 + $0xd0] sm:$0xff]  }
   0xc   :  { %1521 = vmatprep.subr.bf16.mxu0 %v1695_v0  ;;  %1533 = vmatprep.subr.bf16.mxu1 %v1695_v0  ;;  %v378_v35 = vpack.c.b16 %v377_v33, %v377_v33  ;;  %v546_v36 = vpack.c.b16 %v545_v34, %v545_v34  ;;  %v713_v49 = vsel %vm37_vm1, %v712_v44, %v711_v43  ;;  %v1644_v58 = vld [vmem:[%s2322_s1 + $0xf0] sm:$0xff]   ;;  %v1047_v59 = vrot.slane %v1760_v13, 6  ;;  %v1645_v63 = vld [vmem:[%s2322_s1 + $0xd8] sm:$0xff]   ;;  %v1913_v9 = vld [vmem:[%s2324_s2] sm:$0xf] }
   0xd   :  { %v881_v50 = vsel %vm37_vm1, %v880_v46, %v879_v45  ;;  %v714_v51 = vpack.c.b16 %v713_v49, %v713_v49  ;;  %v1048_v60 = vrot.slane %v1762_v14, 5  ;;  %v1215_v61 = vrot.slane %v1760_v13, 7  ;;  %v1646_v1 = vld [vmem:[%s2322_s1 + $0xf8] sm:$0xff]  }
   0xe   :  { %v882_v52 = vpack.c.b16 %v881_v50, %v881_v50  ;;  %v1216_v62 = vrot.slane %v1762_v14, 6  ;;  %v28_v6 = vlaneseq }
   0xf   :  { %1522 = vmatpush3.bf16.msra.mxu0 %v1621_v11  ;;  %1534 = vmatpush3.bf16.msra.mxu1 %v1622_v12  ;;  %v1049_v2 = vsel %vm37_vm1, %v1048_v60, %v1047_v59 }
  0x10   :  { %1539 = vmatprep.subr.bf16.mxu0 %v1695_v0  ;;  %1551 = vmatprep.subr.bf16.mxu1 %v1695_v0  ;;  %v1217_v3 = vsel %vm37_vm1, %v1216_v62, %v1215_v61  ;;  %v1050_v4 = vpack.c.b16 %v1049_v2, %v1049_v2  ;;  %v1905_v7 = vshrl.u32 %v28_v6, 7 }
  0x11   :  { %v1218_v5 = vpack.c.b16 %v1217_v3, %v1217_v3 }
  0x12   :  { %1524 = vmatmul.mubr.msk.bf16.vlgmr.msra.gmra.mrb[0].mxu0 %vm64_vm2, %v39_v21  ;;  %1536 = vmatmul.mubr.msk.bf16.vlgmr.msra.gmra.mrb[0].mxu1 %vm64_vm2, %v210_v22  ;;  %v1908_v8 = vsub.s32 0, %v1905_v7 }
  0x13   :  { %1540 = vmatpush3.bf16.msra.mxu0 %v1623_v17  ;;  %1552 = vmatpush3.bf16.msra.mxu1 %v1624_v20 }
  0x14   :  { %1541 = vmatprep.subr.bf16.mxu0 %v1695_v0  ;;  %1553 = vmatprep.subr.bf16.mxu1 %v1695_v0  ;;  %v31_v10 = vrot.slane %v1913_v9, %v1908_v8 }
  0x15   :  { %1547 = vmatprep.mubr.msk.bf16.mxu0 %vm1696_vm0, %v1695_v0  ;;  %1559 = vmatprep.mubr.msk.bf16.mxu1 %vm1696_vm0, %v1695_v0 }
  0x17   :  { %1542 = vmatpush3.bf16.msra.mxu0 %v1625_v23  ;;  %1554 = vmatpush3.bf16.msra.mxu1 %v1626_v24  ;;  %v1935_v24 = vld [vmem:[%s2324_s2 + $0x8] sm:$0xf] }
  0x18   :  { %1543 = vmatprep.subr.bf16.mxu0 %v1695_v0  ;;  %1555 = vmatprep.subr.bf16.mxu1 %v1695_v0 }
  0x1b   :  { %1544 = vmatpush3.bf16.msra.mxu0 %v1627_v25  ;;  %1556 = vmatpush3.bf16.msra.mxu1 %v1628_v26  ;;  %v1940_v25 = vld [vmem:[%s2324_s2 + $0xc] sm:$0xf]  ;;  %v374_v26 = vrot.slane %v1935_v24, %v1908_v8 }
  0x1c   :  { %1545 = vmatprep.subr.bf16.mxu0 %v1695_v0  ;;  %1557 = vmatprep.subr.bf16.mxu1 %v1695_v0  ;;  %v542_v27 = vrot.slane %v1940_v25, %v1908_v8 }
  0x1f   :  { %1546 = vmatpush3.bf16.msra.mxu0 %v1629_v31  ;;  %1558 = vmatpush3.bf16.msra.mxu1 %v1630_v32 }
  0x20   :  { %1563 = vmatprep.subr.bf16.mxu0 %v1695_v0  ;;  %1575 = vmatprep.subr.bf16.mxu1 %v1695_v0 }
  0x22   :  { %1548 = vmatmul.mubr.msk.bf16.vlgmr.msra.gmra.mrb[4].mxu0 %vm64_vm2, %v378_v35  ;;  %1560 = vmatmul.mubr.msk.bf16.vlgmr.msra.gmra.mrb[4].mxu1 %vm64_vm2, %v546_v36 }
  0x23   :  { %1564 = vmatpush3.bf16.msra.mxu0 %v1631_v37  ;;  %1576 = vmatpush3.bf16.msra.mxu1 %v1632_v38 }
  0x24   :  { %1565 = vmatprep.subr.bf16.mxu0 %v1695_v0  ;;  %1577 = vmatprep.subr.bf16.mxu1 %v1695_v0 }
  0x25   :  { %1571 = vmatprep.mubr.msk.bf16.mxu0 %vm1696_vm0, %v1695_v0  ;;  %1583 = vmatprep.mubr.msk.bf16.mxu1 %vm1696_vm0, %v1695_v0 }
  0x27   :  { %1566 = vmatpush3.bf16.msra.mxu0 %v1633_v39  ;;  %1578 = vmatpush3.bf16.msra.mxu1 %v1634_v40  ;;  %v1951_v40 = vld [vmem:[%s2324_s2 + $0x10] sm:$0xf] }
  0x28   :  { %1567 = vmatprep.subr.bf16.mxu0 %v1695_v0  ;;  %1579 = vmatprep.subr.bf16.mxu1 %v1695_v0 }
  0x2b   :  { %1568 = vmatpush3.bf16.msra.mxu0 %v1635_v41  ;;  %1580 = vmatpush3.bf16.msra.mxu1 %v1636_v42  ;;  %v1956_v41 = vld [vmem:[%s2324_s2 + $0x14] sm:$0xf]  ;;  %v710_v42 = vrot.slane %v1951_v40, %v1908_v8 }
  0x2c   :  { %1569 = vmatprep.subr.bf16.mxu0 %v1695_v0  ;;  %1581 = vmatprep.subr.bf16.mxu1 %v1695_v0  ;;  %v878_v43 = vrot.slane %v1956_v41, %v1908_v8 }
  0x2f   :  { %1570 = vmatpush3.bf16.msra.mxu0 %v1637_v47  ;;  %1582 = vmatpush3.bf16.msra.mxu1 %v1638_v48 }
  0x30   :  { %1587 = vmatprep.subr.bf16.mxu0 %v1695_v0  ;;  %1599 = vmatprep.subr.bf16.mxu1 %v1695_v0 }
  0x32   :  { %1572 = vmatmul.mubr.msk.bf16.vlgmr.msra.gmra.mrb[8].mxu0 %vm64_vm2, %v714_v51  ;;  %1584 = vmatmul.mubr.msk.bf16.vlgmr.msra.gmra.mrb[8].mxu1 %vm64_vm2, %v882_v52 }
  0x33   :  { %1588 = vmatpush3.bf16.msra.mxu0 %v1639_v53  ;;  %1600 = vmatpush3.bf16.msra.mxu1 %v1640_v54 }
  0x34   :  { %1589 = vmatprep.subr.bf16.mxu0 %v1695_v0  ;;  %1601 = vmatprep.subr.bf16.mxu1 %v1695_v0 }
  0x35   :  { %1595 = vmatprep.mubr.msk.bf16.mxu0 %vm1696_vm0, %v1695_v0  ;;  %1607 = vmatprep.mubr.msk.bf16.mxu1 %vm1696_vm0, %v1695_v0 }
  0x37   :  { %1590 = vmatpush3.bf16.msra.mxu0 %v1641_v55  ;;  %1602 = vmatpush3.bf16.msra.mxu1 %v1642_v56  ;;  %v1967_v56 = vld [vmem:[%s2324_s2 + $0x18] sm:$0xf] }
  0x38   :  { %1591 = vmatprep.subr.bf16.mxu0 %v1695_v0  ;;  %1603 = vmatprep.subr.bf16.mxu1 %v1695_v0 }
  0x3b   :  { %1592 = vmatpush3.bf16.msra.mxu0 %v1643_v57  ;;  %1604 = vmatpush3.bf16.msra.mxu1 %v1644_v58  ;;  %v1972_v57 = vld [vmem:[%s2324_s2 + $0x1c] sm:$0xf]  ;;  %v1046_v58 = vrot.slane %v1967_v56, %v1908_v8 }
  0x3c   :  { %1593 = vmatprep.subr.bf16.mxu0 %v1695_v0  ;;  %1605 = vmatprep.subr.bf16.mxu1 %v1695_v0  ;;  %v1918_v0 = vld [vmem:[%s2324_s2 + $0x4] sm:$0xf]  ;;  %v1214_v59 = vrot.slane %v1972_v57, %v1908_v8 }
  0x3d   :  { %v207_v11 = vrot.slane %v1918_v0, %v1908_v8 }
  0x3f   :  { %1594 = vmatpush3.bf16.msra.mxu0 %v1645_v63  ;;  %1606 = vmatpush3.bf16.msra.mxu1 %v1646_v1 }
  0x42   :  { %1596 = vmatmul.mubr.msk.bf16.vlgmr.msra.gmra.mrb[12].mxu0 %vm64_vm2, %v1050_v4  ;;  %1608 = vmatmul.mubr.msk.bf16.vlgmr.msra.gmra.mrb[12].mxu1 %vm64_vm2, %v1218_v5 }
  0xe5   :  { %v102_v12 = vpop.f32.mrb[0].mxu0  ;;  %v272_v13 = vpop.f32.mrb[0].mxu1 }
  0xe6   :  { %v1924_v14 = vadd.f32 %v102_v12, %v31_v10  ;;  %v1525_v15 = vpop.f32.mrb[1].mxu0  ;;  %v1537_v16 = vpop.f32.mrb[1].mxu1  ;;  %v1926_v19 = vadd.f32 %v272_v13, %v207_v11 }
  0xe7   :  { %v105_v17 = vpop.f32.mrb[2].mxu0  ;;  %v275_v18 = vpop.f32.mrb[2].mxu1 }
  0xe8   :  { %v1526_v20 = vpop.f32.mrb[3].mxu0  ;;  %v1538_v21 = vpop.f32.mrb[3].mxu1  ;;  %v109_v22 = vsel %vm108_vm3, %v1924_v14, 0.0  ;;  %v278_v23 = vsel %vm108_vm3, %v1926_v19, 0.0 }
  0xe9   :  { %110 = vadd.xlane.f32.xlu0 %v109_v22 }
  0xed   :  { %279 = vadd.xlane.f32.xlu0 %v278_v23 }
  0xf5   :  { %v440_v28 = vpop.f32.mrb[4].mxu0  ;;  %v608_v29 = vpop.f32.mrb[4].mxu1 }
  0xf6   :  { %v441_v30 = vadd.f32 %v440_v28, %v374_v26  ;;  %v1549_v31 = vpop.f32.mrb[5].mxu0  ;;  %v1561_v32 = vpop.f32.mrb[5].mxu1  ;;  %v609_v35 = vadd.f32 %v608_v29, %v542_v27 }
  0xf7   :  { %v443_v33 = vpop.f32.mrb[6].mxu0  ;;  %v611_v34 = vpop.f32.mrb[6].mxu1 }
  0xf8   :  { %v1550_v36 = vpop.f32.mrb[7].mxu0  ;;  %v1562_v37 = vpop.f32.mrb[7].mxu1  ;;  %v446_v38 = vsel %vm108_vm3, %v441_v30, 0.0  ;;  %v614_v39 = vsel %vm108_vm3, %v609_v35, 0.0 }
  0xf9   :  { %447 = vadd.xlane.f32.xlu1 %v446_v38 }
  0xfd   :  { %615 = vadd.xlane.f32.xlu1 %v614_v39 }
 0x105   :  { %v776_v44 = vpop.f32.mrb[8].mxu0  ;;  %v944_v45 = vpop.f32.mrb[8].mxu1 }
 0x106   :  { %v777_v46 = vadd.f32 %v776_v44, %v710_v42  ;;  %v945_v47 = vadd.f32 %v944_v45, %v878_v43  ;;  %v1573_v48 = vpop.f32.mrb[9].mxu0  ;;  %v1585_v49 = vpop.f32.mrb[9].mxu1 }
 0x107   :  { %v779_v50 = vpop.f32.mrb[10].mxu0  ;;  %v947_v51 = vpop.f32.mrb[10].mxu1 }
 0x108   :  { %v1574_v52 = vpop.f32.mrb[11].mxu0  ;;  %v1586_v53 = vpop.f32.mrb[11].mxu1  ;;  %v950_v54 = vsel %vm108_vm3, %v945_v47, 0.0  ;;  %v782_v55 = vsel %vm108_vm3, %v777_v46, 0.0 }
 0x109   :  { %951 = vadd.xlane.f32.xlu1 %v950_v54  ;;  %783 = vadd.xlane.f32.xlu0 %v782_v55 }
 0x115   :  { %v1112_v60 = vpop.f32.mrb[12].mxu0  ;;  %v1280_v61 = vpop.f32.mrb[12].mxu1 }
 0x116   :  { %v1113_v62 = vadd.f32 %v1112_v60, %v1046_v58  ;;  %v1281_v63 = vadd.f32 %v1280_v61, %v1214_v59  ;;  %v1597_v1 = vpop.f32.mrb[13].mxu0  ;;  %v1609_v2 = vpop.f32.mrb[13].mxu1 }
 0x117   :  { %v1115_v3 = vpop.f32.mrb[14].mxu0  ;;  %v1283_v4 = vpop.f32.mrb[14].mxu1  ;;  %v2022_v1 = vsub.s32 2, %v1905_v7 }
 0x118   :  { %v1598_v5 = vpop.f32.mrb[15].mxu0  ;;  %v1610_v6 = vpop.f32.mrb[15].mxu1  ;;  %v1286_v10 = vsel %vm108_vm3, %v1281_v63, 0.0  ;;  %v1118_v11 = vsel %vm108_vm3, %v1113_v62, 0.0 }
 0x119   :  { %1287 = vadd.xlane.f32.xlu1 %v1286_v10  ;;  %1119 = vadd.xlane.f32.xlu0 %v1118_v11  ;;  %v131_v4 = vrot.slane %v1913_v9, %v2022_v1 }
 0x176   :  { %v111_v12 = vpop.xlane.xlu0 %110 }
 0x177   :  { %v113_v13 = vmul.f32 0.03125, %v111_v12 }
 0x179   :  { %v114_v8 = vsub.f32 %v1924_v14, %v113_v13 }
 0x17a   :  { %v280_v15 = vpop.xlane.xlu0 %279 }
 0x17b   :  { %v281_v16 = vmul.f32 0.03125, %v280_v15  ;;  %v115_v17 = vmul.f32 %v114_v8, %v114_v8 }
 0x17d   :  { %v1982_v18 = vsub.f32 %v1926_v19, %v281_v16  ;;  %v116_v20 = vsel %vm108_vm3, %v115_v17, 0.0  ;;  %v299_v16 = vrot.slane %v1918_v0, %v2022_v1 }
 0x17e   :  { %117 = vadd.xlane.f32.xlu0 %v116_v20 }
 0x17f   :  { %v283_v21 = vmul.f32 %v1982_v18, %v1982_v18 }
 0x181   :  { %v284_v22 = vsel %vm108_vm3, %v283_v21, 0.0 }
 0x182   :  { %285 = vadd.xlane.f32.xlu1 %v284_v22 }
 0x186   :  { %v448_v23 = vpop.xlane.xlu1 %447 }
 0x187   :  { %v449_v26 = vmul.f32 0.03125, %v448_v23 }
 0x189   :  { %v1988_v27 = vsub.f32 %v441_v30, %v449_v26 }
 0x18a   :  { %v616_v14 = vpop.xlane.xlu1 %615 }
 0x18b   :  { %v617_v28 = vmul.f32 0.03125, %v616_v14  ;;  %v451_v29 = vmul.f32 %v1988_v27, %v1988_v27 }
 0x18d   :  { %v1992_v19 = vsub.f32 %v609_v35, %v617_v28  ;;  %v452_v31 = vsel %vm108_vm3, %v451_v29, 0.0 }
 0x18e   :  { %453 = vadd.xlane.f32.xlu0 %v452_v31 }
 0x18f   :  { %v619_v32 = vmul.f32 %v1992_v19, %v1992_v19 }
 0x191   :  { %v620_v33 = vsel %vm108_vm3, %v619_v32, 0.0 }
 0x192   :  { %621 = vadd.xlane.f32.xlu1 %v620_v33 }
 0x196   :  { %v952_v34 = vpop.xlane.xlu1 %951  ;;  %v784_v36 = vpop.xlane.xlu0 %783 }
 0x197   :  { %v953_v30 = vmul.f32 0.03125, %v952_v34  ;;  %v785_v37 = vmul.f32 0.03125, %v784_v36 }
 0x199   :  { %v1998_v38 = vsub.f32 %v945_v47, %v953_v30  ;;  %v2000_v39 = vsub.f32 %v777_v46, %v785_v37  ;;  %v467_v30 = vrot.slane %v1935_v24, %v2022_v1 }
 0x19b   :  { %v955_v35 = vmul.f32 %v1998_v38, %v1998_v38  ;;  %v787_v42 = vmul.f32 %v2000_v39, %v2000_v39 }
 0x19d   :  { %v956_v43 = vsel %vm108_vm3, %v955_v35, 0.0  ;;  %v788_v44 = vsel %vm108_vm3, %v787_v42, 0.0 }
 0x19e   :  { %957 = vadd.xlane.f32.xlu1 %v956_v43  ;;  %789 = vadd.xlane.f32.xlu0 %v788_v44 }
 0x1a6   :  { %v1288_v45 = vpop.xlane.xlu1 %1287  ;;  %v1120_v48 = vpop.xlane.xlu0 %1119 }
 0x1a7   :  { %v1289_v49 = vmul.f32 0.03125, %v1288_v45  ;;  %v1121_v50 = vmul.f32 0.03125, %v1120_v48 }
 0x1a9   :  { %v2008_v47 = vsub.f32 %v1281_v63, %v1289_v49  ;;  %v2010_v46 = vsub.f32 %v1113_v62, %v1121_v50  ;;  %v2019_v63 = vsub.s32 1, %v1905_v7 }
 0x1ab   :  { %v1291_v51 = vmul.f32 %v2008_v47, %v2008_v47  ;;  %v1123_v52 = vmul.f32 %v2010_v46, %v2010_v46  ;;  %v126_v2 = vrot.slane %v1913_v9, %v2019_v63  ;;  %v294_v11 = vrot.slane %v1918_v0, %v2019_v63 }
 0x1ac   :  { %v462_v33 = vrot.slane %v1935_v24, %v2019_v63  ;;  %v630_v48 = vrot.slane %v1940_v25, %v2019_v63 }
 0x1ad   :  { %v1292_v53 = vsel %vm108_vm3, %v1291_v51, 0.0  ;;  %v1124_v54 = vsel %vm108_vm3, %v1123_v52, 0.0 }
 0x1ae   :  { %1293 = vadd.xlane.f32.xlu1 %v1292_v53  ;;  %1125 = vadd.xlane.f32.xlu0 %v1124_v54  ;;  %v635_v53 = vrot.slane %v1940_v25, %v2022_v1 }
 0x20b   :  { %v118_v55 = vpop.xlane.xlu0 %117 }
 0x20c   :  { %v119_v58 = vmul.f32 0.03125, %v118_v55 }
 0x20e   :  { %v120_v59 = vadd.f32 1e-05, %v119_v58 }
 0x20f   :  { %v286_v60 = vpop.xlane.xlu1 %285 }
 0x210   :  { %1647 = vrsqrt.f32 %v120_v59  ;;  %v287_v61 = vmul.f32 0.03125, %v286_v60  ;;  %v2061_v60 = vsub.s32 3, %v1905_v7 }
 0x212   :  { %v288_v62 = vadd.f32 1e-05, %v287_v61 }
 0x214   :  { %1649 = vrsqrt.f32 %v288_v62 }
 0x21a   :  { %v1648_v3 = vpop.eup %1647 }
 0x21b   :  { %v122_v5 = vmul.f32 %v1648_v3, %v114_v8  ;;  %v454_v6 = vpop.xlane.xlu0 %453 }
 0x21c   :  { %v455_v10 = vmul.f32 0.03125, %v454_v6 }
 0x21d   :  { %v127_v12 = vmul.f32 %v126_v2, %v122_v5 }
 0x21e   :  { %v1650_v13 = vpop.eup %1649  ;;  %v456_v15 = vadd.f32 1e-05, %v455_v10  ;;  %v163_v10 = vrot.slane %v1913_v9, %v2061_v60 }
 0x21f   :  { %v2032_v17 = vadd.f32 %v131_v4, %v127_v12  ;;  %v290_v20 = vmul.f32 %v1650_v13, %v1982_v18  ;;  %v622_v21 = vpop.xlane.xlu1 %621  ;;  %v798_v12 = vrot.slane %v1951_v40, %v2019_v63 }
 0x220   :  { %1651 = vrsqrt.f32 %v456_v15  ;;  %v623_v22 = vmul.f32 0.03125, %v622_v21 }
 0x221   :  { %v2036_v8 = vmul.f32 0.70710677, %v2032_v17  ;;  %v295_v23 = vmul.f32 %v294_v11, %v290_v20  ;;  %v331_v11 = vrot.slane %v1918_v0, %v2061_v60 }
 0x222   :  { %v624_v26 = vadd.f32 1e-05, %v623_v22 }
 0x223   :  { %v137_v14 = vand.u32 2147483647, %v2036_v8  ;;  %v2039_v28 = vadd.f32 %v299_v16, %v295_v23  ;;  %v803_v23 = vrot.slane %v1951_v40, %v2022_v1  ;;  %vm135_vm4 = vcmp.ge.f32.partialorder %v2036_v8, 0.0 }
 0x224   :  { %1653 = vrsqrt.f32 %v624_v26  ;;  %v966_v26 = vrot.slane %v1956_v41, %v2019_v63 }
 0x225   :  { %v138_v29 = vmul.f32 0.3275911, %v137_v14  ;;  %v2042_v31 = vmul.f32 0.70710677, %v2039_v28  ;;  %v151_v54 = vsub.f32 0.0, %v137_v14 }
 0x227   :  { %v139_v32 = vadd.f32 1.0, %v138_v29  ;;  %v305_v18 = vand.u32 2147483647, %v2042_v31  ;;  %v152_v62 = vmul.f32 %v151_v54, %v137_v14  ;;  %vm303_vm5 = vcmp.ge.f32.partialorder %v2042_v31, 0.0 }
 0x229   :  { %1655 = vrcp.f32 %v139_v32  ;;  %v306_v34 = vmul.f32 0.3275911, %v305_v18  ;;  %v319_v2 = vsub.f32 0.0, %v305_v18  ;;  %v153_v16 = vmul.f32 1.442695, %v152_v62 }
 0x22a   :  { %v1652_v36 = vpop.eup %1651  ;;  %v971_v32 = vrot.slane %v1956_v41, %v2022_v1 }
 0x22b   :  { %v307_v37 = vadd.f32 1.0, %v306_v34  ;;  %v458_v35 = vmul.f32 %v1652_v36, %v1988_v27  ;;  %v958_v42 = vpop.xlane.xlu1 %957  ;;  %v790_v43 = vpop.xlane.xlu0 %789  ;;  %v320_v20 = vmul.f32 %v319_v2, %v305_v18  ;;  %v1134_v18 = vrot.slane %v1967_v56, %v2019_v63 }
 0x22c   :  { %v959_v44 = vmul.f32 0.03125, %v958_v42  ;;  %v791_v45 = vmul.f32 0.03125, %v790_v43  ;;  %v1139_v36 = vrot.slane %v1967_v56, %v2022_v1 }
 0x22d   :  { %1657 = vrcp.f32 %v307_v37  ;;  %v463_v49 = vmul.f32 %v462_v33, %v458_v35  ;;  %v321_v42 = vmul.f32 1.442695, %v320_v20 }
 0x22e   :  { %v1654_v50 = vpop.eup %1653  ;;  %v960_v51 = vadd.f32 1e-05, %v959_v44  ;;  %v792_v52 = vadd.f32 1e-05, %v791_v45 }
 0x22f   :  { %v2054_v55 = vadd.f32 %v467_v30, %v463_v49  ;;  %v626_v27 = vmul.f32 %v1654_v50, %v1992_v19 }
 0x230   :  { %1659 = vrsqrt.f32 %v960_v51 }
 0x231   :  { %v2058_v58 = vmul.f32 0.70710677, %v2054_v55  ;;  %v631_v59 = vmul.f32 %v630_v48, %v626_v27  ;;  %1661 = vrsqrt.f32 %v792_v52 }
 0x233   :  { %v2063_v61 = vpop.eup %1655  ;;  %v473_v3 = vand.u32 2147483647, %v2058_v58  ;;  %v2066_v4 = vadd.f32 %v635_v53, %v631_v59  ;;  %v1697_v53 = vmov 1966171168   ;;  %vm471_vm7 = vcmp.ge.f32.partialorder %v2058_v58, 0.0 }
 0x234   :  { %v142_v5 = vmul.f32 1.0614054, %v2063_v61  ;;  %v167_v54 = vunpack.c.l.s4 %v1697_v53 }
 0x235   :  { %v474_v19 = vmul.f32 0.3275911, %v473_v3  ;;  %v2070_v6 = vmul.f32 0.70710677, %v2066_v4 }
 0x236   :  { %v143_v13 = vadd.f32 -1.4531521, %v142_v5 }
 0x237   :  { %v2078_v15 = vpop.eup %1657  ;;  %v475_v21 = vadd.f32 1.0, %v474_v19  ;;  %v2081_v22 = vand.u32 2147483647, %v2070_v6  ;;  %vm639_vm8 = vcmp.ge.f32.partialorder %v2070_v6, 0.0 }
 0x238   :  { %v144_v14 = vmul.f32 %v2063_v61, %v143_v13  ;;  %v310_v29 = vmul.f32 1.0614054, %v2078_v15 }
 0x239   :  { %1663 = vrcp.f32 %v475_v21  ;;  %v642_v33 = vmul.f32 0.3275911, %v2081_v22 }
 0x23a   :  { %v1660_v34 = vpop.eup %1659  ;;  %v145_v30 = vadd.f32 1.4214138, %v144_v14  ;;  %v311_v37 = vadd.f32 -1.4531521, %v310_v29  ;;  %1665 = vpow2.f32 %v153_v16  ;;  %v168_v14 = vunpack.c.0.s8 %v167_v54 }
 0x23b   :  { %v1662_v35 = vpop.eup %1661  ;;  %v643_v43 = vadd.f32 1.0, %v642_v33  ;;  %v962_v44 = vmul.f32 %v1660_v34, %v1998_v38  ;;  %v1294_v45 = vpop.xlane.xlu1 %1293  ;;  %v487_v38 = vsub.f32 0.0, %v473_v3 }
 0x23c   :  { %v1126_v48 = vpop.xlane.xlu0 %1125  ;;  %v146_v49 = vmul.f32 %v2063_v61, %v145_v30  ;;  %v312_v50 = vmul.f32 %v2078_v15, %v311_v37  ;;  %v794_v51 = vmul.f32 %v1662_v35, %v2000_v39  ;;  %v1295_v52 = vmul.f32 0.03125, %v1294_v45 }
 0x23d   :  { %1667 = vrcp.f32 %v643_v43  ;;  %v967_v27 = vmul.f32 %v966_v26, %v962_v44  ;;  %v1127_v59 = vmul.f32 0.03125, %v1126_v48  ;;  %v1302_v26 = vrot.slane %v1972_v57, %v2019_v63 }
 0x23e   :  { %v147_v62 = vadd.f32 -0.28449672, %v146_v49  ;;  %v313_v2 = vadd.f32 1.4214138, %v312_v50  ;;  %v799_v5 = vmul.f32 %v798_v12, %v794_v51  ;;  %v1296_v19 = vadd.f32 1e-05, %v1295_v52 }
 0x23f   :  { %1669 = vpow2.f32 %v321_v42  ;;  %v2100_v13 = vadd.f32 %v971_v32, %v967_v27  ;;  %v1128_v16 = vadd.f32 1e-05, %v1127_v59  ;;  %v488_v34 = vmul.f32 %v487_v38, %v473_v3 }
 0x240   :  { %v148_v20 = vmul.f32 %v2063_v61, %v147_v62  ;;  %v314_v21 = vmul.f32 %v2078_v15, %v313_v2  ;;  %v2104_v39 = vadd.f32 %v803_v23, %v799_v5  ;;  %1671 = vrsqrt.f32 %v1296_v19 }
 0x241   :  { %v2109_v29 = vmul.f32 0.70710677, %v2100_v13  ;;  %1673 = vrsqrt.f32 %v1128_v16  ;;  %v655_v30 = vsub.f32 0.0, %v2081_v22  ;;  %v1307_v35 = vrot.slane %v1972_v57, %v2022_v1 }
 0x242   :  { %v149_v12 = vadd.f32 0.2548296, %v148_v20  ;;  %v315_v32 = vadd.f32 -0.28449672, %v314_v21  ;;  %v2117_v37 = vmul.f32 0.70710677, %v2104_v39  ;;  %v2125_v48 = vsub.s32 %v168_v14, %v1905_v7 }
 0x243   :  { %v2112_v33 = vpop.eup %1663  ;;  %v977_v23 = vand.u32 2147483647, %v2109_v29  ;;  %v133_v3 = vmul.f32 0.5, %v2032_v17  ;;  %v1698_v51 = vmov -1.0   ;;  %v489_v59 = vmul.f32 1.442695, %v488_v34 }
 0x244   :  { %v150_v42 = vmul.f32 %v2063_v61, %v149_v12  ;;  %v316_v43 = vmul.f32 %v2078_v15, %v315_v32  ;;  %v478_v44 = vmul.f32 1.0614054, %v2112_v33  ;;  %v1666_v45 = vpop.eup %1665  ;;  %v2129_v50 = vand.u32 2147483647, %v2117_v37 }
 0x245   :  { %v978_v49 = vmul.f32 0.3275911, %v977_v23  ;;  %v136_v52 = vsel %vm135_vm4, 1.0, %v1698_v51  ;;  %v656_v7 = vmul.f32 %v655_v30, %v2081_v22  ;;  %v301_v16 = vmul.f32 0.5, %v2039_v28 }
 0x246   :  { %v155_v61 = vmul.f32 %v1666_v45, %v150_v42  ;;  %v317_v53 = vadd.f32 0.2548296, %v316_v43  ;;  %v479_v54 = vadd.f32 -1.4531521, %v478_v44  ;;  %v810_v17 = vmul.f32 0.3275911, %v2129_v50 }
 0x247   :  { %v2134_v27 = vpop.eup %1667  ;;  %v979_v62 = vadd.f32 1.0, %v978_v49  ;;  %v657_v30 = vmul.f32 1.442695, %v656_v7  ;;  %v304_v49 = vsel %vm303_vm5, 1.0, %v1698_v51  ;;  %vm975_vm9 = vcmp.ge.f32.partialorder %v2109_v29, 0.0 }
 0x248   :  { %v156_v2 = vsub.f32 1.0, %v155_v61  ;;  %v318_v5 = vmul.f32 %v2078_v15, %v317_v53  ;;  %v480_v19 = vmul.f32 %v2112_v33, %v479_v54  ;;  %v646_v38 = vmul.f32 1.0614054, %v2134_v27 }
 0x249   :  { %v1670_v8 = vpop.eup %1669  ;;  %1675 = vrcp.f32 %v979_v62  ;;  %v811_v20 = vadd.f32 1.0, %v810_v17  ;;  %v991_v15 = vsub.f32 0.0, %v977_v23  ;;  %vm807_vm10 = vcmp.ge.f32.partialorder %v2117_v37, 0.0 }
 0x24a   :  { %v1672_v21 = vpop.eup %1671  ;;  %v157_v14 = vmul.f32 %v156_v2, %v136_v52  ;;  %v323_v22 = vmul.f32 %v1670_v8, %v318_v5  ;;  %v481_v12 = vadd.f32 1.4214138, %v480_v19  ;;  %v647_v32 = vadd.f32 -1.4531521, %v646_v38 }
 0x24b   :  { %v1674_v34 = vpop.eup %1673  ;;  %1677 = vpow2.f32 %v489_v59  ;;  %v1298_v42 = vmul.f32 %v1672_v21, %v2008_v47  ;;  %v992_v47 = vmul.f32 %v991_v15, %v977_v23 }
 0x24c   :  { %v158_v43 = vadd.f32 1.0, %v157_v14  ;;  %v324_v44 = vsub.f32 1.0, %v323_v22  ;;  %v482_v45 = vmul.f32 %v2112_v33, %v481_v12  ;;  %v648_v28 = vmul.f32 %v2134_v27, %v647_v32 }
 0x24d   :  { %1679 = vrcp.f32 %v811_v20  ;;  %v1303_v52 = vmul.f32 %v1302_v26, %v1298_v42  ;;  %v1130_v61 = vmul.f32 %v1674_v34, %v2010_v46  ;;  %v993_v19 = vmul.f32 1.442695, %v992_v47 }
 0x24e   :  { %v159_v53 = vmul.f32 %v158_v43, %v133_v3  ;;  %v325_v54 = vmul.f32 %v324_v44, %v304_v49  ;;  %v483_v59 = vadd.f32 -0.28449672, %v482_v45  ;;  %v649_v7 = vadd.f32 1.4214138, %v648_v28 }
 0x24f   :  { %1681 = vpow2.f32 %v657_v30  ;;  %v2150_v62 = vadd.f32 %v1307_v35, %v1303_v52  ;;  %v1135_v17 = vmul.f32 %v1134_v18, %v1130_v61  ;;  %v823_v3 = vsub.f32 0.0, %v2129_v50 }
 0x250   :  { %v164_v31 = vadd.f32 %v163_v10, %v159_v53  ;;  %v326_v2 = vadd.f32 1.0, %v325_v54  ;;  %v484_v26 = vmul.f32 %v2112_v33, %v483_v59  ;;  %v650_v46 = vmul.f32 %v2134_v27, %v649_v7 }
 0x251   :  { %v2162_v5 = vmul.f32 0.70710677, %v2150_v62  ;;  %v2167_v23 = vadd.f32 %v1139_v36, %v1135_v17  ;;  %v824_v22 = vmul.f32 %v823_v3, %v2129_v50  ;;  %v499_v50 = vrot.slane %v1935_v24, %v2061_v60 }
 0x252   :  { %v172_v63 = vrot.slane %v164_v31, %v2125_v48  ;;  %v327_v18 = vmul.f32 %v326_v2, %v301_v16  ;;  %v485_v9 = vadd.f32 0.2548296, %v484_v26  ;;  %v651_v10 = vadd.f32 -0.28449672, %v650_v46 }
 0x253   :  { %v2170_v35 = vpop.eup %1675  ;;  %v2174_v38 = vand.u32 2147483647, %v2162_v5  ;;  %v472_v52 = vsel %vm471_vm7, 1.0, %v1698_v51  ;;  %v825_v7 = vmul.f32 1.442695, %v824_v22  ;;  %vm1311_vm11 = vcmp.ge.f32.partialorder %v2162_v5, 0.0 }
 0x254   :  { %v173_v8 = vcombine.high %v172_v63, %v172_v63  ;;  %v180_v20 = vrot.slane %v172_v63, %v2125_v48  ;;  %v332_v1 = vadd.f32 %v331_v11, %v327_v18  ;;  %v486_v36 = vmul.f32 %v2112_v33, %v485_v9 }
 0x255   :  { %v1678_v16 = vpop.eup %1677  ;;  %v652_v21 = vmul.f32 %v2134_v27, %v651_v10  ;;  %v982_v14 = vmul.f32 1.0614054, %v2170_v35  ;;  %v1314_v12 = vmul.f32 0.3275911, %v2174_v38  ;;  %v2192_v33 = vmul.f32 0.70710677, %v2167_v23 }
 0x256   :  { %v187_v32 = vrot.slane %v173_v8, %v2125_v48  ;;  %191 = vst.msk [vmem:[%s2325_s3] sm:$0x1] %vm190_vm6, %v180_v20  ;;  %v340_v0 = vrot.slane %v332_v1, %v2125_v48  ;;  %v491_v11 = vmul.f32 %v1678_v16, %v486_v36  ;;  %v640_v63 = vsel %vm639_vm8, 1.0, %v1698_v51 }
 0x257   :  { %v2194_v34 = vpop.eup %1679  ;;  %v653_v30 = vadd.f32 0.2548296, %v652_v21  ;;  %v983_v15 = vadd.f32 -1.4531521, %v982_v14  ;;  %v1315_v42 = vadd.f32 1.0, %v1314_v12  ;;  %v1327_v8 = vsub.f32 0.0, %v2174_v38 }
 0x258   :  { %192 = vst.msk [vmem:[%s2325_s3 + $0x8] sm:$0x1] %vm190_vm6, %v187_v32  ;;  %v341_v43 = vcombine.high %v340_v0, %v340_v0  ;;  %v348_v44 = vrot.slane %v340_v0, %v2125_v48  ;;  %v492_v45 = vsub.f32 1.0, %v491_v11  ;;  %v814_v28 = vmul.f32 1.0614054, %v2194_v34 }
 0x259   :  { %v1682_v49 = vpop.eup %1681  ;;  %v654_v24 = vmul.f32 %v2134_v27, %v653_v30  ;;  %v984_v61 = vmul.f32 %v2170_v35, %v983_v15  ;;  %1683 = vrcp.f32 %v1315_v42  ;;  %v1145_v17 = vand.u32 2147483647, %v2192_v33 }
 0x25a   :  { %v355_v53 = vrot.slane %v341_v43, %v2125_v48  ;;  %358 = vst.msk [vmem:[%s2325_s3 + $0x1] sm:$0x1] %vm190_vm6, %v348_v44  ;;  %v493_v54 = vmul.f32 %v492_v45, %v472_v52  ;;  %v815_v59 = vadd.f32 -1.4531521, %v814_v28  ;;  %v469_v27 = vmul.f32 0.5, %v2054_v55 }
 0x25b   :  { %v659_v47 = vmul.f32 %v1682_v49, %v654_v24  ;;  %v985_v58 = vadd.f32 1.4214138, %v984_v61  ;;  %1685 = vpow2.f32 %v993_v19  ;;  %v1146_v3 = vmul.f32 0.3275911, %v1145_v17 }
 0x25c   :  { %359 = vst.msk [vmem:[%s2325_s3 + $0x9] sm:$0x1] %vm190_vm6, %v355_v53  ;;  %v494_v31 = vadd.f32 1.0, %v493_v54  ;;  %v816_v2 = vmul.f32 %v2194_v34, %v815_v59  ;;  %1687 = vpow2.f32 %v825_v7  ;;  %v667_v55 = vrot.slane %v1940_v25, %v2061_v60 }
 0x25d   :  { %v660_v26 = vsub.f32 1.0, %v659_v47  ;;  %v986_v46 = vmul.f32 %v2170_v35, %v985_v58  ;;  %v1147_v20 = vadd.f32 1.0, %v1146_v3  ;;  %v637_v36 = vmul.f32 0.5, %v2066_v4 }
 0x25e   :  { %v495_v6 = vmul.f32 %v494_v31, %v469_v27  ;;  %v817_v18 = vadd.f32 1.4214138, %v816_v2  ;;  %v1328_v11 = vmul.f32 %v1327_v8, %v2174_v38  ;;  %v1159_v24 = vsub.f32 0.0, %v1145_v17 }
 0x25f   :  { %v661_v9 = vmul.f32 %v660_v26, %v640_v63  ;;  %v987_v10 = vadd.f32 -0.28449672, %v986_v46  ;;  %1689 = vrcp.f32 %v1147_v20  ;;  %v976_v7 = vsel %vm975_vm9, 1.0, %v1698_v51 }
 0x260   :  { %v500_v19 = vadd.f32 %v499_v50, %v495_v6  ;;  %v818_v1 = vmul.f32 %v2194_v34, %v817_v18  ;;  %v1329_v52 = vmul.f32 1.442695, %v1328_v11  ;;  %v1160_v2 = vmul.f32 %v1159_v24, %v1145_v17 }
 0x261   :  { %v662_v16 = vadd.f32 1.0, %v661_v9  ;;  %v988_v21 = vmul.f32 %v2170_v35, %v987_v10  ;;  %v1003_v6 = vrot.slane %v1956_v41, %v2061_v60  ;;  %v973_v63 = vmul.f32 0.5, %v2100_v13 }
 0x262   :  { %v508_v14 = vrot.slane %v500_v19, %v2125_v48  ;;  %v819_v22 = vadd.f32 -0.28449672, %v818_v1  ;;  %1691 = vpow2.f32 %v1329_v52  ;;  %v808_v9 = vsel %vm807_vm10, 1.0, %v1698_v51 }
 0x263   :  { %v1684_v12 = vpop.eup %1683  ;;  %v663_v32 = vmul.f32 %v662_v16, %v637_v36  ;;  %v989_v0 = vadd.f32 0.2548296, %v988_v21  ;;  %v835_v20 = vrot.slane %v1951_v40, %v2061_v60  ;;  %v1161_v41 = vmul.f32 1.442695, %v1160_v2 }
 0x264   :  { %v509_v30 = vcombine.high %v508_v14, %v508_v14  ;;  %v516_v25 = vrot.slane %v508_v14, %v2125_v48  ;;  %v820_v50 = vmul.f32 %v2194_v34, %v819_v22  ;;  %v1318_v15 = vmul.f32 1.0614054, %v1684_v12 }
 0x265   :  { %v668_v42 = vadd.f32 %v667_v55, %v663_v32  ;;  %v990_v4 = vmul.f32 %v2170_v35, %v989_v0  ;;  %v1686_v43 = vpop.eup %1685  ;;  %v805_v19 = vmul.f32 0.5, %v2104_v39  ;;  %1693 = vpow2.f32 %v1161_v41 }
 0x266   :  { %v523_v44 = vrot.slane %v509_v30, %v2125_v48  ;;  %526 = vst.msk [vmem:[%s2325_s3 + $0x2] sm:$0x1] %vm190_vm6, %v516_v25  ;;  %v821_v38 = vadd.f32 0.2548296, %v820_v50  ;;  %v1319_v45 = vadd.f32 -1.4531521, %v1318_v15  ;;  %v1688_v61 = vpop.eup %1687 }
 0x267   :  { %v676_v28 = vrot.slane %v668_v42, %v2125_v48  ;;  %v995_v49 = vmul.f32 %v1686_v43, %v990_v4  ;;  %v1312_v5 = vsel %vm1311_vm11, 1.0, %v1698_v51  ;;  %v1309_v52 = vmul.f32 0.5, %v2150_v62 }
 0x268   :  { %527 = vst.msk [vmem:[%s2325_s3 + $0xa] sm:$0x1] %vm190_vm6, %v523_v44  ;;  %v822_v35 = vmul.f32 %v2194_v34, %v821_v38  ;;  %v1320_v53 = vmul.f32 %v1684_v12, %v1319_v45  ;;  %vm1143_vm12 = vcmp.ge.f32.partialorder %v2192_v33, 0.0 }
 0x269   :  { %v677_v54 = vcombine.high %v676_v28, %v676_v28  ;;  %v684_v59 = vrot.slane %v676_v28, %v2125_v48  ;;  %v996_v29 = vsub.f32 1.0, %v995_v49  ;;  %v1690_v27 = vpop.eup %1689  ;;  %v1339_v49 = vrot.slane %v1972_v57, %v2061_v60 }
 0x26a   :  { %v827_v47 = vmul.f32 %v1688_v61, %v822_v35  ;;  %v1321_v58 = vadd.f32 1.4214138, %v1320_v53  ;;  %v1150_v3 = vmul.f32 1.0614054, %v1690_v27 }
 0x26b   :  { %v691_v31 = vrot.slane %v677_v54, %v2125_v48  ;;  %694 = vst.msk [vmem:[%s2325_s3 + $0x3] sm:$0x1] %vm190_vm6, %v684_v59  ;;  %v997_v34 = vmul.f32 %v996_v29, %v976_v7  ;;  %v1144_v7 = vsel %vm1143_vm12, 1.0, %v1698_v51 }
 0x26c   :  { %v828_v26 = vsub.f32 1.0, %v827_v47  ;;  %v1322_v46 = vmul.f32 %v1684_v12, %v1321_v58  ;;  %v1151_v8 = vadd.f32 -1.4531521, %v1150_v3  ;;  %v1692_v30 = vpop.eup %1691  ;;  %v1171_v58 = vrot.slane %v1967_v56, %v2061_v60 }
 0x26d   :  { %695 = vst.msk [vmem:[%s2325_s3 + $0xb] sm:$0x1] %vm190_vm6, %v691_v31  ;;  %v998_v18 = vadd.f32 1.0, %v997_v34 }
 0x26e   :  { %v829_v10 = vmul.f32 %v828_v26, %v808_v9  ;;  %v1323_v17 = vadd.f32 -0.28449672, %v1322_v46  ;;  %v1152_v16 = vmul.f32 %v1690_v27, %v1151_v8 }
 0x26f   :  { %v999_v55 = vmul.f32 %v998_v18, %v973_v63  ;;  %v1694_v35 = vpop.eup %1693 }
 0x270   :  { %v830_v1 = vadd.f32 1.0, %v829_v10  ;;  %v1324_v36 = vmul.f32 %v1684_v12, %v1323_v17  ;;  %v1153_v22 = vadd.f32 1.4214138, %v1152_v16 }
 0x271   :  { %v1004_v21 = vadd.f32 %v1003_v6, %v999_v55 }
 0x272   :  { %v831_v13 = vmul.f32 %v830_v1, %v805_v19  ;;  %v1325_v14 = vadd.f32 0.2548296, %v1324_v36  ;;  %v1154_v11 = vmul.f32 %v1690_v27, %v1153_v22 }
 0x273   :  { %v1012_v37 = vrot.slane %v1004_v21, %v2125_v48 }
 0x274   :  { %v836_v32 = vadd.f32 %v835_v20, %v831_v13  ;;  %v1326_v0 = vmul.f32 %v1684_v12, %v1325_v14  ;;  %v1155_v15 = vadd.f32 -0.28449672, %v1154_v11 }
 0x275   :  { %v1013_v25 = vcombine.high %v1012_v37, %v1012_v37  ;;  %v1020_v40 = vrot.slane %v1012_v37, %v2125_v48 }
 0x276   :  { %v844_v50 = vrot.slane %v836_v32, %v2125_v48  ;;  %v1331_v39 = vmul.f32 %v1692_v30, %v1326_v0  ;;  %v1156_v44 = vmul.f32 %v1690_v27, %v1155_v15 }
 0x277   :  { %v1027_v42 = vrot.slane %v1013_v25, %v2125_v48  ;;  %1030 = vst.msk [vmem:[%s2325_s3 + $0x5] sm:$0x1] %vm190_vm6, %v1020_v40 }
 0x278   :  { %v845_v4 = vcombine.high %v844_v50, %v844_v50  ;;  %v852_v12 = vrot.slane %v844_v50, %v2125_v48  ;;  %v1332_v43 = vsub.f32 1.0, %v1331_v39  ;;  %v1157_v28 = vadd.f32 0.2548296, %v1156_v44 }
 0x279   :  { %1031 = vst.msk [vmem:[%s2325_s3 + $0xd] sm:$0x1] %vm190_vm6, %v1027_v42 }
 0x27a   :  { %v859_v38 = vrot.slane %v845_v4, %v2125_v48  ;;  %862 = vst.msk [vmem:[%s2325_s3 + $0x4] sm:$0x1] %vm190_vm6, %v852_v12  ;;  %v1333_v45 = vmul.f32 %v1332_v43, %v1312_v5  ;;  %v1158_v61 = vmul.f32 %v1690_v27, %v1157_v28  ;;  %v1141_v27 = vmul.f32 0.5, %v2167_v23 }
 0x27c   :  { %863 = vst.msk [vmem:[%s2325_s3 + $0xc] sm:$0x1] %vm190_vm6, %v859_v38  ;;  %v1334_v24 = vadd.f32 1.0, %v1333_v45  ;;  %v1163_v54 = vmul.f32 %v1694_v35, %v1158_v61 }
 0x27e   :  { %v1335_v53 = vmul.f32 %v1334_v24, %v1309_v52  ;;  %v1164_v29 = vsub.f32 1.0, %v1163_v54 }
 0x280   :  { %v1340_v59 = vadd.f32 %v1339_v49, %v1335_v53  ;;  %v1165_v47 = vmul.f32 %v1164_v29, %v1144_v7 }
 0x282   :  { %v1348_v57 = vrot.slane %v1340_v59, %v2125_v48  ;;  %v1166_v34 = vadd.f32 1.0, %v1165_v47 }
 0x284   :  { %v1349_v31 = vcombine.high %v1348_v57, %v1348_v57  ;;  %v1356_v62 = vrot.slane %v1348_v57, %v2125_v48  ;;  %v1167_v51 = vmul.f32 %v1166_v34, %v1141_v27 }
 0x286   :  { %v1363_v2 = vrot.slane %v1349_v31, %v2125_v48  ;;  %1366 = vst.msk [vmem:[%s2325_s3 + $0x7] sm:$0x1] %vm190_vm6, %v1356_v62  ;;  %v1172_v56 = vadd.f32 %v1171_v58, %v1167_v51 }
 0x288   :  { %1367 = vst.msk [vmem:[%s2325_s3 + $0xf] sm:$0x1] %vm190_vm6, %v1363_v2  ;;  %v1180_v60 = vrot.slane %v1172_v56, %v2125_v48 }
 0x28a   :  { %v1181_v33 = vcombine.high %v1180_v60, %v1180_v60  ;;  %v1188_v23 = vrot.slane %v1180_v60, %v2125_v48 }
 0x28c   :  { %v1195_v26 = vrot.slane %v1181_v33, %v2125_v48  ;;  %1198 = vst.msk [vmem:[%s2325_s3 + $0x6] sm:$0x1] %vm190_vm6, %v1188_v23 }
 0x28e   :  { %1199 = vst.msk [vmem:[%s2325_s3 + $0xe] sm:$0x1] %vm190_vm6, %v1195_v26 }

// kernel: forward.3
= control target key start
LH: loop header
LB: loop body
LE: loop exit
PB: predicated region body
PF: predicated region fallthrough
CT: control target
= control target key end

     0   :  { %s5568_s0 = inlined_call_operand.vmem [shape: f32[2,8,32], index: 0, kind: input, shape index: {}]   ;;  %s5569_s1 = inlined_call_operand.vmem [shape: bf16[2,32,96], index: 1, kind: input, shape index: {}]   ;;  %s5570_s2 = inlined_call_operand.vmem [shape: f32[2,1,96], index: 2, kind: input, shape index: {}]   ;;  %s5571_s3 = inlined_call_operand.vmem [shape: bf16[2,32,32], index: 3, kind: input, shape index: {}]   ;;  %s5572_s4 = inlined_call_operand.vmem [shape: f32[2,1,32], index: 4, kind: input, shape index: {}]   ;;  %s5573_s5 = inlined_call_operand.vmem [shape: f32[2,1,32], index: 5, kind: input, shape index: {}]   ;;  %s5574_s6 = inlined_call_operand.vmem [shape: f32[2,1,32], index: 6, kind: input, shape index: {}]   ;;  %s5575_s7 = inlined_call_operand.vmem [shape: bf16[2,32,96], index: 7, kind: input, shape index: {}]   ;;  %s5576_s8 = inlined_call_operand.vmem [shape: f32[2,1,96], index: 8, kind: input, shape index: {}]   ;;  %s5577_s9 = inlined_call_operand.vmem [shape: bf16[2,96,32], index: 9, kind: input, shape index: {}]   ;;  %s5578_s10 = inlined_call_operand.vmem [shape: f32[2,1,32], index: 10, kind: input, shape index: {}]   ;;  %s5579_s11 = inlined_call_operand.vmem [shape: f32[2,1,32], index: 11, kind: input, shape index: {}]   ;;  %s5580_s12 = inlined_call_operand.vmem [shape: f32[2,1,32], index: 12, kind: input, shape index: {}]   ;;  %s5581_s13 = inlined_call_operand.vmem [shape: bf16[32,32], index: 13, kind: input, shape index: {}]   ;;  %s5582_s14 = inlined_call_operand.vmem [shape: f32[1,32], index: 14, kind: input, shape index: {}]   ;;  %s5583_s15 = inlined_call_operand.vmem [shape: bf16[32,64], index: 15, kind: input, shape index: {}]   ;;  %s5584_s16 = inlined_call_operand.vmem [shape: f32[1,64], index: 16, kind: input, shape index: {}]   ;;  %s5585_s17 = inlined_call_operand.vmem [shape: bf16[32,32], index: 17, kind: input, shape index: {}]   ;;  %s5586_s18 = inlined_call_operand.vmem [shape: f32[1,32], index: 18, kind: input, shape index: {}]   ;;  %s5587_s19 = inlined_call_operand.vmem [shape: f32[1,32], index: 19, kind: input, shape index: {}]   ;;  %s5588_s20 = inlined_call_operand.vmem [shape: f32[1,32], index: 20, kind: input, shape index: {}]   ;;  %s5589_s21 = inlined_call_operand.vmem [shape: bf16[32,16], index: 21, kind: input, shape index: {}]   ;;  %s5590_s22 = inlined_call_operand.vmem [shape: f32[1,16], index: 22, kind: input, shape index: {}]   ;;  %s5591_s23 = inlined_call_operand.vmem [shape: bf16[16,8], index: 23, kind: input, shape index: {}]   ;;  %s5592_s24 = inlined_call_operand.vmem [shape: f32[1,8], index: 24, kind: input, shape index: {}]   ;;  %s5593_s25 = inlined_call_operand.vmem [shape: bf16[8,2], index: 25, kind: input, shape index: {}]   ;;  %s5594_s26 = inlined_call_operand.vmem [shape: f32[1,2], index: 26, kind: input, shape index: {}]   ;;  %s5595_s27 = inlined_call_operand.hbm [shape: f32[2,1,2], index: 27, kind: output, shape index: {}]  }
   0x1   :  { %5602 = sst [smem:[#allocation9_spill]] %s5568_s0 }
   0x2   :  { %5603 = sst [smem:[#allocation10_spill]] %s5569_s1 }
   0x3   :  { %5604 = sst [smem:[#allocation11_spill]] %s5570_s2 }
   0x4   :  { %5605 = sst [smem:[#allocation12_spill]] %s5571_s3 }
   0x5   :  { %5606 = sst [smem:[#allocation13_spill]] %s5572_s4 }
   0x6   :  { %5607 = sst [smem:[#allocation14_spill]] %s5573_s5 }
   0x7   :  { %5608 = sst [smem:[#allocation15_spill]] %s5574_s6 }
   0x8   :  { %5609 = sst [smem:[#allocation16_spill]] %s5575_s7 }
   0x9   :  { %5610 = sst [smem:[#allocation17_spill]] %s5576_s8 }
   0xa   :  { %5611 = sst [smem:[#allocation18_spill]] %s5577_s9 }
   0xb   :  { %5612 = sst [smem:[#allocation19_spill]] %s5578_s10 }
   0xc   :  { %5613 = sst [smem:[#allocation20_spill]] %s5579_s11 }
   0xd   :  { %5614 = sst [smem:[#allocation21_spill]] %s5585_s17 }
   0xe   :  { %5615 = sst [smem:[#allocation22_spill]] %s5586_s18 }
   0xf   :  { %5616 = sst [smem:[#allocation23_spill]] %s5587_s19 }
  0x10   :  { %5617 = sst [smem:[#allocation24_spill]] %s5588_s20 }
  0x11   :  { %5618 = sst [smem:[#allocation25_spill]] %s5589_s21 }
  0x12   :  { %5619 = sst [smem:[#allocation26_spill]] %s5590_s22 }
  0x13   :  { %5620 = sst [smem:[#allocation27_spill]] %s5591_s23 }
  0x14   :  { %5621 = sst [smem:[#allocation28_spill]] %s5592_s24 }
  0x15   :  { %5622 = sst [smem:[#allocation29_spill]] %s5593_s25 }
  0x16   :  { %5623 = sst [smem:[#allocation30_spill]] %s5594_s26 }
  0x17   :  { %5624 = sst [smem:[#allocation31_spill]] %s5595_s27 }
  0x18   :  { %32 = vsyncpa [#allocation4], 0  ;;  %s4959_s7 = smov 0   ;;  %s4961_s4 = smov 0  }
  0x19   :  { %s4963_s8 = smov 0  }
  0x1a LB: > { %5625 = sst [smem:[#allocation6_spill]] %s4780_s4  ;;  %s47_s9 = sadd.s32 1, %s4780_s4  ;;  %s4784_s8 = sphi %s4963_s8, %s38_s8   ;;  %s4780_s4 = sphi %s4961_s4, %s5668_s4   ;;  %s4776_s7 = sphi %s4959_s7, %s5667_s7  }
  0x1b   : > { %5626 = sst [smem:[#allocation7_spill]] %s4784_s8  ;;  %p48_p0 = scmp.ge.s32.totalorder %s47_s9, 2 }
  0x1c   : > { %p4065_p1 = scmp.ge.s32.totalorder %s4784_s8, 1  ;;  %p855_p2 = scmp.lt.s32.totalorder %s4784_s8, 3 }
  0x1d   : > { %s5670_s9 = smov (%p48_p0, %s47_s9), 0 }
  0x1e   : > { %5627 = sst [smem:[#allocation8_spill]] %s5670_s9  ;;  %p856_p3 = pnand %p4065_p1, %p855_p2 }
  0x1f   : > { %p972_p4 = scmp.lt.s32.totalorder (!%p856_p3), %s4776_s7, 1  ;;  %s5629_s2 = sld [smem:[#allocation10_spill]] (!%p856_p3) }
  0x20   : > { %859 = sbr.rel (%p856_p3) target bundleno = 8263 (0x2047), region = 128  ;;  %s5630_s4 = sld [smem:[#allocation12_spill]] (!%p856_p3) }
  0x21   : > { %s5634_s11 = sld [smem:[#allocation16_spill]] (!%p856_p3)  ;;  %s5635_s9 = sld [smem:[#allocation17_spill]] (!%p856_p3) }
  0x22   : > { %s5636_s8 = sld [smem:[#allocation19_spill]] (!%p856_p3)  ;;  %s5637_s23 = sld [smem:[#allocation20_spill]] (!%p856_p3) }
  0x23   : > { %s5638_s10 = sld [smem:[#allocation18_spill]] (!%p856_p3)  ;;  %p4073_p5 = scmp.ne.s32.totalorder (!%p856_p3), %s4776_s7, 0 }
  0x27   : > { %s4982_s5 = scalar_select %p972_p4, %s4776_s7, 1 }
  0x28   : > { %1021 = sbr.rel (%p4073_p5) target bundleno = 55 (0x37), region = 132  ;;  %vm1024_vm0 = vcmask (!%p4073_p5), 261120  }
  0x29   : > { %s4163_s28 = sshll.u32 %s4982_s5, 4  ;;  %s1001_s18 = scalar_lea.vmem %s5635_s9, %s4982_s5 }
  0x2a   : > { %s976_s3 = scalar_lea.vmem %s5629_s2, %s4163_s28  ;;  %s4995_s27 = scalar_lea.vmem %s5630_s4, %s4163_s28 }
  0x2b   : > { %s5012_s2 = scalar_lea.vmem %s5634_s11, %s4163_s28  ;;  %s4542_s17 = smul.u32 48, %s4982_s5 }
  0x2c   : > { %s1009_s25 = scalar_lea.vmem %s5636_s8, %s4982_s5  ;;  %s1012_s19 = scalar_lea.vmem %s5637_s23, %s4982_s5 }
  0x2d   : > { %s5030_s29 = scalar_lea.vmem %s5638_s10, %s4542_s17  ;;  %s1015_s6 = scalar_lea.vmem %s5580_s12, %s4982_s5 }
  0x2e   : > { %s5639_s4 = sld [smem:[#allocation9_spill]] (!%p4073_p5) }
  0x34   : > { %s5640_s9 = smov %s5639_s4  ;;  %v1022_v0 = vld [vmem:[%s5639_s4] sm:$0xff] }
  0x35   : > { %v1023_v1 = vld [vmem:[%s5640_s9 + $0x8] sm:$0xff]  ;;  %1025 = vst.msk [vmem:[#allocation2] sm:$0xff] %vm1024_vm0, %v1022_v0 }
  0x36   : > { %1026 = vst.msk [vmem:[#allocation2 + $0x8] sm:$0xff] %vm1024_vm0, %v1023_v1 }
  0x37 PF: > { %v4621_v2 = vld [vmem:[%s976_s3] sm:$0xff]   ;;  %v4786_v3 = vmov 0.0   ;;  %v4622_v4 = vld [vmem:[%s976_s3 + $0x8] sm:$0xff]   ;;  %vm4787_vm1 = vmmov 0   ;;  %vm1053_vm2 = vcmask 261120   ;;  %s5641_s8 = sld [smem:[#allocation11_spill]] }
  0x38   : > { %4266 = vmatprep.subr.bf16.mxu0 %v4786_v3  ;;  %4286 = vmatprep.subr.bf16.mxu1 %v4786_v3  ;;  %s4788_s20 = smov 96   ;;  %vm1106_vm3 = vcmask 64512   ;;  %s4789_s23 = smov 64   ;;  %vm1232_vm4 = vcmask 1043456   ;;  %vm2016_vm5 = vcmask 130048   ;;  %vm2019_vm6 = vcmask 195584  }
  0x39   : > { %4267 = vmatpush3.bf16.msra.mxu0 %v4621_v2  ;;  %4270 = vmatprep.mubr.msk.bf16.mxu0 %vm4787_vm1, %v4786_v3  ;;  %s4790_s21 = smov 88   ;;  %s4791_s0 = smov 120   ;;  %vm2315_vm9 = vcmask 785408  }
  0x3a   : > { %4268 = vmatprep.subr.bf16.mxu0 %v4786_v3  ;;  %4288 = vmatprep.mubr.msk.bf16.mxu1 %vm4787_vm1, %v4786_v3  ;;  %s4792_s10 = smov 56   ;;  %s4793_s28 = smov 80  }
  0x3b   : > { %s4794_s1 = smov 112   ;;  %s4795_s11 = smov 48  }
  0x3c   : > { %v5047_v5 = vld [vmem:[#allocation2] sm:$0xff]  ;;  %s4796_s30 = smov 72   ;;  %s4797_s4 = smov 104  }
  0x3d   : > { %v5049_v6 = vld [vmem:[#allocation2 + $0x8] sm:$0xff]  ;;  %4269 = vmatpush3.bf16.msra.mxu0 %v4622_v4  ;;  %s5642_s22 = scalar_lea.vmem %s5641_s8, %s4982_s5  ;;  %s4798_s26 = smov 40  }
  0x3e   : > { %v1029_v7 = vpack.c.bf16 %v5049_v6, %v5047_v5  ;;  %4274 = vmatprep.subr.bf16.mxu0 %v4786_v3  ;;  %v4074_v8 = vld [vmem:[%s5642_s22] ss:$0 sm:$0xff]  ;;  %s4799_s24 = smov 8   ;;  %s4800_s17 = smov 16  }
  0x3f   : > { %s4801_s3 = smov 24   ;;  %s5643_s22 = sld [smem:[#allocation13_spill]] }
  0x40   : > { %4271 = vmatmul.mubr.msk.bf16.vlgmr.msra.gmra.mrb[0].mxu0 %vm1053_vm2, %v1029_v7  ;;  %p4116_p6 = scmp.ne.s32.totalorder %s4776_s7, 1 }
  0x41   : > { %4276 = vmatprep.mubr.msk.bf16.mxu0 %vm4787_vm1, %v4786_v3  ;;  %vm4804_vm10 = vmmov (!%p4116_p6), 0   ;;  %vm2446_vm11 = vcmask (!%p4116_p6), 1041409   ;;  %vm2700_vm12 = vcmask (!%p4116_p6), 57344   ;;  %vm3585_vm13 = vcmask (!%p4116_p6), 254976   ;;  %s5658_s8 = sld [smem:[#allocation26_spill]] (!%p4116_p6) }
  0x42   : > { %vm3873_vm0 = vcmask (!%p4116_p6), 8192  }
 0x113   : > { %v1091_v9 = vpop.f32.mrb[0].mxu0 }
 0x114   : > { %v1092_v10 = vadd.f32 %v4074_v8, %v1091_v9  ;;  %v4272_v11 = vpop.f32.mrb[1].mxu0 }
 0x115   : > { %v1094_v12 = vpop.f32.mrb[2].mxu0 }
 0x116   : > { %v5065_v13 = vpack.c.bf16 %v1092_v10, %v1092_v10  ;;  %v1095_v14 = vadd.f32 %v4074_v8, %v1094_v12  ;;  %v4273_v15 = vpop.f32.mrb[3].mxu0 }
 0x118   : > { %1104 = vrot.lane.b32.xlu0 %v5065_v13, %s4788_s20  ;;  %v5068_v16 = vpack.c.bf16 %v1095_v14, %v1095_v14 }
 0x11c   : > { %1153 = vrot.lane.b32.xlu0 %v5068_v16, %s4788_s20  ;;  %s5644_s20 = scalar_lea.vmem %s5643_s22, %s4982_s5  ;;  %s5652_s22 = sld [smem:[#allocation21_spill]] (!%p4116_p6) }
 0x18a   : > { %v1105_v17 = vpop.permute.xlu0 %1104 }
 0x18b   : > { %v1111_v18 = vsel %vm1106_vm3, %v1105_v17, 0 }
 0x18c   : > { %4275 = vmatpush3.bf16.xpose.msra.mxu0 %v1111_v18 }
 0x18d   : > { %4280 = vmatprep.subr.bf16.mxu0 %v4786_v3 }
 0x18e   : > { %v1154_v19 = vpop.permute.xlu0 %1153 }
 0x18f   : > { %v1159_v20 = vsel %vm1106_vm3, %v1154_v19, 0 }
 0x193   : > { %4277 = vmatmul.mubr.msk.bf16.vlgmr.msra.gmra.mrb[4].mxu0 %vm1106_vm3, %v5065_v13 }
 0x194   : > { %4281 = vmatpush3.bf16.xpose.msra.mxu0 %v1159_v20  ;;  %4282 = vmatprep.mubr.msk.bf16.mxu0 %vm4787_vm1, %v4786_v3 }
 0x195   : > { %4292 = vmatprep.subr.bf16.mxu0 %v4786_v3 }
 0x19b   : > { %4283 = vmatmul.mubr.msk.bf16.vlgmr.msra.gmra.mrb[8].mxu0 %vm1106_vm3, %v5068_v16 }
 0x19c   : > { %4294 = vmatprep.mubr.msk.bf16.mxu0 %vm4787_vm1, %v4786_v3 }
 0x266   : > { %v1147_v21 = vpop.f32.mrb[4].mxu0 }
 0x267   : > { %v1201_v22 = vmul.f32 0.35355338, %v1147_v21  ;;  %v4278_v23 = vpop.f32.mrb[5].mxu0 }
 0x268   : > { %v1150_v24 = vpop.f32.mrb[6].mxu0 }
 0x269   : > { %v4279_v25 = vpop.f32.mrb[7].mxu0  ;;  %v1203_v26 = vsel %vm1106_vm3, %v1201_v22, -inf }
 0x26a   : > { %1204 = vmax.xlane.f32.xlu1 %v1203_v26 }
 0x26e   : > { %v1195_v27 = vpop.f32.mrb[8].mxu0 }
 0x26f   : > { %v1202_v28 = vmul.f32 0.35355338, %v1195_v27  ;;  %v4284_v29 = vpop.f32.mrb[9].mxu0 }
 0x270   : > { %v1198_v30 = vpop.f32.mrb[10].mxu0 }
 0x271   : > { %v4285_v31 = vpop.f32.mrb[11].mxu0  ;;  %v1206_v32 = vsel %vm1106_vm3, %v1202_v28, -inf }
 0x272   : > { %1207 = vmax.xlane.f32.xlu1 %v1206_v32 }
 0x283   : > { %1227 = vrot.lane.b32.xlu1 %v5065_v13, %s4789_s23 }
 0x287   : > { %1276 = vrot.lane.b32.xlu1 %v5068_v16, %s4789_s23 }
 0x28b   : > { %1326 = vrot.lane.b32.xlu1 %v5065_v13, %s4790_s21 }
 0x2f7   : > { %v1205_v33 = vpop.xlane.xlu1 %1204 }
 0x2f8   : > { %v1209_v34 = vsub.f32 %v1201_v22, %v1205_v33 }
 0x2fa   : > { %v1211_v35 = vmul.f32 1.442695, %v1209_v34 }
 0x2fc   : > { %4633 = vpow2.f32 %v1211_v35 }
 0x2ff   : > { %v1208_v36 = vpop.xlane.xlu1 %1207 }
 0x300   : > { %v1210_v37 = vsub.f32 %v1202_v28, %v1208_v36 }
 0x302   : > { %v1213_v38 = vmul.f32 1.442695, %v1210_v37 }
 0x303   : > { %v1228_v39 = vpop.permute.xlu1 %1227 }
 0x304   : > { %4635 = vpow2.f32 %v1213_v38  ;;  %v1234_v40 = vsel %vm1232_vm4, %v1228_v39, 0 }
 0x305   : > { %4287 = vmatpush3.bf16.msra.mxu1 %v1234_v40 }
 0x306   : > { %v4634_v41 = vpop.eup %4633  ;;  %4298 = vmatprep.subr.bf16.mxu1 %v4786_v3 }
 0x307   : > { %v1277_v42 = vpop.permute.xlu1 %1276  ;;  %v1215_v43 = vsel %vm1106_vm3, %v4634_v41, 0.0 }
 0x308   : > { %v1282_v44 = vsel %vm1232_vm4, %v1277_v42, 0  ;;  %1216 = vadd.xlane.f32.xlu0 %v1215_v43 }
 0x309   : > { %4293 = vmatpush3.bf16.msra.mxu0 %v1282_v44 }
 0x30a   : > { %4304 = vmatprep.subr.bf16.mxu0 %v4786_v3 }
 0x30b   : > { %v1327_v48 = vpop.permute.xlu1 %1326 }
 0x30c   : > { %v1332_v53 = vsel %vm1106_vm3, %v1327_v48, 0 }
 0x30e   : > { %v4636_v45 = vpop.eup %4635 }
 0x30f   : > { %v1218_v46 = vsel %vm1106_vm3, %v4636_v45, 0.0 }
 0x310   : > { %1219 = vadd.xlane.f32.xlu1 %v1218_v46 }
 0x31e   : > { %1324 = vrot.lane.b32.xlu0 %v5065_v13, %s4791_s0 }
 0x321   : > { %1376 = vrot.lane.b32.xlu1 %v5068_v16, %s4790_s21  ;;  %s5653_s21 = sld [smem:[#allocation22_spill]] (!%p4116_p6) }
 0x325   : > { %1374 = vrot.lane.b32.xlu1 %v5068_v16, %s4791_s0  ;;  %s5645_s0 = sld [smem:[#allocation14_spill]] }
 0x395   : > { %v1217_v47 = vpop.xlane.xlu0 %1216 }
 0x396   : > { %4637 = vrcp.f32 %v1217_v47 }
 0x399   : > { %v1325_v58 = vpop.permute.xlu0 %1324 }
 0x39d   : > { %v1220_v49 = vpop.xlane.xlu1 %1219 }
 0x39e   : > { %4639 = vrcp.f32 %v1220_v49 }
 0x3a0   : > { %v4638_v50 = vpop.eup %4637 }
 0x3a1   : > { %v1222_v51 = vmul.f32 %v4638_v50, %v4634_v41  ;;  %v1377_v56 = vpop.permute.xlu1 %1376 }
 0x3a2   : > { %v1382_v59 = vsel %vm1106_vm3, %v1377_v56, 0 }
 0x3a3   : > { %v1225_v52 = vpack.c.bf16 %v1222_v51, %v1222_v51 }
 0x3a5   : > { %4289 = vmatmul.mubr.msk.bf16.vlgmr.msra.gmra.mrb[0].mxu1 %vm1106_vm3, %v1225_v52  ;;  %v1375_v60 = vpop.permute.xlu1 %1374 }
 0x3a6   : > { %4299 = vmatpush3.bf16.xpose.msra.mxu1 %v1332_v53  ;;  %4300 = vmatprep.mubr.msk.bf16.mxu1 %vm4787_vm1, %v4786_v3 }
 0x3a7   : > { %4310 = vmatprep.subr.bf16.mxu1 %v4786_v3 }
 0x3a8   : > { %v4640_v54 = vpop.eup %4639 }
 0x3a9   : > { %v1224_v55 = vmul.f32 %v4640_v54, %v4636_v45 }
 0x3ab   : > { %v1226_v57 = vpack.c.bf16 %v1224_v55, %v1224_v55 }
 0x3ad   : > { %4295 = vmatmul.mubr.msk.bf16.vlgmr.msra.gmra.mrb[12].mxu0 %vm1106_vm3, %v1226_v57  ;;  %4301 = vmatmul.mubr.msk.bf16.vlgmr.msra.gmra.mrb[4].mxu1 %vm1106_vm3, %v1325_v58 }
 0x3ae   : > { %4305 = vmatpush3.bf16.xpose.msra.mxu0 %v1382_v59  ;;  %4306 = vmatprep.mubr.msk.bf16.mxu0 %vm4787_vm1, %v4786_v3 }
 0x3af   : > { %4316 = vmatprep.subr.bf16.mxu0 %v4786_v3  ;;  %4312 = vmatprep.mubr.msk.bf16.mxu1 %vm4787_vm1, %v4786_v3 }
 0x3b5   : > { %4307 = vmatmul.mubr.msk.bf16.vlgmr.msra.gmra.mrb[16].mxu0 %vm1106_vm3, %v1375_v60 }
 0x3b6   : > { %4318 = vmatprep.mubr.msk.bf16.mxu0 %vm4787_vm1, %v4786_v3 }
 0x478   : > { %v5113_v61 = vpop.f32.mrb[0].mxu1 }
 0x479   : > { %v4290_v62 = vpop.f32.mrb[1].mxu1 }
 0x47a   : > { %v1273_v63 = vpop.f32.mrb[2].mxu1 }
 0x47b   : > { %v4291_v0 = vpop.f32.mrb[3].mxu1 }
 0x480   : > { %v5115_v1 = vpop.f32.mrb[12].mxu0  ;;  %v1368_v2 = vpop.f32.mrb[4].mxu1 }
 0x481   : > { %v1424_v4 = vmul.f32 0.35355338, %v1368_v2  ;;  %v4296_v7 = vpop.f32.mrb[13].mxu0  ;;  %v4302_v8 = vpop.f32.mrb[5].mxu1 }
 0x482   : > { %v1321_v9 = vpop.f32.mrb[14].mxu0  ;;  %v1371_v10 = vpop.f32.mrb[6].mxu1 }
 0x483   : > { %v4297_v11 = vpop.f32.mrb[15].mxu0  ;;  %v4303_v12 = vpop.f32.mrb[7].mxu1  ;;  %v1426_v14 = vsel %vm1106_vm3, %v1424_v4, -inf }
 0x484   : > { %1427 = vmax.xlane.f32.xlu1 %v1426_v14 }
 0x488   : > { %v1418_v15 = vpop.f32.mrb[16].mxu0 }
 0x489   : > { %v1425_v17 = vmul.f32 0.35355338, %v1418_v15  ;;  %v4308_v18 = vpop.f32.mrb[17].mxu0 }
 0x48a   : > { %v1421_v19 = vpop.f32.mrb[18].mxu0 }
 0x48b   : > { %v4309_v20 = vpop.f32.mrb[19].mxu0  ;;  %v1429_v21 = vsel %vm1106_vm3, %v1425_v17, -inf }
 0x48c   : > { %1430 = vmax.xlane.f32.xlu0 %v1429_v21 }
 0x495   : > { %1450 = vrot.lane.b32.xlu1 %v5065_v13, %s4792_s10 }
 0x499   : > { %1548 = vrot.lane.b32.xlu1 %v5065_v13, %s4793_s28 }
 0x4a2   : > { %1498 = vrot.lane.b32.xlu0 %v5068_v16, %s4792_s10  ;;  %s5646_s10 = scalar_lea.vmem %s5645_s0, %s4982_s5 }
 0x4a6   : > { %1546 = vrot.lane.b32.xlu0 %v5065_v13, %s4794_s1 }
 0x511   : > { %v1428_v22 = vpop.xlane.xlu1 %1427 }
 0x512   : > { %v1432_v23 = vsub.f32 %v1424_v4, %v1428_v22 }
 0x514   : > { %v1434_v24 = vmul.f32 1.442695, %v1432_v23 }
 0x515   : > { %v1451_v25 = vpop.permute.xlu1 %1450 }
 0x516   : > { %4641 = vpow2.f32 %v1434_v24  ;;  %v1456_v26 = vsel %vm1232_vm4, %v1451_v25, 0 }
 0x517   : > { %4311 = vmatpush3.bf16.msra.mxu1 %v1456_v26 }
 0x518   : > { %4322 = vmatprep.subr.bf16.mxu1 %v4786_v3 }
 0x519   : > { %v1431_v27 = vpop.xlane.xlu0 %1430  ;;  %v1549_v36 = vpop.permute.xlu1 %1548 }
 0x51a   : > { %v1433_v28 = vsub.f32 %v1425_v17, %v1431_v27  ;;  %v1554_v42 = vsel %vm1106_vm3, %v1549_v36, 0 }
 0x51c   : > { %v1436_v29 = vmul.f32 1.442695, %v1433_v28 }
 0x51d   : > { %v1499_v30 = vpop.permute.xlu0 %1498 }
 0x51e   : > { %4643 = vpow2.f32 %v1436_v29  ;;  %v1504_v31 = vsel %vm1232_vm4, %v1499_v30, 0 }
 0x51f   : > { %4317 = vmatpush3.bf16.msra.mxu0 %v1504_v31 }
 0x520   : > { %v4642_v32 = vpop.eup %4641  ;;  %4328 = vmatprep.subr.bf16.mxu0 %v4786_v3 }
 0x521   : > { %v1438_v33 = vsel %vm1106_vm3, %v4642_v32, 0.0  ;;  %v1547_v47 = vpop.permute.xlu0 %1546 }
 0x522   : > { %1439 = vadd.xlane.f32.xlu1 %v1438_v33 }
 0x528   : > { %v4644_v34 = vpop.eup %4643 }
 0x529   : > { %v1441_v35 = vsel %vm1106_vm3, %v4644_v34, 0.0 }
 0x52a   : > { %1442 = vadd.xlane.f32.xlu1 %v1441_v35 }
 0x53b   : > { %1598 = vrot.lane.b32.xlu1 %v5068_v16, %s4793_s28  ;;  %s4805_s28 = smov (!%p4116_p6), 96  }
 0x53f   : > { %1596 = vrot.lane.b32.xlu1 %v5068_v16, %s4794_s1  ;;  %s5647_s1 = sld [smem:[#allocation15_spill]] }
 0x5af   : > { %v1440_v37 = vpop.xlane.xlu1 %1439 }
 0x5b0   : > { %4645 = vrcp.f32 %v1440_v37 }
 0x5b7   : > { %v1443_v38 = vpop.xlane.xlu1 %1442 }
 0x5b8   : > { %4647 = vrcp.f32 %v1443_v38 }
 0x5ba   : > { %v4646_v39 = vpop.eup %4645 }
 0x5bb   : > { %v1445_v40 = vmul.f32 %v4646_v39, %v4642_v32  ;;  %v1599_v45 = vpop.permute.xlu1 %1598 }
 0x5bc   : > { %v1604_v48 = vsel %vm1106_vm3, %v1599_v45, 0 }
 0x5bd   : > { %v1448_v41 = vpack.c.bf16 %v1445_v40, %v1445_v40 }
 0x5bf   : > { %4313 = vmatmul.mubr.msk.bf16.vlgmr.msra.gmra.mrb[8].mxu1 %vm1106_vm3, %v1448_v41  ;;  %v1597_v49 = vpop.permute.xlu1 %1596 }
 0x5c0   : > { %4323 = vmatpush3.bf16.xpose.msra.mxu1 %v1554_v42  ;;  %4324 = vmatprep.mubr.msk.bf16.mxu1 %vm4787_vm1, %v4786_v3 }
 0x5c1   : > { %4334 = vmatprep.subr.bf16.mxu1 %v4786_v3 }
 0x5c2   : > { %v4648_v43 = vpop.eup %4647 }
 0x5c3   : > { %v1447_v44 = vmul.f32 %v4648_v43, %v4644_v34 }
 0x5c5   : > { %v1449_v46 = vpack.c.bf16 %v1447_v44, %v1447_v44 }
 0x5c7   : > { %4319 = vmatmul.mubr.msk.bf16.vlgmr.msra.gmra.mrb[20].mxu0 %vm1106_vm3, %v1449_v46  ;;  %4325 = vmatmul.mubr.msk.bf16.vlgmr.msra.gmra.mrb[12].mxu1 %vm1106_vm3, %v1547_v47 }
 0x5c8   : > { %4329 = vmatpush3.bf16.xpose.msra.mxu0 %v1604_v48  ;;  %4330 = vmatprep.mubr.msk.bf16.mxu0 %vm4787_vm1, %v4786_v3 }
 0x5c9   : > { %4340 = vmatprep.subr.bf16.mxu0 %v4786_v3  ;;  %4336 = vmatprep.mubr.msk.bf16.mxu1 %vm4787_vm1, %v4786_v3 }
 0x5cf   : > { %4331 = vmatmul.mubr.msk.bf16.vlgmr.msra.gmra.mrb[24].mxu0 %vm1106_vm3, %v1597_v49 }
 0x5d0   : > { %4342 = vmatprep.mubr.msk.bf16.mxu0 %vm4787_vm1, %v4786_v3 }
 0x692   : > { %v5147_v50 = vpop.f32.mrb[8].mxu1 }
 0x693   : > { %v4314_v51 = vpop.f32.mrb[9].mxu1 }
 0x694   : > { %v1495_v52 = vpop.f32.mrb[10].mxu1 }
 0x695   : > { %v4315_v53 = vpop.f32.mrb[11].mxu1 }
 0x69a   : > { %v5149_v54 = vpop.f32.mrb[20].mxu0  ;;  %v1590_v55 = vpop.f32.mrb[12].mxu1 }
 0x69b   : > { %v4606_v56 = vpack.i.bf16 %v5149_v54, %v5147_v50  ;;  %v1646_v57 = vmul.f32 0.35355338, %v1590_v55  ;;  %v4320_v58 = vpop.f32.mrb[21].mxu0  ;;  %v4326_v59 = vpop.f32.mrb[13].mxu1 }
 0x69c   : > { %v1543_v60 = vpop.f32.mrb[22].mxu0  ;;  %v1593_v62 = vpop.f32.mrb[14].mxu1 }
 0x69d   : > { %v4321_v63 = vpop.f32.mrb[23].mxu0  ;;  %v4327_v0 = vpop.f32.mrb[15].mxu1  ;;  %v1648_v2 = vsel %vm1106_vm3, %v1646_v57, -inf }
 0x69e   : > { %1649 = vmax.xlane.f32.xlu0 %v1648_v2 }
 0x6a2   : > { %v1640_v4 = vpop.f32.mrb[24].mxu0 }
 0x6a3   : > { %v1647_v7 = vmul.f32 0.35355338, %v1640_v4  ;;  %v4332_v8 = vpop.f32.mrb[25].mxu0 }
 0x6a4   : > { %v1643_v9 = vpop.f32.mrb[26].mxu0 }
 0x6a5   : > { %v4333_v10 = vpop.f32.mrb[27].mxu0  ;;  %v1651_v11 = vsel %vm1106_vm3, %v1647_v7, -inf }
 0x6a6   : > { %1652 = vmax.xlane.f32.xlu1 %v1651_v11 }
 0x6b7   : > { %1672 = vrot.lane.b32.xlu1 %v5065_v13, %s4795_s11 }
 0x6bb   : > { %1770 = vrot.lane.b32.xlu1 %v5065_v13, %s4796_s30 }
 0x6bf   : > { %1820 = vrot.lane.b32.xlu1 %v5068_v16, %s4796_s30  ;;  %s5655_s30 = sld [smem:[#allocation23_spill]] (!%p4116_p6) }
 0x6c3   : > { %1818 = vrot.lane.b32.xlu1 %v5068_v16, %s4797_s4 }
 0x72b   : > { %v1650_v12 = vpop.xlane.xlu0 %1649 }
 0x72c   : > { %v1654_v14 = vsub.f32 %v1646_v57, %v1650_v12 }
 0x72e   : > { %v1656_v15 = vmul.f32 1.442695, %v1654_v14 }
 0x730   : > { %4649 = vpow2.f32 %v1656_v15 }
 0x733   : > { %v1653_v17 = vpop.xlane.xlu1 %1652 }
 0x734   : > { %v1655_v18 = vsub.f32 %v1647_v7, %v1653_v17 }
 0x736   : > { %v1658_v19 = vmul.f32 1.442695, %v1655_v18 }
 0x737   : > { %v1673_v20 = vpop.permute.xlu1 %1672 }
 0x738   : > { %4651 = vpow2.f32 %v1658_v19  ;;  %v1678_v21 = vsel %vm1232_vm4, %v1673_v20, 0 }
 0x739   : > { %4335 = vmatpush3.bf16.msra.mxu1 %v1678_v21 }
 0x73a   : > { %v4650_v22 = vpop.eup %4649  ;;  %4346 = vmatprep.subr.bf16.mxu1 %v4786_v3 }
 0x73b   : > { %v1660_v23 = vsel %vm1106_vm3, %v4650_v22, 0.0  ;;  %v1771_v31 = vpop.permute.xlu1 %1770 }
 0x73c   : > { %1661 = vadd.xlane.f32.xlu0 %v1660_v23  ;;  %v1776_v34 = vsel %vm1106_vm3, %v1771_v31, 0 }
 0x73f   : > { %v1821_v37 = vpop.permute.xlu1 %1820 }
 0x740   : > { %v1826_v40 = vsel %vm1106_vm3, %v1821_v37, 0 }
 0x742   : > { %v4652_v24 = vpop.eup %4651 }
 0x743   : > { %v1663_v25 = vsel %vm1106_vm3, %v4652_v24, 0.0  ;;  %v1819_v41 = vpop.permute.xlu1 %1818 }
 0x744   : > { %1664 = vadd.xlane.f32.xlu0 %v1663_v25 }
 0x75a   : > { %1720 = vrot.lane.b32.xlu0 %v5068_v16, %s4795_s11  ;;  %s5648_s11 = scalar_lea.vmem %s5647_s1, %s4982_s5  ;;  %s4806_s1 = smov (!%p4116_p6), 120  }
 0x75b   : > { %s4815_s5 = smov (!%p4116_p6), 24  }
 0x75e   : > { %1768 = vrot.lane.b32.xlu0 %v5065_v13, %s4797_s4  ;;  %s4808_s4 = smov (!%p4116_p6), 88  }
 0x7c9   : > { %v1662_v26 = vpop.xlane.xlu0 %1661 }
 0x7ca   : > { %4653 = vrcp.f32 %v1662_v26  ;;  %v4623_v26 = vld [vmem:[%s4995_s27] sm:$0xff]  }
 0x7d1   : > { %v1665_v27 = vpop.xlane.xlu0 %1664 }
 0x7d2   : > { %4655 = vrcp.f32 %v1665_v27  ;;  %v4624_v27 = vld [vmem:[%s4995_s27 + $0x8] sm:$0xff]  }
 0x7d4   : > { %v4654_v28 = vpop.eup %4653 }
 0x7d5   : > { %v1667_v29 = vmul.f32 %v4654_v28, %v4650_v22  ;;  %v1721_v30 = vpop.permute.xlu0 %1720 }
 0x7d6   : > { %v1726_v32 = vsel %vm1232_vm4, %v1721_v30, 0 }
 0x7d7   : > { %4341 = vmatpush3.bf16.msra.mxu0 %v1726_v32  ;;  %v1670_v33 = vpack.c.bf16 %v1667_v29, %v1667_v29 }
 0x7d8   : > { %4352 = vmatprep.subr.bf16.mxu0 %v4786_v3 }
 0x7d9   : > { %4337 = vmatmul.mubr.msk.bf16.vlgmr.msra.gmra.mrb[16].mxu1 %vm1106_vm3, %v1670_v33  ;;  %v1769_v39 = vpop.permute.xlu0 %1768 }
 0x7da   : > { %4347 = vmatpush3.bf16.xpose.msra.mxu1 %v1776_v34  ;;  %4348 = vmatprep.mubr.msk.bf16.mxu1 %vm4787_vm1, %v4786_v3 }
 0x7db   : > { %4358 = vmatprep.subr.bf16.mxu1 %v4786_v3 }
 0x7dc   : > { %v4656_v35 = vpop.eup %4655 }
 0x7dd   : > { %v1669_v36 = vmul.f32 %v4656_v35, %v4652_v24 }
 0x7df   : > { %v1671_v38 = vpack.c.bf16 %v1669_v36, %v1669_v36 }
 0x7e1   : > { %4343 = vmatmul.mubr.msk.bf16.vlgmr.msra.gmra.mrb[28].mxu0 %vm1106_vm3, %v1671_v38  ;;  %4349 = vmatmul.mubr.msk.bf16.vlgmr.msra.gmra.mrb[20].mxu1 %vm1106_vm3, %v1769_v39 }
 0x7e2   : > { %4353 = vmatpush3.bf16.xpose.msra.mxu0 %v1826_v40  ;;  %4354 = vmatprep.mubr.msk.bf16.mxu0 %vm4787_vm1, %v4786_v3 }
 0x7e3   : > { %4364 = vmatprep.subr.bf16.mxu0 %v4786_v3  ;;  %4360 = vmatprep.mubr.msk.bf16.mxu1 %vm4787_vm1, %v4786_v3 }
 0x7e9   : > { %4355 = vmatmul.mubr.msk.bf16.vlgmr.msra.gmra.mrb[32].mxu0 %vm1106_vm3, %v1819_v41 }
 0x7ea   : > { %4366 = vmatprep.mubr.msk.bf16.mxu0 %vm4787_vm1, %v4786_v3 }
 0x8ac   : > { %v1714_v42 = vpop.f32.mrb[16].mxu1 }
 0x8ad   : > { %v4338_v43 = vpop.f32.mrb[17].mxu1 }
 0x8ae   : > { %v1717_v44 = vpop.f32.mrb[18].mxu1 }
 0x8af   : > { %v4339_v45 = vpop.f32.mrb[19].mxu1 }
 0x8b4   : > { %v1762_v46 = vpop.f32.mrb[28].mxu0  ;;  %v1812_v47 = vpop.f32.mrb[20].mxu1 }
 0x8b5   : > { %v4611_v48 = vpack.i.bf16 %v1762_v46, %v1714_v42  ;;  %v1868_v49 = vmul.f32 0.35355338, %v1812_v47  ;;  %v4344_v51 = vpop.f32.mrb[29].mxu0  ;;  %v4350_v52 = vpop.f32.mrb[21].mxu1 }
 0x8b6   : > { %v1765_v53 = vpop.f32.mrb[30].mxu0  ;;  %v1815_v55 = vpop.f32.mrb[22].mxu1 }
 0x8b7   : > { %v4345_v57 = vpop.f32.mrb[31].mxu0  ;;  %v4351_v58 = vpop.f32.mrb[23].mxu1  ;;  %v1870_v59 = vsel %vm1106_vm3, %v1868_v49, -inf }
 0x8b8   : > { %1871 = vmax.xlane.f32.xlu0 %v1870_v59 }
 0x8bc   : > { %v1862_v60 = vpop.f32.mrb[32].mxu0 }
 0x8bd   : > { %v1869_v62 = vmul.f32 0.35355338, %v1862_v60  ;;  %v4356_v63 = vpop.f32.mrb[33].mxu0 }
 0x8be   : > { %v1865_v0 = vpop.f32.mrb[34].mxu0 }
 0x8bf   : > { %v4357_v2 = vpop.f32.mrb[35].mxu0  ;;  %v1873_v4 = vsel %vm1106_vm3, %v1869_v62, -inf }
 0x8c0   : > { %1874 = vmax.xlane.f32.xlu1 %v1873_v4 }
 0x8d1   : > { %1894 = vrot.lane.b32.xlu1 %v5065_v13, %s4798_s26 }
 0x8d5   : > { %4607 = vrot.lane.b32.xlu1 %v4606_v56, %s4799_s24  ;;  %s4812_s24 = smov (!%p4116_p6), 72  }
 0x8d9   : > { %4612 = vrot.lane.b32.xlu1 %v4611_v48, %s4800_s17 }
 0x945   : > { %v1872_v7 = vpop.xlane.xlu0 %1871 }
 0x946   : > { %v1876_v8 = vsub.f32 %v1868_v49, %v1872_v7 }
 0x948   : > { %v1878_v9 = vmul.f32 1.442695, %v1876_v8 }
 0x94a   : > { %4657 = vpow2.f32 %v1878_v9 }
 0x94d   : > { %v1875_v10 = vpop.xlane.xlu1 %1874 }
 0x94e   : > { %v1877_v11 = vsub.f32 %v1869_v62, %v1875_v10 }
 0x950   : > { %v1880_v12 = vmul.f32 1.442695, %v1877_v11 }
 0x951   : > { %v1895_v14 = vpop.permute.xlu1 %1894 }
 0x952   : > { %4659 = vpow2.f32 %v1880_v12  ;;  %v1900_v15 = vsel %vm1232_vm4, %v1895_v14, 0 }
 0x953   : > { %4359 = vmatpush3.bf16.msra.mxu1 %v1900_v15 }
 0x954   : > { %v4658_v13 = vpop.eup %4657  ;;  %4370 = vmatprep.subr.bf16.mxu1 %v4786_v3 }
 0x955   : > { %v1882_v50 = vsel %vm1106_vm3, %v4658_v13, 0.0  ;;  %v4608_v37 = vpop.permute.xlu1 %4607 }
 0x956   : > { %1883 = vadd.xlane.f32.xlu0 %v1882_v50  ;;  %v4610_v39 = vunpack.i.h.bf16 %v4608_v37  ;;  %v4609_v40 = vunpack.i.l.bf16 %v4608_v37 }
 0x958   : > { %v2015_v44 = vsel %vm1106_vm3, %v5115_v1, %v4610_v39  ;;  %v2014_v45 = vsel %vm1106_vm3, %v5113_v61, %v4609_v40  ;;  %v4096_v61 = vld [vmem:[%s5644_s20] ss:$0 sm:$0xff] }
 0x959   : > { %v4613_v38 = vpop.permute.xlu1 %4612 }
 0x95a   : > { %v4615_v41 = vunpack.i.h.bf16 %v4613_v38  ;;  %v4614_v42 = vunpack.i.l.bf16 %v4613_v38 }
 0x95c   : > { %v4660_v54 = vpop.eup %4659  ;;  %v2017_v48 = vsel %vm2016_vm5, %v2014_v45, %v4614_v42  ;;  %v2018_v49 = vsel %vm2016_vm5, %v2015_v44, %v4615_v41 }
 0x95d   : > { %v1885_v56 = vsel %vm1106_vm3, %v4660_v54, 0.0 }
 0x95e   : > { %1886 = vadd.xlane.f32.xlu0 %v1885_v56 }
 0x974   : > { %1942 = vrot.lane.b32.xlu0 %v5068_v16, %s4798_s26  ;;  %s4809_s26 = smov (!%p4116_p6), 112  }
 0x9e3   : > { %v1884_v17 = vpop.xlane.xlu0 %1883 }
 0x9e4   : > { %4661 = vrcp.f32 %v1884_v17 }
 0x9eb   : > { %v1887_v18 = vpop.xlane.xlu0 %1886 }
 0x9ec   : > { %4663 = vrcp.f32 %v1887_v18 }
 0x9ee   : > { %v4662_v19 = vpop.eup %4661 }
 0x9ef   : > { %v1889_v20 = vmul.f32 %v4662_v19, %v4658_v13  ;;  %v1943_v21 = vpop.permute.xlu0 %1942  ;;  %v4626_v13 = vld [vmem:[%s5012_s2 + $0x8] sm:$0xff]  }
 0x9f0   : > { %v1948_v22 = vsel %vm1232_vm4, %v1943_v21, 0  ;;  %v4100_v21 = vld [vmem:[%s5646_s10] ss:$0 sm:$0xff]  ;;  %s5654_s10 = sld [smem:[#allocation25_spill]] (!%p4116_p6) }
 0x9f1   : > { %4365 = vmatpush3.bf16.msra.mxu0 %v1948_v22  ;;  %v1892_v23 = vpack.c.bf16 %v1889_v20, %v1889_v20 }
 0x9f2   : > { %4378 = vmatprep.subr.bf16.mxu0 %v4786_v3 }
 0x9f3   : > { %4361 = vmatmul.mubr.msk.bf16.vlgmr.msra.gmra.mrb[24].mxu1 %vm1106_vm3, %v1892_v23 }
 0x9f4   : > { %4374 = vmatprep.mubr.msk.bf16.mxu1 %vm4787_vm1, %v4786_v3  ;;  %4371 = vmatpush3.bf16.msra.mxu1 %v4623_v26 }
 0x9f5   : > { %4372 = vmatprep.subr.bf16.mxu1 %v4786_v3 }
 0x9f6   : > { %v4664_v16 = vpop.eup %4663 }
 0x9f7   : > { %v1891_v24 = vmul.f32 %v4664_v16, %v4660_v54 }
 0x9f8   : > { %4373 = vmatpush3.bf16.msra.mxu1 %v4624_v27 }
 0x9f9   : > { %v1893_v25 = vpack.c.bf16 %v1891_v24, %v1891_v24  ;;  %4386 = vmatprep.subr.bf16.mxu1 %v4786_v3 }
 0x9fb   : > { %4367 = vmatmul.mubr.msk.bf16.vlgmr.msra.gmra.mrb[36].mxu0 %vm1106_vm3, %v1893_v25  ;;  %v4101_v25 = vld [vmem:[%s5648_s11] ss:$0 sm:$0xff] }
 0x9fc   : > { %4382 = vmatprep.mubr.msk.bf16.mxu0 %vm4787_vm1, %v4786_v3 }
 0xac6   : > { %v1936_v28 = vpop.f32.mrb[24].mxu1 }
 0xac7   : > { %v4362_v29 = vpop.f32.mrb[25].mxu1 }
 0xac8   : > { %v1939_v30 = vpop.f32.mrb[26].mxu1 }
 0xac9   : > { %v4363_v31 = vpop.f32.mrb[27].mxu1  ;;  %v4627_v30 = vld [vmem:[%s5030_s29] sm:$0xff]  }
 0xaca   : > { %v4628_v31 = vld [vmem:[%s5030_s29 + $0x8] sm:$0xff]  }
 0xace   : > { %v1984_v32 = vpop.f32.mrb[36].mxu0 }
 0xacf   : > { %v4616_v33 = vpack.i.bf16 %v1984_v32, %v1936_v28  ;;  %v4368_v34 = vpop.f32.mrb[37].mxu0  ;;  %v4629_v32 = vld [vmem:[%s5030_s29 + $0x10] sm:$0xff]  }
 0xad0   : > { %v1987_v35 = vpop.f32.mrb[38].mxu0  ;;  %v4631_v34 = vld [vmem:[%s5030_s29 + $0x20] sm:$0xff]  }
 0xad1   : > { %4617 = vrot.lane.b32.xlu0 %v4616_v33, %s4801_s3  ;;  %v4369_v36 = vpop.f32.mrb[39].mxu0  ;;  %v4630_v33 = vld [vmem:[%s5030_s29 + $0x18] sm:$0xff]   ;;  %v4632_v35 = vld [vmem:[%s5030_s29 + $0x28] sm:$0xff]   ;;  %s4811_s29 = smov (!%p4116_p6), 104   ;;  %s4814_s3 = smov (!%p4116_p6), 16  }
 0xad2   : > { %v4102_v36 = vld [vmem:[%s1001_s18] ss:$0 sm:$0xff]  ;;  %s4810_s18 = smov (!%p4116_p6), 80  }
 0xb43   : > { %v4618_v43 = vpop.permute.xlu0 %4617 }
 0xb44   : > { %v4620_v46 = vunpack.i.h.bf16 %v4618_v43  ;;  %v4619_v47 = vunpack.i.l.bf16 %v4618_v43 }
 0xb46   : > { %v2021_v51 = vsel %vm2019_vm6, %v2018_v49, %v4620_v46  ;;  %v2020_v52 = vsel %vm2019_vm6, %v2017_v48, %v4619_v47 }
 0xb47   : > { %v2022_v53 = vpack.c.bf16 %v2021_v51, %v2020_v52 }
 0xb49   : > { %4375 = vmatmul.mubr.msk.bf16.vlgmr.msra.gmra.mrb[28].mxu1 %vm1053_vm2, %v2022_v53 }
 0xb4a   : > { %4398 = vmatprep.mubr.msk.bf16.mxu1 %vm4787_vm1, %v4786_v3  ;;  %4387 = vmatpush3.bf16.msra.mxu1 %v4627_v30 }
 0xb4b   : > { %4388 = vmatprep.subr.bf16.mxu1 %v4786_v3 }
 0xb4e   : > { %4389 = vmatpush3.bf16.msra.mxu1 %v4628_v31 }
 0xb4f   : > { %4390 = vmatprep.subr.bf16.mxu1 %v4786_v3 }
 0xb52   : > { %4391 = vmatpush3.bf16.msra.mxu1 %v4629_v32 }
 0xb53   : > { %4392 = vmatprep.subr.bf16.mxu1 %v4786_v3 }
 0xb56   : > { %4393 = vmatpush3.bf16.msra.mxu1 %v4630_v33  ;;  %v4106_v33 = vld [vmem:[%s1009_s25] ss:$0 sm:$0xff]  ;;  %s4813_s25 = smov (!%p4116_p6), 8  }
 0xb57   : > { %4394 = vmatprep.subr.bf16.mxu1 %v4786_v3 }
 0xb5a   : > { %4395 = vmatpush3.bf16.msra.mxu1 %v4631_v34 }
 0xb5b   : > { %4396 = vmatprep.subr.bf16.mxu1 %v4786_v3 }
 0xb5e   : > { %4397 = vmatpush3.bf16.msra.mxu1 %v4632_v35 }
 0xc1c   : > { %v2083_v1 = vpop.f32.mrb[28].mxu1 }
 0xc1d   : > { %v2084_v55 = vadd.f32 %v4096_v61, %v2083_v1  ;;  %v4376_v57 = vpop.f32.mrb[29].mxu1 }
 0xc1e   : > { %v2086_v58 = vpop.f32.mrb[30].mxu1 }
 0xc1f   : > { %v2087_v59 = vadd.f32 %v4096_v61, %v2086_v58  ;;  %v4377_v60 = vpop.f32.mrb[31].mxu1  ;;  %v2090_v62 = vadd.f32 %v2084_v55, %v5047_v5 }
 0xc21   : > { %v2094_v63 = vsel %vm1053_vm2, %v2090_v62, 0.0  ;;  %v2091_v0 = vadd.f32 %v2087_v59, %v5049_v6  ;;  %v4625_v6 = vld [vmem:[%s5012_s2] sm:$0xff]   ;;  %s5661_s2 = sld [smem:[#allocation30_spill]] (!%p4116_p6) }
 0xc22   : > { %2095 = vadd.xlane.f32.xlu1 %v2094_v63  ;;  %4379 = vmatpush3.bf16.msra.mxu0 %v4625_v6 }
 0xc23   : > { %v2097_v2 = vsel %vm1053_vm2, %v2091_v0, 0.0  ;;  %4380 = vmatprep.subr.bf16.mxu0 %v4786_v3 }
 0xc24   : > { %2098 = vadd.xlane.f32.xlu0 %v2097_v2 }
 0xc26   : > { %4381 = vmatpush3.bf16.msra.mxu0 %v4626_v13 }
 0xcaf   : > { %v2096_v4 = vpop.xlane.xlu1 %2095 }
 0xcb0   : > { %v2101_v7 = vmul.f32 0.03125, %v2096_v4 }
 0xcb1   : > { %v2099_v8 = vpop.xlane.xlu0 %2098 }
 0xcb2   : > { %v2103_v9 = vsub.f32 %v2090_v62, %v2101_v7  ;;  %v2102_v10 = vmul.f32 0.03125, %v2099_v8 }
 0xcb4   : > { %v2104_v11 = vsub.f32 %v2091_v0, %v2102_v10  ;;  %v2105_v12 = vmul.f32 %v2103_v9, %v2103_v9 }
 0xcb6   : > { %v2107_v14 = vsel %vm1053_vm2, %v2105_v12, 0.0  ;;  %v2106_v5 = vmul.f32 %v2104_v11, %v2104_v11 }
 0xcb7   : > { %2108 = vadd.xlane.f32.xlu0 %v2107_v14 }
 0xcb8   : > { %v2110_v15 = vsel %vm1053_vm2, %v2106_v5, 0.0 }
 0xcb9   : > { %2111 = vadd.xlane.f32.xlu1 %v2110_v15 }
 0xd44   : > { %v2109_v50 = vpop.xlane.xlu0 %2108 }
 0xd45   : > { %v2113_v54 = vmul.f32 0.03125, %v2109_v50 }
 0xd46   : > { %v2112_v56 = vpop.xlane.xlu1 %2111 }
 0xd47   : > { %v2115_v17 = vadd.f32 1e-05, %v2113_v54  ;;  %v2114_v18 = vmul.f32 0.03125, %v2112_v56 }
 0xd49   : > { %4665 = vrsqrt.f32 %v2115_v17  ;;  %v2116_v19 = vadd.f32 1e-05, %v2114_v18  ;;  %v4802_v18 = vmov -1.0  }
 0xd4b   : > { %4667 = vrsqrt.f32 %v2116_v19 }
 0xd53   : > { %v4666_v20 = vpop.eup %4665 }
 0xd54   : > { %v2119_v22 = vmul.f32 %v4666_v20, %v2103_v9 }
 0xd55   : > { %v4668_v23 = vpop.eup %4667 }
 0xd56   : > { %v2127_v16 = vmul.f32 %v4100_v21, %v2119_v22  ;;  %v2120_v24 = vmul.f32 %v4668_v23, %v2104_v11 }
 0xd58   : > { %v2128_v26 = vmul.f32 %v4100_v21, %v2120_v24  ;;  %v5242_v27 = vadd.f32 %v4101_v25, %v2127_v16 }
 0xd5a   : > { %v5244_v28 = vadd.f32 %v4101_v25, %v2128_v26 }
 0xd5c   : > { %v2137_v29 = vpack.c.bf16 %v5244_v28, %v5242_v27 }
 0xd5e   : > { %4383 = vmatmul.mubr.msk.bf16.vlgmr.msra.gmra.mrb[40].mxu0 %vm1053_vm2, %v2137_v29 }
 0xe31   : > { %v2198_v37 = vpop.f32.mrb[40].mxu0 }
 0xe32   : > { %v2199_v38 = vadd.f32 %v4102_v36, %v2198_v37  ;;  %v4384_v39 = vpop.f32.mrb[41].mxu0 }
 0xe33   : > { %v2201_v40 = vpop.f32.mrb[42].mxu0 }
 0xe34   : > { %v2207_v41 = vmul.f32 0.70710677, %v2199_v38  ;;  %v2202_v42 = vadd.f32 %v4102_v36, %v2201_v40  ;;  %v4385_v43 = vpop.f32.mrb[43].mxu0  ;;  %v2205_v25 = vmul.f32 0.5, %v2199_v38 }
 0xe36   : > { %v2213_v44 = vand.u32 2147483647, %v2207_v41  ;;  %v2208_v45 = vmul.f32 0.70710677, %v2202_v42  ;;  %vm2209_vm7 = vcmp.ge.f32.partialorder %v2207_v41, 0.0  ;;  %v2206_v26 = vmul.f32 0.5, %v2202_v42 }
 0xe37   : > { %v2211_v19 = vsel %vm2209_vm7, 1.0, %v4802_v18 }
 0xe38   : > { %v2215_v46 = vmul.f32 0.3275911, %v2213_v44  ;;  %v2214_v47 = vand.u32 2147483647, %v2208_v45  ;;  %v2241_v51 = vsub.f32 0.0, %v2213_v44  ;;  %vm2210_vm8 = vcmp.ge.f32.partialorder %v2208_v45, 0.0 }
 0xe39   : > { %v2212_v23 = vsel %vm2210_vm8, 1.0, %v4802_v18 }
 0xe3a   : > { %v2217_v48 = vadd.f32 1.0, %v2215_v46  ;;  %v2216_v3 = vmul.f32 0.3275911, %v2214_v47  ;;  %v2242_v52 = vsub.f32 0.0, %v2214_v47  ;;  %v2243_v61 = vmul.f32 %v2241_v51, %v2213_v44 }
 0xe3c   : > { %4669 = vrcp.f32 %v2217_v48  ;;  %v2218_v49 = vadd.f32 1.0, %v2216_v3  ;;  %v2244_v58 = vmul.f32 %v2242_v52, %v2214_v47  ;;  %v2245_v59 = vmul.f32 1.442695, %v2243_v61 }
 0xe3e   : > { %4671 = vrcp.f32 %v2218_v49  ;;  %v2247_v2 = vmul.f32 1.442695, %v2244_v58 }
 0xe3f   : > { %4673 = vpow2.f32 %v2245_v59  ;;  %v4114_v59 = vld [vmem:[%s1012_s19] ss:$0 sm:$0xff] }
 0xe40   : > { %4675 = vpow2.f32 %v2247_v2 }
 0xe46   : > { %v4670_v53 = vpop.eup %4669 }
 0xe47   : > { %v2223_v1 = vmul.f32 1.0614054, %v4670_v53 }
 0xe48   : > { %v4672_v55 = vpop.eup %4671 }
 0xe49   : > { %v2225_v57 = vadd.f32 -1.4531521, %v2223_v1  ;;  %v2224_v60 = vmul.f32 1.0614054, %v4672_v55  ;;  %v4674_v6 = vpop.eup %4673 }
 0xe4a   : > { %v4676_v56 = vpop.eup %4675 }
 0xe4b   : > { %v2227_v62 = vmul.f32 %v4670_v53, %v2225_v57  ;;  %v2226_v63 = vadd.f32 -1.4531521, %v2224_v60 }
 0xe4d   : > { %v2229_v0 = vadd.f32 1.4214138, %v2227_v62  ;;  %v2228_v4 = vmul.f32 %v4672_v55, %v2226_v63  ;;  %v4115_v63 = vld [vmem:[%s1015_s6] ss:$0 sm:$0xff] }
 0xe4f   : > { %v2231_v7 = vmul.f32 %v4670_v53, %v2229_v0  ;;  %v2230_v8 = vadd.f32 1.4214138, %v2228_v4 }
 0xe51   : > { %v2233_v9 = vadd.f32 -0.28449672, %v2231_v7  ;;  %v2232_v10 = vmul.f32 %v4672_v55, %v2230_v8 }
 0xe53   : > { %v2235_v11 = vmul.f32 %v4670_v53, %v2233_v9  ;;  %v2234_v12 = vadd.f32 -0.28449672, %v2232_v10  ;;  %v4681_v9 = vld [vmem:[%s5583_s15] sm:$0xff] (!%p4116_p6)   ;;  %v4803_v10 = vmov (!%p4116_p6), 0.0  }
 0xe54   : > { %4410 = vmatprep.subr.bf16.mxu1 (!%p4116_p6), %v4803_v10  ;;  %4402 = vmatprep.subr.bf16.mxu0 (!%p4116_p6), %v4803_v10 }
 0xe55   : > { %v2237_v14 = vadd.f32 0.2548296, %v2235_v11  ;;  %v2236_v5 = vmul.f32 %v4672_v55, %v2234_v12  ;;  %v4682_v11 = vld [vmem:[%s5583_s15 + $0x8] sm:$0xff] (!%p4116_p6)   ;;  %v4683_v12 = vld [vmem:[%s5581_s13] sm:$0xff] (!%p4116_p6)   ;;  %4406 = vmatprep.mubr.msk.bf16.mxu0 (!%p4116_p6), %vm4804_vm10, %v4803_v10 }
 0xe56   : > { %4403 = vmatpush3.bf16.msra.mxu0 (!%p4116_p6), %v4683_v12 }
 0xe57   : > { %v2239_v15 = vmul.f32 %v4670_v53, %v2237_v14  ;;  %v2238_v13 = vadd.f32 0.2548296, %v2236_v5  ;;  %4404 = vmatprep.subr.bf16.mxu0 (!%p4116_p6), %v4803_v10 }
 0xe59   : > { %v2249_v50 = vmul.f32 %v4674_v6, %v2239_v15  ;;  %v2240_v54 = vmul.f32 %v4672_v55, %v2238_v13  ;;  %v4684_v15 = vld [vmem:[%s5581_s13 + $0x8] sm:$0xff] (!%p4116_p6)  }
 0xe5a   : > { %4405 = vmatpush3.bf16.msra.mxu0 (!%p4116_p6), %v4684_v15 }
 0xe5b   : > { %v2251_v17 = vsub.f32 1.0, %v2249_v50  ;;  %v2250_v20 = vmul.f32 %v4676_v56, %v2240_v54  ;;  %4418 = vmatprep.subr.bf16.mxu0 (!%p4116_p6), %v4803_v10 }
 0xe5d   : > { %v2253_v21 = vmul.f32 %v2251_v17, %v2211_v19  ;;  %v2252_v22 = vsub.f32 1.0, %v2250_v20 }
 0xe5f   : > { %v2255_v16 = vadd.f32 1.0, %v2253_v21  ;;  %v2254_v24 = vmul.f32 %v2252_v22, %v2212_v23 }
 0xe61   : > { %v2256_v29 = vadd.f32 1.0, %v2254_v24  ;;  %v2257_v30 = vmul.f32 %v2255_v16, %v2205_v25 }
 0xe63   : > { %v2258_v31 = vmul.f32 %v2256_v29, %v2206_v26 }
 0xe65   : > { %v2259_v32 = vpack.c.bf16 %v2258_v31, %v2257_v30 }
 0xe67   : > { %4399 = vmatmul.mubr.msk.bf16.vlgmr.msra.gmra.mrb[32].mxu1 %vm2315_vm9, %v2259_v32 }
 0xe68   : > { %4411 = vmatpush3.bf16.msra.mxu1 (!%p4116_p6), %v4681_v9  ;;  %4414 = vmatprep.mubr.msk.bf16.mxu1 (!%p4116_p6), %vm4804_vm10, %v4803_v10 }
 0xe69   : > { %4412 = vmatprep.subr.bf16.mxu1 (!%p4116_p6), %v4803_v10 }
 0xe6c   : > { %4413 = vmatpush3.bf16.msra.mxu1 (!%p4116_p6), %v4682_v11 }
 0xe6d   : > { %4424 = vmatprep.subr.bf16.mxu1 (!%p4116_p6), %v4803_v10 }
 0xf3a   : > { %v2353_v34 = vpop.f32.mrb[32].mxu1 }
 0xf3b   : > { %v2354_v35 = vadd.f32 %v4106_v33, %v2353_v34  ;;  %v4400_v36 = vpop.f32.mrb[33].mxu1  ;;  %v4121_v34 = vld [vmem:[%s5584_s16] ss:$0 sm:$0xff] (!%p4116_p6) }
 0xf3c   : > { %v2356_v37 = vpop.f32.mrb[34].mxu1 }
 0xf3d   : > { %v2357_v39 = vadd.f32 %v4106_v33, %v2356_v37  ;;  %v4401_v40 = vpop.f32.mrb[35].mxu1  ;;  %v2360_v38 = vadd.f32 %v2354_v35, %v5242_v27 }
 0xf3f   : > { %v2364_v41 = vsel %vm1053_vm2, %v2360_v38, 0.0  ;;  %v2361_v42 = vadd.f32 %v2357_v39, %v5244_v28 }
 0xf40   : > { %2365 = vadd.xlane.f32.xlu0 %v2364_v41 }
 0xf41   : > { %v2367_v43 = vsel %vm1053_vm2, %v2361_v42, 0.0 }
 0xf42   : > { %2368 = vadd.xlane.f32.xlu1 %v2367_v43 }
 0xfcd   : > { %v2366_v44 = vpop.xlane.xlu0 %2365 }
 0xfce   : > { %v2370_v45 = vmul.f32 0.03125, %v2366_v44 }
 0xfcf   : > { %v2369_v46 = vpop.xlane.xlu1 %2368 }
 0xfd0   : > { %v2372_v47 = vsub.f32 %v2360_v38, %v2370_v45  ;;  %v2371_v48 = vmul.f32 0.03125, %v2369_v46  ;;  %v4807_v45 = vmov (!%p4116_p6), 1966171168  }
 0xfd1   : > { %v2575_v46 = vunpack.c.l.s4 (!%p4116_p6), %v4807_v45 }
 0xfd2   : > { %v2373_v3 = vsub.f32 %v2361_v42, %v2371_v48  ;;  %v2374_v49 = vmul.f32 %v2372_v47, %v2372_v47 }
 0xfd3   : > { %v2576_v48 = vunpack.c.0.s8 (!%p4116_p6), %v2575_v46 }
 0xfd4   : > { %v2376_v51 = vsel %vm1053_vm2, %v2374_v49, 0.0  ;;  %v2375_v52 = vmul.f32 %v2373_v3, %v2373_v3  ;;  %v4117_v49 = vld [vmem:[%s5582_s14] ss:$0 sm:$0xff] (!%p4116_p6) }
 0xfd5   : > { %2377 = vadd.xlane.f32.xlu0 %v2376_v51 }
 0xfd6   : > { %v2379_v27 = vsel %vm1053_vm2, %v2375_v52, 0.0 }
 0xfd7   : > { %2380 = vadd.xlane.f32.xlu1 %v2379_v27 }
0x1062   : > { %v2378_v28 = vpop.xlane.xlu0 %2377 }
0x1063   : > { %v2382_v53 = vmul.f32 0.03125, %v2378_v28 }
0x1064   : > { %v2381_v61 = vpop.xlane.xlu1 %2380 }
0x1065   : > { %v2384_v1 = vadd.f32 1e-05, %v2382_v53  ;;  %v2383_v55 = vmul.f32 0.03125, %v2381_v61 }
0x1067   : > { %4677 = vrsqrt.f32 %v2384_v1  ;;  %v2385_v57 = vadd.f32 1e-05, %v2383_v55 }
0x1069   : > { %4679 = vrsqrt.f32 %v2385_v57 }
0x1071   : > { %v4678_v58 = vpop.eup %4677 }
0x1072   : > { %v2388_v60 = vmul.f32 %v4678_v58, %v2372_v47  ;;  %v2577_v47 = vlaneseq (!%p4116_p6) }
0x1073   : > { %v4680_v62 = vpop.eup %4679 }
0x1074   : > { %v2396_v0 = vmul.f32 %v4114_v59, %v2388_v60  ;;  %v2389_v2 = vmul.f32 %v4680_v62, %v2373_v3  ;;  %2411 = sbr.rel (%p4116_p6) target bundleno = 8227 (0x2023), region = 136  ;;  %v2578_v3 = vshrl.u32 (!%p4116_p6), %v2577_v47, 7 }
0x1076   : > { %v2404_v4 = vadd.f32 %v4115_v63, %v2396_v0  ;;  %v2397_v7 = vmul.f32 %v4114_v59, %v2389_v2  ;;  %v5340_v27 = vsub.s32 (!%p4116_p6), %v2576_v48, %v2578_v3  ;;  %v2599_v58 = vsub.s32 (!%p4116_p6), 0, %v2578_v3 }
0x1078   : > { %2406 = vst.msk [vmem:[#allocation2] sm:$0xff] %vm1053_vm2, %v2404_v4  ;;  %v2405_v8 = vadd.f32 %v4115_v63, %v2397_v7  ;;  %v2412_v14 = vsel (!%p4116_p6), %vm1053_vm2, %v2404_v4, 0.0 }
0x1079   : > { %v2413_v5 = vrot.slane (!%p4116_p6), %v2412_v14, 4 }
0x107a   : > { %2407 = vst.msk [vmem:[#allocation2 + $0x8] sm:$0xff] %vm1053_vm2, %v2405_v8  ;;  %v2419_v6 = vsel (!%p4116_p6), %vm1053_vm2, %v2405_v8, 0.0  ;;  %v2504_v13 = vpack.c.bf16 (!%p4116_p6), %v2405_v8, %v2404_v4 }
0x107b   : > { %v2414_v50 = vadd.f32 %v2413_v5, %v2412_v14  ;;  %v2420_v54 = vrot.slane %v2419_v6, 4 }
0x107c   : > { %4415 = vmatmul.mubr.msk.bf16.vlgmr.msra.gmra.mrb[0].mxu1 %vm1053_vm2, %v2504_v13 }
0x107d   : > { %v2415_v56 = vrot.slane %v2414_v50, 2  ;;  %v2421_v17 = vadd.f32 %v2420_v54, %v2419_v6  ;;  %4426 = vmatprep.mubr.msk.bf16.mxu1 %vm4804_vm10, %v4803_v10 }
0x107f   : > { %v2416_v18 = vadd.f32 %v2415_v56, %v2414_v50  ;;  %v2422_v19 = vrot.slane %v2421_v17, 2 }
0x1081   : > { %v2417_v20 = vrot.slane %v2416_v18, 1  ;;  %v2423_v21 = vadd.f32 %v2422_v19, %v2421_v17 }
0x1083   : > { %v2418_v22 = vadd.f32 %v2417_v20, %v2416_v18  ;;  %v2424_v23 = vrot.slane %v2423_v21, 1 }
0x1085   : > { %v2425_v16 = vadd.f32 %v2424_v23, %v2423_v21  ;;  %v2427_v24 = vmul.f32 0.125, %v2418_v22 }
0x1087   : > { %v2428_v25 = vmul.f32 0.125, %v2425_v16  ;;  %v2429_v26 = vpack.c.bf16 %v2427_v24, %v2427_v24 }
0x1089   : > { %v2430_v29 = vpack.c.bf16 %v2428_v25, %v2428_v25  ;;  %v2444_v30 = vunpack.c.l.b16 %v2429_v26 }
0x108b   : > { %v2445_v31 = vunpack.c.l.b16 %v2430_v29 }
0x108d   : > { %v2447_v32 = vsel %vm2446_vm11, %v2445_v31, %v2444_v30 }
0x108e   : > { %v2448_v33 = vpack.c.b16 %v2447_v32, %v2447_v32 }
0x1090   : > { %4407 = vmatmul.mubr.msk.bf16.vlgmr.msra.gmra.mrb[0].mxu0 %vm1053_vm2, %v2448_v33 }
0x1091   : > { %4420 = vmatprep.mubr.msk.bf16.mxu0 %vm4804_vm10, %v4803_v10 }
0x114f   : > { %v2565_v35 = vpop.f32.mrb[0].mxu1 }
0x1150   : > { %v2566_v36 = vadd.f32 %v4121_v34, %v2565_v35  ;;  %v4416_v37 = vpop.f32.mrb[1].mxu1 }
0x1151   : > { %v2568_v39 = vpop.f32.mrb[2].mxu1 }
0x1152   : > { %v5323_v40 = vpack.c.bf16 %v2566_v36, %v2566_v36  ;;  %v2569_v38 = vadd.f32 %v4121_v34, %v2568_v39  ;;  %v4417_v41 = vpop.f32.mrb[3].mxu1 }
0x1154   : > { %v5325_v42 = vpack.c.bf16 %v2569_v38, %v2569_v38  ;;  %2725 = vrot.lane.b32.xlu1 %v5323_v40, %s4805_s28  ;;  %v2605_v43 = vsel %vm1106_vm3, %v5323_v40, 0 }
0x1155   : > { %4419 = vmatpush3.bf16.xpose.msra.mxu0 %v2605_v43 }
0x1156   : > { %v2656_v44 = vsel %vm1106_vm3, %v5325_v42, 0  ;;  %4430 = vmatprep.subr.bf16.mxu0 %v4803_v10 }
0x1157   : > { %4425 = vmatpush3.bf16.xpose.msra.mxu1 %v2656_v44 }
0x1158   : > { %2873 = vrot.lane.b32.xlu1 %v5325_v42, %s4806_s1  ;;  %4436 = vmatprep.subr.bf16.mxu1 %v4803_v10 }
0x1163   : > { %v2498_v51 = vpop.f32.mrb[0].mxu0 }
0x1164   : > { %v2499_v52 = vadd.f32 %v4117_v49, %v2498_v51  ;;  %v4408_v28 = vpop.f32.mrb[1].mxu0 }
0x1165   : > { %v2501_v53 = vpop.f32.mrb[2].mxu0 }
0x1166   : > { %v2572_v61 = vpack.c.bf16 %v2499_v52, %v2499_v52  ;;  %v4409_v1 = vpop.f32.mrb[3].mxu0 }
0x1168   : > { %v2580_v55 = vrot.slane %v2572_v61, %v5340_v27 }
0x116a   : > { %v2587_v57 = vrot.slane %v2580_v55, %v5340_v27 }
0x116c   : > { %v2589_v59 = vunpack.i.h.s16 %v2587_v57  ;;  %v4127_v60 = vpack.i.b16 %v2587_v57, %v2587_v57 }
0x116e   : > { %v2647_v62 = vpack.i.b16 %v2589_v59, %v2589_v59  ;;  %v5344_v63 = vrot.slane %v4127_v60, %v2599_v58 }
0x1170   : > { %4421 = vmatmul.mubr.msk.bf16.vlgmr.msra.gmra.mrb[4].mxu0 %vm1106_vm3, %v5344_v63  ;;  %v5348_v0 = vrot.slane %v2647_v62, %v2599_v58 }
0x1171   : > { %4432 = vmatprep.mubr.msk.bf16.mxu0 %vm4804_vm10, %v4803_v10 }
0x1172   : > { %4427 = vmatmul.mubr.msk.bf16.vlgmr.msra.gmra.mrb[4].mxu1 %vm1106_vm3, %v5348_v0 }
0x1173   : > { %4438 = vmatprep.mubr.msk.bf16.mxu1 %vm4804_vm10, %v4803_v10 }
0x11c6   : > { %v2726_v2 = vpop.permute.xlu1 %2725 }
0x11c7   : > { %v2731_v4 = vsel %vm1232_vm4, %v2726_v2, 0 }
0x11c8   : > { %4431 = vmatpush3.bf16.msra.mxu0 %v2731_v4 }
0x11c9   : > { %4442 = vmatprep.subr.bf16.mxu0 %v4803_v10 }
0x11ca   : > { %v2874_v29 = vpop.permute.xlu1 %2873 }
0x11cb   : > { %v2879_v41 = vsel %vm1106_vm3, %v2874_v29, 0 }
0x1243   : > { %v2641_v7 = vpop.f32.mrb[4].mxu0 }
0x1244   : > { %v4422_v8 = vpop.f32.mrb[5].mxu0  ;;  %v2698_v6 = vmul.f32 0.35355338, %v2641_v7 }
0x1245   : > { %v2644_v9 = vpop.f32.mrb[6].mxu0  ;;  %v2692_v11 = vpop.f32.mrb[4].mxu1 }
0x1246   : > { %v2699_v12 = vmul.f32 0.35355338, %v2692_v11  ;;  %v4423_v14 = vpop.f32.mrb[7].mxu0  ;;  %v4428_v5 = vpop.f32.mrb[5].mxu1  ;;  %v2701_v54 = vsel %vm2700_vm12, %v2698_v6, -inf }
0x1247   : > { %v2695_v15 = vpop.f32.mrb[6].mxu1 }
0x1248   : > { %v4429_v13 = vpop.f32.mrb[7].mxu1  ;;  %v2704_v50 = vsel %vm2700_vm12, %v2699_v12, -inf }
0x1249   : > { %2705 = vmax.xlane.f32.xlu0 %v2704_v50 }
0x124d   : > { %2702 = vmax.xlane.f32.xlu0 %v2701_v54 }
0x1263   : > { %2773 = vrot.lane.b32.xlu0 %v5325_v42, %s4805_s28 }
0x1267   : > { %2871 = vrot.lane.b32.xlu0 %v5348_v0, %s4806_s1 }
0x12d6   : > { %v2706_v56 = vpop.xlane.xlu0 %2705 }
0x12d7   : > { %v2708_v17 = vsub.f32 %v2699_v12, %v2706_v56 }
0x12d9   : > { %v2711_v20 = vmul.f32 1.442695, %v2708_v17 }
0x12da   : > { %v2703_v18 = vpop.xlane.xlu0 %2702 }
0x12db   : > { %v2707_v19 = vsub.f32 %v2698_v6, %v2703_v18 }
0x12dd   : > { %v2709_v21 = vmul.f32 1.442695, %v2707_v19 }
0x12de   : > { %v2774_v22 = vpop.permute.xlu0 %2773 }
0x12df   : > { %4690 = vpow2.f32 %v2709_v21  ;;  %v2779_v23 = vsel %vm1232_vm4, %v2774_v22, 0 }
0x12e0   : > { %4437 = vmatpush3.bf16.msra.mxu1 %v2779_v23  ;;  %4692 = vpow2.f32 %v2711_v20 }
0x12e1   : > { %4448 = vmatprep.subr.bf16.mxu1 %v4803_v10 }
0x12e2   : > { %v2872_v44 = vpop.permute.xlu0 %2871 }
0x12e9   : > { %v4691_v16 = vpop.eup %4690 }
0x12ea   : > { %v2713_v24 = vsel %vm2700_vm12, %v4691_v16, 0.0  ;;  %v4693_v25 = vpop.eup %4692 }
0x12eb   : > { %2714 = vadd.xlane.f32.xlu1 %v2713_v24  ;;  %v2716_v26 = vsel %vm2700_vm12, %v4693_v25, 0.0 }
0x12ef   : > { %2717 = vadd.xlane.f32.xlu1 %v2716_v26 }
0x1300   : > { %2823 = vrot.lane.b32.xlu1 %v5323_v40, %s4806_s1 }
0x1304   : > { %2821 = vrot.lane.b32.xlu1 %v5344_v63, %s4806_s1 }
0x1378   : > { %v2715_v30 = vpop.xlane.xlu1 %2714 }
0x1379   : > { %4694 = vrcp.f32 %v2715_v30 }
0x137c   : > { %v2718_v31 = vpop.xlane.xlu1 %2717 }
0x137d   : > { %4696 = vrcp.f32 %v2718_v31 }
0x1380   : > { %v2824_v34 = vpop.permute.xlu1 %2823 }
0x1381   : > { %v2829_v37 = vsel %vm1106_vm3, %v2824_v34, 0 }
0x1383   : > { %v4695_v32 = vpop.eup %4694 }
0x1384   : > { %v2720_v33 = vmul.f32 %v4695_v32, %v4691_v16  ;;  %v2822_v43 = vpop.permute.xlu1 %2821 }
0x1386   : > { %v2723_v35 = vpack.c.bf16 %v2720_v33, %v2720_v33 }
0x1387   : > { %v4697_v36 = vpop.eup %4696 }
0x1388   : > { %4433 = vmatmul.mubr.msk.bf16.vlgmr.msra.gmra.mrb[8].mxu0 %vm1106_vm3, %v2723_v35  ;;  %v2722_v39 = vmul.f32 %v4697_v36, %v4693_v25 }
0x1389   : > { %4443 = vmatpush3.bf16.xpose.msra.mxu0 %v2829_v37  ;;  %4444 = vmatprep.mubr.msk.bf16.mxu0 %vm4804_vm10, %v4803_v10 }
0x138a   : > { %v2724_v38 = vpack.c.bf16 %v2722_v39, %v2722_v39  ;;  %4454 = vmatprep.subr.bf16.mxu0 %v4803_v10 }
0x138c   : > { %4439 = vmatmul.mubr.msk.bf16.vlgmr.msra.gmra.mrb[8].mxu1 %vm1106_vm3, %v2724_v38 }
0x138d   : > { %4449 = vmatpush3.bf16.xpose.msra.mxu1 %v2879_v41  ;;  %4450 = vmatprep.mubr.msk.bf16.mxu1 %vm4804_vm10, %v4803_v10 }
0x138e   : > { %4460 = vmatprep.subr.bf16.mxu1 %v4803_v10 }
0x1390   : > { %4445 = vmatmul.mubr.msk.bf16.vlgmr.msra.gmra.mrb[12].mxu0 %vm1106_vm3, %v2822_v43 }
0x1391   : > { %4456 = vmatprep.mubr.msk.bf16.mxu0 %vm4804_vm10, %v4803_v10 }
0x1394   : > { %4451 = vmatmul.mubr.msk.bf16.vlgmr.msra.gmra.mrb[12].mxu1 %vm1106_vm3, %v2872_v44 }
0x1395   : > { %4462 = vmatprep.mubr.msk.bf16.mxu1 %vm4804_vm10, %v4803_v10 }
0x145b   : > { %v2767_v45 = vpop.f32.mrb[8].mxu0 }
0x145c   : > { %v4434_v46 = vpop.f32.mrb[9].mxu0 }
0x145d   : > { %v2770_v47 = vpop.f32.mrb[10].mxu0 }
0x145e   : > { %v4435_v48 = vpop.f32.mrb[11].mxu0 }
0x145f   : > { %v2815_v3 = vpop.f32.mrb[8].mxu1 }
0x1460   : > { %v3489_v49 = vrot.slane %v2815_v3, 7  ;;  %v4440_v51 = vpop.f32.mrb[9].mxu1 }
0x1461   : > { %v2818_v52 = vpop.f32.mrb[10].mxu1 }
0x1462   : > { %v4441_v28 = vpop.f32.mrb[11].mxu1  ;;  %v5389_v53 = vsel %vm2446_vm11, %v3489_v49, %v2767_v45 }
0x1463   : > { %v2865_v61 = vpop.f32.mrb[12].mxu0 }
0x1464   : > { %v2921_v1 = vmul.f32 0.35355338, %v2865_v61  ;;  %v4446_v55 = vpop.f32.mrb[13].mxu0 }
0x1465   : > { %v2868_v57 = vpop.f32.mrb[14].mxu0 }
0x1466   : > { %v4447_v58 = vpop.f32.mrb[15].mxu0  ;;  %v2923_v59 = vsel %vm2700_vm12, %v2921_v1, -inf }
0x1467   : > { %v2915_v60 = vpop.f32.mrb[12].mxu1  ;;  %2924 = vmax.xlane.f32.xlu1 %v2923_v59 }
0x1468   : > { %v2922_v62 = vmul.f32 0.35355338, %v2915_v60  ;;  %v4452_v2 = vpop.f32.mrb[13].mxu1 }
0x1469   : > { %v2918_v4 = vpop.f32.mrb[14].mxu1 }
0x146a   : > { %v4453_v7 = vpop.f32.mrb[15].mxu1  ;;  %v2926_v8 = vsel %vm2700_vm12, %v2922_v62, -inf }
0x146b   : > { %2927 = vmax.xlane.f32.xlu0 %v2926_v8 }
0x1478   : > { %2947 = vrot.lane.b32.xlu1 %v5323_v40, %s4808_s4 }
0x147c   : > { %3095 = vrot.lane.b32.xlu1 %v5325_v42, %s4809_s26 }
0x1480   : > { %3045 = vrot.lane.b32.xlu1 %v5323_v40, %s4809_s26 }
0x1484   : > { %3043 = vrot.lane.b32.xlu1 %v5344_v63, %s4809_s26 }
0x14f4   : > { %v2925_v9 = vpop.xlane.xlu1 %2924 }
0x14f5   : > { %v2929_v11 = vsub.f32 %v2921_v1, %v2925_v9 }
0x14f7   : > { %v2931_v12 = vmul.f32 1.442695, %v2929_v11 }
0x14f8   : > { %v2928_v14 = vpop.xlane.xlu0 %2927  ;;  %v2948_v5 = vpop.permute.xlu1 %2947 }
0x14f9   : > { %4698 = vpow2.f32 %v2931_v12  ;;  %v2930_v15 = vsub.f32 %v2922_v62, %v2928_v14  ;;  %v2953_v6 = vsel %vm1232_vm4, %v2948_v5, 0 }
0x14fa   : > { %4455 = vmatpush3.bf16.msra.mxu0 %v2953_v6 }
0x14fb   : > { %v2933_v13 = vmul.f32 1.442695, %v2930_v15  ;;  %4466 = vmatprep.subr.bf16.mxu0 %v4803_v10 }
0x14fc   : > { %v3096_v20 = vpop.permute.xlu1 %3095 }
0x14fd   : > { %4700 = vpow2.f32 %v2933_v13  ;;  %v3101_v32 = vsel %vm1106_vm3, %v3096_v20, 0 }
0x1500   : > { %v3046_v24 = vpop.permute.xlu1 %3045 }
0x1501   : > { %v3051_v29 = vsel %vm1106_vm3, %v3046_v24, 0 }
0x1503   : > { %v4699_v50 = vpop.eup %4698 }
0x1504   : > { %v2935_v54 = vsel %vm2700_vm12, %v4699_v50, 0.0  ;;  %v3044_v33 = vpop.permute.xlu1 %3043 }
0x1505   : > { %2936 = vadd.xlane.f32.xlu0 %v2935_v54 }
0x1507   : > { %v4701_v56 = vpop.eup %4700 }
0x1508   : > { %v2938_v17 = vsel %vm2700_vm12, %v4701_v56, 0.0 }
0x1509   : > { %2939 = vadd.xlane.f32.xlu0 %v2938_v17 }
0x151f   : > { %2995 = vrot.lane.b32.xlu0 %v5325_v42, %s4808_s4 }
0x1523   : > { %3093 = vrot.lane.b32.xlu0 %v5348_v0, %s4809_s26 }
0x1592   : > { %v2937_v18 = vpop.xlane.xlu0 %2936 }
0x1593   : > { %4702 = vrcp.f32 %v2937_v18 }
0x1596   : > { %v2940_v19 = vpop.xlane.xlu0 %2939 }
0x1597   : > { %4704 = vrcp.f32 %v2940_v19 }
0x159a   : > { %v2996_v21 = vpop.permute.xlu0 %2995 }
0x159b   : > { %v3001_v22 = vsel %vm1232_vm4, %v2996_v21, 0 }
0x159c   : > { %4461 = vmatpush3.bf16.msra.mxu1 %v3001_v22 }
0x159d   : > { %v4703_v23 = vpop.eup %4702  ;;  %4472 = vmatprep.subr.bf16.mxu1 %v4803_v10 }
0x159e   : > { %v2942_v16 = vmul.f32 %v4703_v23, %v4699_v50  ;;  %v3094_v34 = vpop.permute.xlu0 %3093 }
0x15a0   : > { %v2945_v25 = vpack.c.bf16 %v2942_v16, %v2942_v16 }
0x15a1   : > { %v4705_v26 = vpop.eup %4704 }
0x15a2   : > { %4457 = vmatmul.mubr.msk.bf16.vlgmr.msra.gmra.mrb[16].mxu0 %vm1106_vm3, %v2945_v25  ;;  %v2944_v30 = vmul.f32 %v4705_v26, %v4701_v56 }
0x15a3   : > { %4467 = vmatpush3.bf16.xpose.msra.mxu0 %v3051_v29  ;;  %4468 = vmatprep.mubr.msk.bf16.mxu0 %vm4804_vm10, %v4803_v10 }
0x15a4   : > { %v2946_v31 = vpack.c.bf16 %v2944_v30, %v2944_v30  ;;  %4478 = vmatprep.subr.bf16.mxu0 %v4803_v10 }
0x15a6   : > { %4463 = vmatmul.mubr.msk.bf16.vlgmr.msra.gmra.mrb[16].mxu1 %vm1106_vm3, %v2946_v31 }
0x15a7   : > { %4473 = vmatpush3.bf16.xpose.msra.mxu1 %v3101_v32  ;;  %4474 = vmatprep.mubr.msk.bf16.mxu1 %vm4804_vm10, %v4803_v10 }
0x15a8   : > { %4484 = vmatprep.subr.bf16.mxu1 %v4803_v10 }
0x15aa   : > { %4469 = vmatmul.mubr.msk.bf16.vlgmr.msra.gmra.mrb[20].mxu0 %vm1106_vm3, %v3044_v33 }
0x15ab   : > { %4480 = vmatprep.mubr.msk.bf16.mxu0 %vm4804_vm10, %v4803_v10 }
0x15ae   : > { %4475 = vmatmul.mubr.msk.bf16.vlgmr.msra.gmra.mrb[20].mxu1 %vm1106_vm3, %v3094_v34 }
0x15af   : > { %4486 = vmatprep.mubr.msk.bf16.mxu1 %vm4804_vm10, %v4803_v10 }
0x1675   : > { %v2989_v35 = vpop.f32.mrb[16].mxu0 }
0x1676   : > { %v4458_v36 = vpop.f32.mrb[17].mxu0 }
0x1677   : > { %v2992_v37 = vpop.f32.mrb[18].mxu0 }
0x1678   : > { %v4459_v39 = vpop.f32.mrb[19].mxu0 }
0x1679   : > { %v3037_v38 = vpop.f32.mrb[16].mxu1 }
0x167a   : > { %v3494_v41 = vrot.slane %v3037_v38, 7  ;;  %v4464_v43 = vpop.f32.mrb[17].mxu1 }
0x167b   : > { %v3040_v44 = vpop.f32.mrb[18].mxu1 }
0x167c   : > { %v4465_v45 = vpop.f32.mrb[19].mxu1  ;;  %v5422_v46 = vsel %vm2446_vm11, %v3494_v41, %v2989_v35 }
0x167d   : > { %v3087_v47 = vpop.f32.mrb[20].mxu0 }
0x167e   : > { %v3143_v48 = vmul.f32 0.35355338, %v3087_v47  ;;  %v4470_v3 = vpop.f32.mrb[21].mxu0 }
0x167f   : > { %v3090_v49 = vpop.f32.mrb[22].mxu0 }
0x1680   : > { %v4471_v51 = vpop.f32.mrb[23].mxu0  ;;  %v3145_v52 = vsel %vm2700_vm12, %v3143_v48, -inf }
0x1681   : > { %v3137_v28 = vpop.f32.mrb[20].mxu1  ;;  %3146 = vmax.xlane.f32.xlu1 %v3145_v52 }
0x1682   : > { %v3144_v61 = vmul.f32 0.35355338, %v3137_v28  ;;  %v4476_v1 = vpop.f32.mrb[21].mxu1 }
0x1683   : > { %v3140_v55 = vpop.f32.mrb[22].mxu1 }
0x1684   : > { %v4477_v57 = vpop.f32.mrb[23].mxu1  ;;  %v3148_v58 = vsel %vm2700_vm12, %v3144_v61, -inf }
0x1685   : > { %3149 = vmax.xlane.f32.xlu0 %v3148_v58 }
0x1692   : > { %3169 = vrot.lane.b32.xlu1 %v5323_v40, %s4810_s18 }
0x1696   : > { %3317 = vrot.lane.b32.xlu1 %v5325_v42, %s4811_s29 }
0x169a   : > { %3267 = vrot.lane.b32.xlu1 %v5323_v40, %s4811_s29 }
0x169e   : > { %3265 = vrot.lane.b32.xlu1 %v5344_v63, %s4811_s29 }
0x170e   : > { %v3147_v59 = vpop.xlane.xlu1 %3146 }
0x170f   : > { %v3151_v60 = vsub.f32 %v3143_v48, %v3147_v59 }
0x1711   : > { %v3153_v62 = vmul.f32 1.442695, %v3151_v60 }
0x1712   : > { %v3150_v2 = vpop.xlane.xlu0 %3149  ;;  %v3170_v4 = vpop.permute.xlu1 %3169 }
0x1713   : > { %4706 = vpow2.f32 %v3153_v62  ;;  %v3152_v7 = vsub.f32 %v3144_v61, %v3150_v2  ;;  %v3175_v8 = vsel %vm1232_vm4, %v3170_v4, 0 }
0x1714   : > { %4479 = vmatpush3.bf16.msra.mxu0 %v3175_v8 }
0x1715   : > { %v3155_v9 = vmul.f32 1.442695, %v3152_v7  ;;  %4490 = vmatprep.subr.bf16.mxu0 %v4803_v10 }
0x1716   : > { %v3318_v6 = vpop.permute.xlu1 %3317 }
0x1717   : > { %4708 = vpow2.f32 %v3155_v9  ;;  %v3323_v22 = vsel %vm1106_vm3, %v3318_v6, 0 }
0x171a   : > { %v3268_v17 = vpop.permute.xlu1 %3267 }
0x171b   : > { %v3273_v20 = vsel %vm1106_vm3, %v3268_v17, 0 }
0x171d   : > { %v4707_v11 = vpop.eup %4706 }
0x171e   : > { %v3157_v12 = vsel %vm2700_vm12, %v4707_v11, 0.0  ;;  %v3266_v23 = vpop.permute.xlu1 %3265 }
0x171f   : > { %3158 = vadd.xlane.f32.xlu0 %v3157_v12 }
0x1721   : > { %v4709_v14 = vpop.eup %4708 }
0x1722   : > { %v3160_v63 = vsel %vm2700_vm12, %v4709_v14, 0.0 }
0x1723   : > { %3161 = vadd.xlane.f32.xlu0 %v3160_v63  ;;  %v4685_v63 = vld [vmem:[%s5652_s22] sm:$0xff]  }
0x1739   : > { %3217 = vrot.lane.b32.xlu0 %v5325_v42, %s4810_s18  ;;  %s5656_s18 = sld [smem:[#allocation24_spill]] }
0x173d   : > { %3315 = vrot.lane.b32.xlu0 %v5348_v0, %s4811_s29 }
0x17ac   : > { %v3159_v5 = vpop.xlane.xlu0 %3158 }
0x17ad   : > { %4710 = vrcp.f32 %v3159_v5  ;;  %v4686_v5 = vld [vmem:[%s5652_s22 + $0x8] sm:$0xff]  }
0x17b0   : > { %v3162_v15 = vpop.xlane.xlu0 %3161 }
0x17b1   : > { %4712 = vrcp.f32 %v3162_v15 }
0x17b4   : > { %v3218_v13 = vpop.permute.xlu0 %3217 }
0x17b5   : > { %v3223_v50 = vsel %vm1232_vm4, %v3218_v13, 0 }
0x17b6   : > { %4485 = vmatpush3.bf16.msra.mxu1 %v3223_v50 }
0x17b7   : > { %v4711_v54 = vpop.eup %4710  ;;  %4496 = vmatprep.subr.bf16.mxu1 %v4803_v10 }
0x17b8   : > { %v3164_v56 = vmul.f32 %v4711_v54, %v4707_v11  ;;  %v3316_v16 = vpop.permute.xlu0 %3315 }
0x17ba   : > { %v3167_v18 = vpack.c.bf16 %v3164_v56, %v3164_v56 }
0x17bb   : > { %v4713_v19 = vpop.eup %4712 }
0x17bc   : > { %4481 = vmatmul.mubr.msk.bf16.vlgmr.msra.gmra.mrb[24].mxu0 %vm1106_vm3, %v3167_v18  ;;  %v3166_v0 = vmul.f32 %v4713_v19, %v4709_v14 }
0x17bd   : > { %4491 = vmatpush3.bf16.xpose.msra.mxu0 %v3273_v20  ;;  %4492 = vmatprep.mubr.msk.bf16.mxu0 %vm4804_vm10, %v4803_v10 }
0x17be   : > { %v3168_v21 = vpack.c.bf16 %v3166_v0, %v3166_v0  ;;  %4502 = vmatprep.subr.bf16.mxu0 %v4803_v10 }
0x17c0   : > { %4487 = vmatmul.mubr.msk.bf16.vlgmr.msra.gmra.mrb[24].mxu1 %vm1106_vm3, %v3168_v21 }
0x17c1   : > { %4497 = vmatpush3.bf16.xpose.msra.mxu1 %v3323_v22  ;;  %4498 = vmatprep.mubr.msk.bf16.mxu1 %vm4804_vm10, %v4803_v10 }
0x17c2   : > { %4508 = vmatprep.subr.bf16.mxu1 %v4803_v10 }
0x17c4   : > { %4493 = vmatmul.mubr.msk.bf16.vlgmr.msra.gmra.mrb[28].mxu0 %vm1106_vm3, %v3266_v23 }
0x17c5   : > { %4504 = vmatprep.mubr.msk.bf16.mxu0 %vm4804_vm10, %v4803_v10 }
0x17c8   : > { %4499 = vmatmul.mubr.msk.bf16.vlgmr.msra.gmra.mrb[28].mxu1 %vm1106_vm3, %v3316_v16 }
0x17c9   : > { %4510 = vmatprep.mubr.msk.bf16.mxu1 %vm4804_vm10, %v4803_v10 }
0x188f   : > { %v3211_v24 = vpop.f32.mrb[24].mxu0 }
0x1890   : > { %v4482_v25 = vpop.f32.mrb[25].mxu0 }
0x1891   : > { %v3214_v26 = vpop.f32.mrb[26].mxu0 }
0x1892   : > { %v4483_v29 = vpop.f32.mrb[27].mxu0  ;;  %v4144_v26 = vld [vmem:[%s5653_s21] ss:$0 sm:$0xff]  ;;  %s5660_s21 = sld [smem:[#allocation28_spill]] }
0x1893   : > { %v3259_v30 = vpop.f32.mrb[24].mxu1 }
0x1894   : > { %v3501_v31 = vrot.slane %v3259_v30, 7  ;;  %v4488_v32 = vpop.f32.mrb[25].mxu1 }
0x1895   : > { %v3262_v33 = vpop.f32.mrb[26].mxu1 }
0x1896   : > { %v4489_v34 = vpop.f32.mrb[27].mxu1  ;;  %v3502_v35 = vsel %vm2446_vm11, %v3501_v31, %v3211_v24 }
0x1897   : > { %v3309_v36 = vpop.f32.mrb[28].mxu0 }
0x1898   : > { %v3365_v37 = vmul.f32 0.35355338, %v3309_v36  ;;  %v4494_v39 = vpop.f32.mrb[29].mxu0 }
0x1899   : > { %v3312_v38 = vpop.f32.mrb[30].mxu0 }
0x189a   : > { %v4495_v41 = vpop.f32.mrb[31].mxu0  ;;  %v3367_v43 = vsel %vm2700_vm12, %v3365_v37, -inf  ;;  %v4687_v38 = vld [vmem:[%s5654_s10] sm:$0xff]  }
0x189b   : > { %v3359_v44 = vpop.f32.mrb[28].mxu1  ;;  %3368 = vmax.xlane.f32.xlu1 %v3367_v43  ;;  %v4688_v41 = vld [vmem:[%s5654_s10 + $0x8] sm:$0xff]  }
0x189c   : > { %v3366_v45 = vmul.f32 0.35355338, %v3359_v44  ;;  %v4500_v47 = vpop.f32.mrb[29].mxu1 }
0x189d   : > { %v3362_v48 = vpop.f32.mrb[30].mxu1 }
0x189e   : > { %v4501_v3 = vpop.f32.mrb[31].mxu1  ;;  %v3370_v49 = vsel %vm2700_vm12, %v3366_v45, -inf  ;;  %v4148_v48 = vld [vmem:[%s5655_s30] ss:$0 sm:$0xff] }
0x189f   : > { %3371 = vmax.xlane.f32.xlu0 %v3370_v49  ;;  %v4149_v49 = vld [vmem:[%s5656_s18] ss:$0 sm:$0xff] }
0x18ac   : > { %3391 = vrot.lane.b32.xlu1 %v5323_v40, %s4812_s24 }
0x18b0   : > { %3496 = vrot.lane.b32.xlu1 %v5422_v46, %s4813_s25  ;;  %s5657_s25 = sld [smem:[#allocation27_spill]] }
0x18b4   : > { %3503 = vrot.lane.b32.xlu1 %v3502_v35, %s4814_s3 }
0x1928   : > { %v3369_v51 = vpop.xlane.xlu1 %3368 }
0x1929   : > { %v3373_v52 = vsub.f32 %v3365_v37, %v3369_v51 }
0x192b   : > { %v3375_v28 = vmul.f32 1.442695, %v3373_v52 }
0x192c   : > { %v3372_v61 = vpop.xlane.xlu0 %3371  ;;  %v3392_v1 = vpop.permute.xlu1 %3391 }
0x192d   : > { %4714 = vpow2.f32 %v3375_v28  ;;  %v3374_v55 = vsub.f32 %v3366_v45, %v3372_v61  ;;  %v3397_v57 = vsel %vm1232_vm4, %v3392_v1, 0  ;;  %v4689_v61 = vld [vmem:[%s5657_s25] sm:$0xff]  }
0x192e   : > { %4503 = vmatpush3.bf16.msra.mxu0 %v3397_v57  ;;  %v4150_v1 = vld [vmem:[%s5658_s8] ss:$0 sm:$0xff] }
0x192f   : > { %v3377_v58 = vmul.f32 1.442695, %v3374_v55  ;;  %4514 = vmatprep.subr.bf16.mxu0 %v4803_v10 }
0x1930   : > { %v3497_v0 = vpop.permute.xlu1 %3496 }
0x1931   : > { %4716 = vpow2.f32 %v3377_v58  ;;  %v3513_v22 = vsel %vm1106_vm3, %v5389_v53, %v3497_v0 }
0x1934   : > { %v3504_v21 = vpop.permute.xlu1 %3503 }
0x1935   : > { %v3514_v23 = vsel %vm2016_vm5, %v3513_v22, %v3504_v21 }
0x1937   : > { %v4715_v40 = vpop.eup %4714 }
0x1938   : > { %v3379_v59 = vsel %vm2700_vm12, %v4715_v40, 0.0 }
0x1939   : > { %3380 = vadd.xlane.f32.xlu0 %v3379_v59 }
0x193b   : > { %v4717_v46 = vpop.eup %4716 }
0x193c   : > { %v3382_v60 = vsel %vm2700_vm12, %v4717_v46, 0.0 }
0x193d   : > { %3383 = vadd.xlane.f32.xlu0 %v3382_v60 }
0x1953   : > { %3439 = vrot.lane.b32.xlu0 %v5325_v42, %s4812_s24 }
0x19c6   : > { %v3381_v62 = vpop.xlane.xlu0 %3380 }
0x19c7   : > { %4718 = vrcp.f32 %v3381_v62 }
0x19ca   : > { %v3384_v2 = vpop.xlane.xlu0 %3383 }
0x19cb   : > { %4720 = vrcp.f32 %v3384_v2 }
0x19ce   : > { %v3440_v4 = vpop.permute.xlu0 %3439 }
0x19cf   : > { %v3445_v7 = vsel %vm1232_vm4, %v3440_v4, 0 }
0x19d0   : > { %4509 = vmatpush3.bf16.msra.mxu1 %v3445_v7 }
0x19d1   : > { %v4719_v8 = vpop.eup %4718  ;;  %4522 = vmatprep.subr.bf16.mxu1 %v4803_v10 }
0x19d2   : > { %v3386_v9 = vmul.f32 %v4719_v8, %v4715_v40 }
0x19d4   : > { %v3389_v11 = vpack.c.bf16 %v3386_v9, %v3386_v9 }
0x19d5   : > { %v4721_v12 = vpop.eup %4720 }
0x19d6   : > { %4505 = vmatmul.mubr.msk.bf16.vlgmr.msra.gmra.mrb[32].mxu0 %vm1106_vm3, %v3389_v11  ;;  %v3388_v14 = vmul.f32 %v4721_v12, %v4717_v46 }
0x19d7   : > { %4518 = vmatprep.mubr.msk.bf16.mxu0 %vm4804_vm10, %v4803_v10  ;;  %4515 = vmatpush3.bf16.msra.mxu0 %v4685_v63 }
0x19d8   : > { %v3390_v42 = vpack.c.bf16 %v3388_v14, %v3388_v14  ;;  %4516 = vmatprep.subr.bf16.mxu0 %v4803_v10 }
0x19da   : > { %4511 = vmatmul.mubr.msk.bf16.vlgmr.msra.gmra.mrb[32].mxu1 %vm1106_vm3, %v3390_v42 }
0x19db   : > { %4526 = vmatprep.mubr.msk.bf16.mxu1 %vm4804_vm10, %v4803_v10  ;;  %4517 = vmatpush3.bf16.msra.mxu0 %v4686_v5 }
0x19dc   : > { %4530 = vmatprep.subr.bf16.mxu0 %v4803_v10  ;;  %4523 = vmatpush3.bf16.msra.mxu1 %v4687_v38 }
0x19dd   : > { %4524 = vmatprep.subr.bf16.mxu1 %v4803_v10 }
0x19e0   : > { %4525 = vmatpush3.bf16.msra.mxu1 %v4688_v41 }
0x19e1   : > { %4536 = vmatprep.subr.bf16.mxu1 %v4803_v10 }
0x1aa9   : > { %v3433_v15 = vpop.f32.mrb[32].mxu0 }
0x1aaa   : > { %v4506_v6 = vpop.f32.mrb[33].mxu0 }
0x1aab   : > { %v3436_v13 = vpop.f32.mrb[34].mxu0 }
0x1aac   : > { %v4507_v50 = vpop.f32.mrb[35].mxu0 }
0x1aad   : > { %v3481_v54 = vpop.f32.mrb[32].mxu1 }
0x1aae   : > { %v3508_v56 = vrot.slane %v3481_v54, 7  ;;  %v4512_v17 = vpop.f32.mrb[33].mxu1 }
0x1aaf   : > { %v3484_v18 = vpop.f32.mrb[34].mxu1 }
0x1ab0   : > { %v4513_v19 = vpop.f32.mrb[35].mxu1  ;;  %v3509_v20 = vsel %vm2446_vm11, %v3508_v56, %v3433_v15  ;;  %v4816_v56 = vmov -1.0  }
0x1ab1   : > { %3510 = vrot.lane.b32.xlu0 %v3509_v20, %s4815_s5  ;;  %s5659_s5 = sld [smem:[#allocation29_spill]] }
0x1ab7   : > { %v3794_v22 = vld [vmem:[%s5659_s5] sm:$0xf] }
0x1b23   : > { %v3511_v16 = vpop.permute.xlu0 %3510 }
0x1b24   : > { %v3515_v24 = vsel %vm2019_vm6, %v3514_v23, %v3511_v16  ;;  %v3806_v23 = vsel %vm1232_vm4, %v3794_v22, 0  ;;  %v4154_v16 = vld [vmem:[%s5660_s21] ss:$0 sm:$0xff] }
0x1b25   : > { %v3516_v25 = vpack.c.bf16 %v3515_v24, %v3515_v24 }
0x1b27   : > { %4519 = vmatmul.mubr.msk.bf16.vlgmr.msra.gmra.mrb[36].mxu0 %vm1053_vm2, %v3516_v25 }
0x1b28   : > { %4532 = vmatprep.mubr.msk.bf16.mxu0 %vm4804_vm10, %v4803_v10  ;;  %4531 = vmatpush3.bf16.msra.mxu0 %v4689_v61 }
0x1bfa   : > { %v3577_v29 = vpop.f32.mrb[36].mxu0 }
0x1bfb   : > { %v3578_v30 = vadd.f32 %v4144_v26, %v3577_v29  ;;  %v4520_v31 = vpop.f32.mrb[37].mxu0 }
0x1bfc   : > { %v3580_v53 = vpop.f32.mrb[38].mxu0 }
0x1bfd   : > { %v4521_v32 = vpop.f32.mrb[39].mxu0  ;;  %v3586_v33 = vsel %vm3585_vm13, %v3578_v30, 0.0 }
0x1bfe   : > { %3587 = vadd.xlane.f32.xlu1 %v3586_v33 }
0x1c8b   : > { %v3588_v34 = vpop.xlane.xlu1 %3587 }
0x1c8c   : > { %v3589_v35 = vmul.f32 0.03125, %v3588_v34 }
0x1c8e   : > { %v3590_v36 = vsub.f32 %v3578_v30, %v3589_v35 }
0x1c90   : > { %v3591_v37 = vmul.f32 %v3590_v36, %v3590_v36 }
0x1c92   : > { %v3592_v39 = vsel %vm3585_vm13, %v3591_v37, 0.0 }
0x1c93   : > { %3593 = vadd.xlane.f32.xlu0 %v3592_v39 }
0x1d20   : > { %v3594_v43 = vpop.xlane.xlu0 %3593 }
0x1d21   : > { %v3595_v44 = vmul.f32 0.03125, %v3594_v43 }
0x1d23   : > { %v3596_v45 = vadd.f32 1e-05, %v3595_v44 }
0x1d25   : > { %4722 = vrsqrt.f32 %v3596_v45 }
0x1d2f   : > { %v4723_v47 = vpop.eup %4722 }
0x1d30   : > { %v3598_v3 = vmul.f32 %v4723_v47, %v3590_v36 }
0x1d32   : > { %v3605_v51 = vmul.f32 %v4148_v48, %v3598_v3 }
0x1d34   : > { %v3612_v52 = vadd.f32 %v4149_v49, %v3605_v51 }
0x1d36   : > { %v3613_v28 = vpack.c.bf16 %v3612_v52, %v3612_v52 }
0x1d38   : > { %4527 = vmatmul.mubr.msk.bf16.vlgmr.msra.gmra.mrb[36].mxu1 %vm1053_vm2, %v3613_v28 }
0x1d39   : > { %4538 = vmatprep.mubr.msk.bf16.mxu1 %vm4804_vm10, %v4803_v10  ;;  %4537 = vmatpush3.bf16.msra.mxu1 %v3806_v23 }
0x1e0b   : > { %v3674_v55 = vpop.f32.mrb[36].mxu1 }
0x1e0c   : > { %v3675_v57 = vadd.f32 %v4150_v1, %v3674_v55  ;;  %v4528_v58 = vpop.f32.mrb[37].mxu1 }
0x1e0d   : > { %v3677_v40 = vpop.f32.mrb[38].mxu1 }
0x1e0e   : > { %v3681_v59 = vmul.f32 0.70710677, %v3675_v57  ;;  %v4529_v46 = vpop.f32.mrb[39].mxu1  ;;  %v3680_v19 = vmul.f32 0.5, %v3675_v57  ;;  %v4157_v40 = vld [vmem:[%s5661_s2] ss:$0 sm:$0xff] }
0x1e10   : > { %v3684_v60 = vand.u32 2147483647, %v3681_v59  ;;  %vm3682_vm14 = vcmp.ge.f32.partialorder %v3681_v59, 0.0 }
0x1e11   : > { %v3683_v17 = vsel %vm3682_vm14, 1.0, %v4816_v56 }
0x1e12   : > { %v3685_v62 = vmul.f32 0.3275911, %v3684_v60  ;;  %v3698_v10 = vsub.f32 0.0, %v3684_v60 }
0x1e14   : > { %v3686_v2 = vadd.f32 1.0, %v3685_v62  ;;  %v3699_v7 = vmul.f32 %v3698_v10, %v3684_v60 }
0x1e16   : > { %4724 = vrcp.f32 %v3686_v2  ;;  %v3700_v11 = vmul.f32 1.442695, %v3699_v7 }
0x1e18   : > { %4726 = vpow2.f32 %v3700_v11 }
0x1e20   : > { %v4725_v4 = vpop.eup %4724 }
0x1e21   : > { %v3689_v8 = vmul.f32 1.0614054, %v4725_v4 }
0x1e22   : > { %v4727_v13 = vpop.eup %4726 }
0x1e23   : > { %v3690_v9 = vadd.f32 -1.4531521, %v3689_v8 }
0x1e25   : > { %v3691_v12 = vmul.f32 %v4725_v4, %v3690_v9 }
0x1e27   : > { %v3692_v14 = vadd.f32 1.4214138, %v3691_v12 }
0x1e29   : > { %v3693_v42 = vmul.f32 %v4725_v4, %v3692_v14 }
0x1e2b   : > { %v3694_v63 = vadd.f32 -0.28449672, %v3693_v42 }
0x1e2d   : > { %v3695_v5 = vmul.f32 %v4725_v4, %v3694_v63 }
0x1e2f   : > { %v3696_v15 = vadd.f32 0.2548296, %v3695_v5 }
0x1e31   : > { %v3697_v6 = vmul.f32 %v4725_v4, %v3696_v15 }
0x1e33   : > { %v3702_v50 = vmul.f32 %v4727_v13, %v3697_v6 }
0x1e35   : > { %v3703_v54 = vsub.f32 1.0, %v3702_v50 }
0x1e37   : > { %v3704_v18 = vmul.f32 %v3703_v54, %v3683_v17 }
0x1e39   : > { %v3705_v20 = vadd.f32 1.0, %v3704_v18 }
0x1e3b   : > { %v3706_v0 = vmul.f32 %v3705_v20, %v3680_v19 }
0x1e3d   : > { %v3707_v21 = vpack.c.bf16 %v3706_v0, %v3706_v0 }
0x1e3f   : > { %4533 = vmatmul.mubr.msk.bf16.vlgmr.msra.gmra.mrb[40].mxu0 %vm2016_vm5, %v3707_v21 }
0x1f12   : > { %v3760_v24 = vpop.f32.mrb[40].mxu0 }
0x1f13   : > { %v3761_v25 = vadd.f32 %v4154_v16, %v3760_v24  ;;  %v4534_v26 = vpop.f32.mrb[41].mxu0 }
0x1f14   : > { %v3763_v29 = vpop.f32.mrb[42].mxu0 }
0x1f15   : > { %v3767_v30 = vmul.f32 0.70710677, %v3761_v25  ;;  %v4535_v31 = vpop.f32.mrb[43].mxu0  ;;  %v3766_v1 = vmul.f32 0.5, %v3761_v25 }
0x1f17   : > { %v3770_v53 = vand.u32 2147483647, %v3767_v30  ;;  %vm3768_vm15 = vcmp.ge.f32.partialorder %v3767_v30, 0.0 }
0x1f18   : > { %v3769_v28 = vsel %vm3768_vm15, 1.0, %v4816_v56 }
0x1f19   : > { %v3771_v32 = vmul.f32 0.3275911, %v3770_v53  ;;  %v3784_v34 = vsub.f32 0.0, %v3770_v53 }
0x1f1b   : > { %v3772_v33 = vadd.f32 1.0, %v3771_v32  ;;  %v3785_v36 = vmul.f32 %v3784_v34, %v3770_v53 }
0x1f1d   : > { %4728 = vrcp.f32 %v3772_v33  ;;  %v3786_v38 = vmul.f32 1.442695, %v3785_v36 }
0x1f1f   : > { %4730 = vpow2.f32 %v3786_v38 }
0x1f27   : > { %v4729_v35 = vpop.eup %4728 }
0x1f28   : > { %v3775_v37 = vmul.f32 1.0614054, %v4729_v35 }
0x1f29   : > { %v4731_v49 = vpop.eup %4730 }
0x1f2a   : > { %v3776_v39 = vadd.f32 -1.4531521, %v3775_v37 }
0x1f2c   : > { %v3777_v41 = vmul.f32 %v4729_v35, %v3776_v39 }
0x1f2e   : > { %v3778_v43 = vadd.f32 1.4214138, %v3777_v41 }
0x1f30   : > { %v3779_v44 = vmul.f32 %v4729_v35, %v3778_v43 }
0x1f32   : > { %v3780_v45 = vadd.f32 -0.28449672, %v3779_v44 }
0x1f34   : > { %v3781_v47 = vmul.f32 %v4729_v35, %v3780_v45 }
0x1f36   : > { %v3782_v48 = vadd.f32 0.2548296, %v3781_v47 }
0x1f38   : > { %v3783_v3 = vmul.f32 %v4729_v35, %v3782_v48 }
0x1f3a   : > { %v3788_v51 = vmul.f32 %v4731_v49, %v3783_v3 }
0x1f3c   : > { %v3789_v52 = vsub.f32 1.0, %v3788_v51 }
0x1f3e   : > { %v3790_v61 = vmul.f32 %v3789_v52, %v3769_v28 }
0x1f40   : > { %v3791_v55 = vadd.f32 1.0, %v3790_v61 }
0x1f42   : > { %v3792_v57 = vmul.f32 %v3791_v55, %v3766_v1 }
0x1f44   : > { %v3793_v58 = vpack.c.bf16 %v3792_v57, %v3792_v57 }
0x1f46   : > { %4539 = vmatmul.mubr.msk.bf16.vlgmr.msra.gmra.mrb[40].mxu1 %vm1106_vm3, %v3793_v58 }
0x2019   : > { %v3842_v59 = vpop.f32.mrb[40].mxu1 }
0x201a   : > { %v3843_v46 = vadd.f32 %v4157_v40, %v3842_v59  ;;  %v4540_v60 = vpop.f32.mrb[41].mxu1 }
0x201b   : > { %v3845_v62 = vpop.f32.mrb[42].mxu1 }
0x201c   : > { %v3855_v2 = vrot.slane %v3843_v46, %v5340_v27  ;;  %v4541_v10 = vpop.f32.mrb[43].mxu1 }
0x201e   : > { %v3856_v4 = vcombine.high %v3855_v2, %v3855_v2  ;;  %v3863_v7 = vrot.slane %v3855_v2, %v5340_v27 }
0x2020   : > { %v3870_v8 = vrot.slane %v3856_v4, %v5340_v27  ;;  %3874 = vst.msk [vmem:[#allocation3] sm:$0x1] %vm3873_vm0, %v3863_v7 }
0x2022   : > { %3875 = vst.msk [vmem:[#allocation3 + $0x1] sm:$0x1] %vm3873_vm0, %v3870_v8 }
0x2023 PF: > { %s5662_s28 = sld [smem:[#allocation7_spill]]  ;;  %s4817_s30 = smov [#allocation3]  }
0x2024   : > { %s3885_s4 = sshll.u32 %s4817_s30, 4  ;;  %s3886_s4 = int_to_ptr.vmem [resolvable:$true] %s3885_s4 }
0x2025   : > { %s4732_s26 = scalar_lea.vmem %s3886_s4, 32  ;;  %p4739_p11 = scmp.lt.s32.totalorder %s3886_s4, %s3886_s4 }
0x2026   : > { %p4733_p8 = scmp.ne.s32.totalorder %s3886_s4, %s4732_s26  ;;  %p4740_p12 = scmp.lt.s32.totalorder %s4732_s26, %s4732_s26 }
0x2028   : > { %p4741_p13 = por %p4740_p12, %p4739_p11 }
0x2029   : > { %s5663_s1 = sadd.s32 4294967295, %s5662_s28  }
0x202a   : > { %p5531_p7 = scmp.eq.s32.totalorder %s5663_s1, 1 }
0x202c   : > { %p4734_p9 = pnand %p4733_p8, %p5531_p7 }
0x202e   : > { %p4735_p10 = pneg %p4734_p9 }
0x2030   : > { %p4742_p0 = pnand %p4741_p13, %p4735_p10 }
0x2032   : > { %4745 = shalt.err (!%p4742_p0)
}
0x2033   : > { %s5665_s24 = sld [smem:[#allocation31_spill]] }
0x2039   : > { %s4746_s25 = scalar_lea.hbm %s5665_s24, 32 }
0x203a   : > { %p4747_p1 = scmp.ne.s32.totalorder %s5665_s24, %s4746_s25  ;;  %p4752_p4 = scmp.lt.u32.totalorder %s4746_s25, %s5665_s24 }
0x203c   : > { %p4748_p2 = pnand %p4747_p1, %p5531_p7 }
0x203e   : > { %p4749_p3 = pneg %p4748_p2 }
0x2040   : > { %p4754_p5 = pnand %p4752_p4, %p4749_p3 }
0x2042   : > { %4757 = shalt.err (!%p4754_p5)
}
0x2043   : > { %s4818_s20 = smov 1  }
0x2044   : > { %4544 = dma.vmem_to_hbm [thread:$0]  (%p5531_p7), %s3886_s4, 32, %s5665_s24, [#allocation4], %s4800_s17, %s4800_s17, %s4818_s20  }
0x2045   : > { %4771 = dma.done.wait (%p5531_p7), [#allocation4], 32  }
0x2046   : > { %4773 = vsyncadd (%p5531_p7), [#allocation4], 4294967264 }
0x2047 PF: > { %s5666_s23 = sld [smem:[#allocation7_spill]]  ;;  %s5667_s7 = sld [smem:[#allocation6_spill]] }
0x2048   : > { %s5668_s4 = sld [smem:[#allocation8_spill]] }
0x204d   : > { %s38_s8 = sadd.s32 1, %s5666_s23  }
0x204e   : > { %p35_p6 = scmp.ge.s32.totalorder %s38_s8, 4  }
0x2050   :  { %37 = sbr.rel (!%p35_p6) target bundleno = 26 (0x1a), region = 200 }
0x2057   :  { %3901 = vsyncpa [#allocation4], 1 }
0x2058   :  { %3903 = vsyncpa [#allocation4 + $0x1], 1 }

</bundles_post_ra>
